<compile_context>
chip_gen: v7x
topology: tpu7x:2x2x1
jax: 0.10.0
libtpu: 0.0.40
codegen_flags: <defaults>
</compile_context>

<pallas_src>
import jax
import jax.numpy as jnp
from jax import lax
from jax.experimental import pallas as pl
from jax.experimental.pallas import tpu as pltpu

EPS = 1e-12          # matches nn.LayerNorm((256,), eps=1e-12) in the module
HIDDEN = 256


def ln_linear_kernel(x_ref, wt_ref, b_ref, o_ref):
    # x_ref: (tm, H); wt_ref: (H_in, H_out) [MXU-native K on sublanes];
    # b_ref: (1, H_out)  (gamma/beta already folded into wt/b).
    x = x_ref[...].astype(jnp.float32)
    h = x.shape[-1]
    inv_h = jnp.float32(1.0 / h)

    # One-pass LayerNorm statistics: two independent cross-lane reductions,
    # var = E[x^2] - mean^2, clamped against cancellation going negative.
    s1 = jnp.sum(x, axis=-1, keepdims=True)
    s2 = jnp.sum(x * x, axis=-1, keepdims=True)
    mean = s1 * inv_h
    var = jnp.maximum(s2 * inv_h - mean * mean, 0.0)
    xn = (x - mean) * lax.rsqrt(var + EPS)

    # xn @ W_t: contraction over the last axis of xn and axis 0 of the
    # pre-transposed weight — the MXU-native layout, no in-kernel transpose.
    # Precision pinned so the f32 tolerance doesn't rely on a default.
    out = jnp.dot(
        xn, wt_ref[...].astype(jnp.float32),
        preferred_element_type=jnp.float32,
        precision=lax.Precision.HIGHEST,
    )
    o_ref[...] = (out + b_ref[...].astype(jnp.float32)).astype(o_ref.dtype)


def fold_ln_affine_into_linear(gamma, beta, weight, bias):
    """One-time parameter prep (outside the per-call hot path).

    weight: (H_out, H_in) torch-Linear layout.
    Returns (w_t, b_fused):
      w_t     = (weight * gamma).T        -> (H_in, H_out), MXU-native layout
      b_fused = weight @ beta + bias      -> (1, H_out)
    so that  (xn*gamma + beta) @ weight.T + bias == xn @ w_t + b_fused.
    """
    w_fused = weight * gamma[None, :].astype(weight.dtype)
    b_fused = weight.astype(jnp.float32) @ beta.astype(jnp.float32) + bias.astype(
        jnp.float32
    )
    return jnp.transpose(w_fused), b_fused.reshape(1, -1).astype(bias.dtype)


def layernorm_linear(x, w_t, b_fused, *, tm=None):
    """x: (B, S, H); w_t: (H_in, H_out) prepared by fold_ln_affine_into_linear."""
    B, S, H = x.shape
    H_in, H_out = w_t.shape
    assert H_in == H
    rows = B * S

    if tm is None:
        # 2-way row split: uses both TensorCores on v7x and gives v5e/v6e a
        # second pipeline step so LN/DMA overlap the matmul; falls back to a
        # single block when the rows can't split on an 8-row boundary.
        if rows % 2 == 0 and (rows // 2) % 8 == 0:
            tm = rows // 2
        else:
            tm = rows
    assert rows % tm == 0, "row count must be divisible by the row tile"
    assert tm % 8 == 0, "row tile must be a multiple of 8 (f32 sublane)"

    x2d = x.reshape(rows, H)

    cost = pl.CostEstimate(
        flops=2 * rows * H * H_out + 8 * rows * H,
        transcendentals=rows,  # one rsqrt per row
        bytes_accessed=4 * (rows * H + H * H_out + rows * H_out + H_out),
    )

    out2d = pl.pallas_call(
        ln_linear_kernel,
        out_shape=jax.ShapeDtypeStruct((rows, H_out), x.dtype),
        grid_spec=pltpu.PrefetchScalarGridSpec(
            num_scalar_prefetch=0,
            grid=(rows // tm,),
            in_specs=[
                pl.BlockSpec((tm, H), lambda i: (i, 0)),         # x rows
                pl.BlockSpec((H_in, H_out), lambda i: (0, 0)),   # weight (K, N), resident
                pl.BlockSpec((1, H_out), lambda i: (0, 0)),      # fused bias
            ],
            out_specs=pl.BlockSpec((tm, H_out), lambda i: (i, 0)),
        ),
        compiler_params=pltpu.CompilerParams(
            dimension_semantics=("parallel",)),
        cost_estimate=cost,
    )(x2d, w_t, b_fused)

    return out2d.reshape(B, S, H_out)


if __name__ == "__main__":
    key = jax.random.PRNGKey(0)
    kx, kw, kb, kg, kbt = jax.random.split(key, 5)

    # Input consistent with the module: (1, 384, 256)
    x = jax.random.normal(kx, (1, 384, HIDDEN), dtype=jnp.float32)

    # Deterministic synthetic parameters (non-trivial affine so folding is exercised)
    gamma = 1.0 + 0.1 * jax.random.normal(kg, (HIDDEN,), dtype=jnp.float32)
    beta = 0.1 * jax.random.normal(kbt, (HIDDEN,), dtype=jnp.float32)
    weight = jax.random.normal(kw, (HIDDEN, HIDDEN), dtype=jnp.float32) * 0.02
    bias = jax.random.normal(kb, (HIDDEN,), dtype=jnp.float32) * 0.02

    # One-time parameter prep (affine fold + transpose), then the fused kernel.
    w_t, b_fused = fold_ln_affine_into_linear(gamma, beta, weight, bias)
    out = layernorm_linear(x, w_t, b_fused)
    jax.block_until_ready(out)

    # Reference check in plain JAX (mirrors the PyTorch module forward)
    mean = jnp.mean(x, axis=-1, keepdims=True)
    var = jnp.mean((x - mean) ** 2, axis=-1, keepdims=True)
    xn = (x - mean) / jnp.sqrt(var + EPS)
    y = xn * gamma + beta
    ref = (
        jnp.einsum("bsh,oh->bso", y, weight, precision=lax.Precision.HIGHEST) + bias
    )
    assert out.shape == (1, 384, HIDDEN)
    assert jnp.allclose(out, ref, atol=1e-4, rtol=1e-4)

    print("KERNEL_OK")
</pallas_src>

<mosaic_0001>
module attributes {stable_mosaic.version = 11 : i64} {
  func.func @ln_linear_kernel(%arg0: i32, %arg1: memref<192x256xf32, #tpu.memory_space<vmem>>, %arg2: memref<256x256xf32, #tpu.memory_space<vmem>>, %arg3: memref<1x256xf32, #tpu.memory_space<vmem>>, %arg4: memref<192x256xf32, #tpu.memory_space<vmem>>) attributes {dimension_semantics = [#tpu.dimension_semantics<parallel>], iteration_bounds = array<i64: 2>, scalar_prefetch = 0 : i64, scratch_operands = 0 : i64, tpu.core_type = #tpu.core_type<tc>, window_params = [{transform_indices = @transform_0, window_bounds = array<i64: 192, 256>}, {pipeline_mode = #tpu.pipeline_mode<synchronous>, transform_indices = @transform_1, window_bounds = array<i64: 256, 256>}, {pipeline_mode = #tpu.pipeline_mode<synchronous>, transform_indices = @transform_2, window_bounds = array<i64: 1, 256>}, {transform_indices = @transform_3, window_bounds = array<i64: 192, 256>}]} {
    %c0 = arith.constant 0 : index
    %c0_0 = arith.constant 0 : index
    %0 = vector.load %arg1[%c0, %c0_0] : memref<192x256xf32, #tpu.memory_space<vmem>>, vector<192x256xf32>
    %cst = arith.constant dense<0.000000e+00> : vector<192xf32>
    %1 = vector.multi_reduction <add>, %0, %cst [1] : vector<192x256xf32> to vector<192xf32>
    %2 = vector.shape_cast %1 : vector<192xf32> to vector<192x1xf32>
    %3 = arith.mulf %0, %0 : vector<192x256xf32>
    %cst_1 = arith.constant dense<0.000000e+00> : vector<192xf32>
    %4 = vector.multi_reduction <add>, %3, %cst_1 [1] : vector<192x256xf32> to vector<192xf32>
    %5 = vector.shape_cast %4 : vector<192xf32> to vector<192x1xf32>
    %cst_2 = arith.constant 3.906250e-03 : f32
    %6 = vector.broadcast %cst_2 : f32 to vector<192x1xf32>
    %7 = arith.mulf %2, %6 : vector<192x1xf32>
    %cst_3 = arith.constant 3.906250e-03 : f32
    %8 = vector.broadcast %cst_3 : f32 to vector<192x1xf32>
    %9 = arith.mulf %5, %8 : vector<192x1xf32>
    %10 = arith.mulf %7, %7 : vector<192x1xf32>
    %11 = arith.subf %9, %10 : vector<192x1xf32>
    %cst_4 = arith.constant 0.000000e+00 : f32
    %12 = vector.broadcast %cst_4 : f32 to vector<192x1xf32>
    %13 = arith.maximumf %11, %12 : vector<192x1xf32>
    %14 = vector.broadcast %7 : vector<192x1xf32> to vector<192x256xf32>
    %15 = arith.subf %0, %14 : vector<192x256xf32>
    %cst_5 = arith.constant 9.99999996E-13 : f32
    %16 = vector.broadcast %cst_5 : f32 to vector<192x1xf32>
    %17 = arith.addf %13, %16 : vector<192x1xf32>
    %18 = math.rsqrt %17 : vector<192x1xf32>
    %19 = vector.broadcast %18 : vector<192x1xf32> to vector<192x256xf32>
    %20 = arith.mulf %15, %19 : vector<192x256xf32>
    %c0_6 = arith.constant 0 : index
    %c0_7 = arith.constant 0 : index
    %21 = vector.load %arg2[%c0_6, %c0_7] : memref<256x256xf32, #tpu.memory_space<vmem>>, vector<256x256xf32>
    %cst_8 = arith.constant dense<0.000000e+00> : vector<192x256xf32>
    %22 = tpu.matmul %20, %21, %cst_8 {dimension_numbers = #tpu.dot_dimension_numbers<[1], [0], [0], [1], [0, 0, 1, 1], [], []>, precision = #tpu.contract_precision<fp32>} : vector<192x256xf32>, vector<256x256xf32>, vector<192x256xf32> -> vector<192x256xf32>
    %c0_9 = arith.constant 0 : index
    %c0_10 = arith.constant 0 : index
    %23 = vector.load %arg3[%c0_9, %c0_10] : memref<1x256xf32, #tpu.memory_space<vmem>>, vector<1x256xf32>
    %24 = vector.broadcast %23 : vector<1x256xf32> to vector<192x256xf32>
    %25 = arith.addf %22, %24 : vector<192x256xf32>
    %c0_11 = arith.constant 0 : index
    %c0_12 = arith.constant 0 : index
    %26 = vector.load %arg4[%c0_11, %c0_12] : memref<192x256xf32, #tpu.memory_space<vmem>>, vector<192x256xf32>
    tpu.vector_store %arg4[%c0_11, %c0_12], %25 {strides = array<i32>} : memref<192x256xf32, #tpu.memory_space<vmem>>, vector<192x256xf32>,
    return
  }
  func.func @transform_0(%arg0: i32) -> (i32, i32) {
    %c0_i32 = arith.constant 0 : i32
    %c0_i32_0 = arith.constant 0 : i32
    return %arg0, %c0_i32 : i32, i32
  }
  func.func @transform_1(%arg0: i32) -> (i32, i32) {
    %c0_i32 = arith.constant 0 : i32
    %c0_i32_0 = arith.constant 0 : i32
    %c0_i32_1 = arith.constant 0 : i32
    return %c0_i32, %c0_i32_0 : i32, i32
  }
  func.func @transform_2(%arg0: i32) -> (i32, i32) {
    %c0_i32 = arith.constant 0 : i32
    %c0_i32_0 = arith.constant 0 : i32
    %c0_i32_1 = arith.constant 0 : i32
    return %c0_i32, %c0_i32_0 : i32, i32
  }
  func.func @transform_3(%arg0: i32) -> (i32, i32) {
    %c0_i32 = arith.constant 0 : i32
    %c0_i32_0 = arith.constant 0 : i32
    return %arg0, %c0_i32 : i32, i32
  }
}

</mosaic_0001>

<bundles_post_ra>
// kernel: tpu_custom_call.1
= control target key start
LH: loop header
LB: loop body
LE: loop exit
PB: predicated region body
PF: predicated region fallthrough
CT: control target
= control target key end

     0   :  { %8 = vsyncpa [#allocation3], 0  ;;  %s7173_s0 = inlined_call_operand.hbm [shape: f32[384,256], index: 0, kind: input, shape index: {}]   ;;  %s7174_s1 = inlined_call_operand.hbm [shape: f32[256,256], index: 1, kind: input, shape index: {}]   ;;  %s7175_s2 = inlined_call_operand.vmem [shape: f32[1,256], index: 2, kind: input, shape index: {}]   ;;  %s7176_s3 = inlined_call_operand.hbm [shape: f32[384,256], index: 3, kind: output, shape index: {}]  }
   0x1   :  { %10 = vsyncpa [#allocation3 + $0x1], 0 }
   0x2   :  { %11 = vsyncpa [#allocation6], 0 }
   0x3   :  { %12 = vsyncpa [#allocation4], 0 }
   0x4   :  { %14 = vsyncpa [#allocation4 + $0x1], 0  ;;  %s4649_s12 = smov 0   ;;  %s4651_s13 = smov 0  }
   0x5   :  { %s4653_s14 = smov 0   ;;  %s4655_s15 = smov 0  }
   0x6 LB: > { %s4670_s16 = sadd.s32 4294967295, %s4620_s15   ;;  %s3643_s17 = sadd.s32 4294967294, %s4620_s15   ;;  %s4620_s15 = sphi %s4655_s15, %s7968_s15   ;;  %s4616_s14 = sphi %s4653_s14, %s7967_s14   ;;  %s4612_s13 = sphi %s4651_s13, %s7966_s13   ;;  %s4608_s12 = sphi %s4649_s12, %s7965_s12  }
   0x7   : > { %p40_p0 = scmp.ne.s32.totalorder %s4612_s13, %s4608_s12  ;;  %p7177_p1 = scmp.eq.s32.totalorder %s4670_s16, 0 }
   0x8   : > { %p112_p3 = scmp.eq.s32.totalorder %s3643_s17, 1  ;;  %p3644_p5 = scmp.ge.s32.totalorder %s4620_s15, 1 }
   0x9   : > { %p4679_p4 = por %p7177_p1, %p40_p0  ;;  %p119_p7 = scmp.lt.s32.totalorder %s4620_s15, 3 }
   0xa   : > { %p4684_p6 = por %p112_p3, %p40_p0  ;;  %s4622_s21 = smov [#allocation5]  }
   0xb   : > { %s7404_s18 = scalar_select %p4679_p4, 1, 0 }
   0xc   : > { %s7405_s19 = scalar_select %p4684_p6, 1, 0 }
   0xd   : > { %p4689_p8 = pnand %p3644_p5, %p119_p7  ;;  %s131_s22 = sshll.u32 %s4622_s21, 4  ;;  %s4693_s22 = int_to_ptr.vmem [resolvable:$true] %s131_s22 }
   0xe   : > { %s4705_s24 = sadd.s32 1, %s4620_s15   ;;  %s27_s25 = sadd.s32 1, %s4616_s14 }
   0xf   : > { %s7406_s20 = scalar_select %p4689_p8, 1, 0 }
  0x10   : > { %p4343_p9 = pneg %p4689_p8  ;;  %s24_s26 = ssub.s32 %s4620_s15, %s4705_s24 }
  0x11   : > { %s4492_s29 = scalar_lea.hbm %s7174_s1, 8192 }
  0x12   : > { %p4700_p11 = pnand %p4343_p9, %p7177_p1  ;;  %p4493_p12 = scmp.ne.s32.totalorder %s7174_s1, %s4492_s29 }
  0x13   : > { %p4499_p5 = scmp.lt.u32.totalorder %s4492_s29, %s7174_s1 }
  0x14   : > { %p4494_p13 = pneg %p4700_p11 }
  0x16   : > { %p4495_p0 = pnand %p4494_p13, %p4493_p12 }
  0x18   : > { %p4496_p3 = pneg %p4495_p0 }
  0x1a   : > { %p4501_p7 = pnand %p4499_p5, %p4496_p3 }
  0x1c   : > { %4504 = shalt.err (!%p4501_p7)
}
  0x1d   : > { %s4505_s7 = scalar_lea.vmem %s4693_s22, 8192  ;;  %p4513_p2 = scmp.lt.s32.totalorder %s4693_s22, %s4693_s22 }
  0x1e   : > { %p4506_p9 = scmp.ne.s32.totalorder %s4693_s22, %s4505_s7  ;;  %p4514_p6 = scmp.lt.s32.totalorder %s4505_s7, %s4505_s7 }
  0x20   : > { %p4508_p10 = pnand %p4506_p9, %p4494_p13  ;;  %p4515_p4 = por %p4514_p6, %p4513_p2 }
  0x22   : > { %p4509_p1 = pneg %p4508_p10 }
  0x24   : > { %p4516_p8 = pnand %p4515_p4, %p4509_p1 }
  0x26   : > { %4519 = shalt.err (!%p4516_p8)
}
  0x27   : > { %s4623_s8 = smov 256   ;;  %s4624_s9 = smov 16  }
  0x28   : > { %4346 = dma.hbm_to_vmem [thread:$0]  (!%p4700_p11), %s7174_s1, 8192, %s4693_s22, [#allocation6], %s4623_s8, %s4623_s8, %s4624_s9  }
  0x29   : > { %p25_p1 = scmp.eq.s32.totalorder %s24_s26, 0  ;;  %p34_p2 = scmp.ne.s32.totalorder %s4616_s14, %s4612_s13 }
  0x2a   : > { %p35_p4 = scmp.eq.s32.totalorder %s4620_s15, 0  ;;  %p4356_p6 = scmp.lt.s32.totalorder %s4620_s15, 2 }
  0x2b   : > { %s4739_s17 = scalar_select %p25_p1, %s4616_s14, %s27_s25  }
  0x2c   : > { %p36_p8 = por %p35_p4, %p34_p2  ;;  %p7408_p10 = scmp.eq.s32.totalorder %s4670_s16, 1 }
  0x2d   : > { %s148_s23 = sand.u32 1, %s4616_s14   ;;  %s3659_s27 = smul.u32 6144, %s4620_s15 }
  0x2e   : > { %p4743_p12 = por %p7408_p10, %p34_p2  ;;  %s4333_s28 = smul.u32 384, %s148_s23 }
  0x2f   : > { %p4749_p13 = pnand %p4356_p6, %p36_p8  ;;  %s4756_s25 = scalar_lea.hbm %s7173_s0, %s3659_s27 }
  0x30   : > { %s152_s30 = scalar_lea.vmem [#allocation2], %s4333_s28  ;;  %s4760_s5 = scalar_lea.sflag [#allocation3], %s148_s23 }
  0x31   : > { %s160_s4 = sshll.u32 %s152_s30, 4  ;;  %s4520_s6 = scalar_lea.hbm %s4756_s25, 6144  ;;  %s4758_s4 = int_to_ptr.vmem [resolvable:$true] %s160_s4 }
  0x32   : > { %p4521_p11 = scmp.ne.s32.totalorder %s4756_s25, %s4520_s6  ;;  %p4522_p0 = pneg %p4749_p13 }
  0x33   : > { %s4525_s11 = scalar_lea.hbm %s7173_s0, 12288  ;;  %p4526_p7 = scmp.lt.u32.totalorder %s4756_s25, %s7173_s0 }
  0x34   : > { %p4523_p3 = pnand %p4522_p0, %p4521_p11  ;;  %p4527_p9 = scmp.lt.u32.totalorder %s4525_s11, %s4520_s6 }
  0x35   : > { %p4529_p2 = scmp.lt.u32.totalorder %s4520_s6, %s4756_s25 }
  0x36   : > { %p4524_p5 = pneg %p4523_p3  ;;  %p4528_p1 = por %p4527_p9, %p4526_p7 }
  0x38   : > { %p4530_p4 = por %p4529_p2, %p4528_p1 }
  0x3a   : > { %p4531_p6 = pnand %p4530_p4, %p4524_p5 }
  0x3c   : > { %4534 = shalt.err (!%p4531_p6)
}
  0x3d   : > { %s4535_s23 = scalar_lea.vmem %s4758_s4, 6144  ;;  %s4625_s28 = smov [#allocation2]  }
  0x3e   : > { %p4536_p8 = scmp.ne.s32.totalorder %s4758_s4, %s4535_s23  ;;  %s4540_s26 = sshll.u32 %s4625_s28, 4  ;;  %s4541_s26 = int_to_ptr.vmem [resolvable:$false] %s4540_s26 }
  0x3f   : > { %s4542_s30 = scalar_lea.vmem %s4541_s26, 12288  ;;  %p4543_p3 = scmp.lt.s32.totalorder %s4758_s4, %s4541_s26 }
  0x40   : > { %p4538_p10 = pnand %p4536_p8, %p4522_p0  ;;  %p4544_p7 = scmp.lt.s32.totalorder %s4542_s30, %s4535_s23 }
  0x42   : > { %p4539_p11 = pneg %p4538_p10  ;;  %p4545_p9 = por %p4544_p7, %p4543_p3 }
  0x44   : > { %p4546_p1 = pnand %p4545_p9, %p4539_p11 }
  0x46   : > { %4549 = shalt.err (!%p4546_p1)
}
  0x47   : > { %4350 = dma.hbm_to_vmem [thread:$0]  (!%p4749_p13), %s4756_s25, 6144, %s4758_s4, %s4760_s5, %s4623_s8, %s4623_s8, %s4624_s9  }
  0x48   : > { %p7411_p0 = scmp.ne.s32.totalorder %s7406_s20, 0 }
  0x4a   : > { %172 = sbr.rel (%p7411_p0) target bundleno = 819 (0x333), region = 32 }
  0x51   : > { %s4794_s6 = sand.u32 1, %s4612_s13   ;;  %p7412_p5 = scmp.ne.s32.totalorder %s7404_s18, 0 }
  0x52   : > { %s4334_s7 = smul.u32 384, %s4794_s6  ;;  %s175_s10 = scalar_lea.sflag [#allocation3], %s4794_s6 }
  0x54   : > { %s4800_s29 = scalar_lea.vmem [#allocation2], %s4334_s7 }
  0x55   : > { %4595 = dma.done.wait (%p7412_p5), %s175_s10, 6144  }
  0x56   : > { %4597 = vsyncadd (%p7412_p5), %s175_s10, 4294961152  ;;  %p7413_p13 = scmp.eq.s32.totalorder %s4670_s16, 0 }
  0x58   : > { %4599 = dma.done.wait (%p7413_p13), [#allocation6], 8192   ;;  %p7414_p2 = pmov %p7413_p13 }
  0x59   : > { %v209_v0 = vld [vmem:[%s4800_s29 + $0x10] sm:$0xff]  ;;  %v210_v1 = vld [vmem:[%s4800_s29 + $0x18] sm:$0xff]  ;;  %v207_v2 = vld [vmem:[%s4800_s29] sm:$0xff]  ;;  %s7026_s8 = scalar_lea.vmem [#allocation7], %s4334_s7  ;;  %s3660_s9 = smul.u32 6144, %s4670_s16 }
  0x5a   : > { %4601 = vsyncadd (%p7414_p2), [#allocation6], 4294959104  ;;  %v258_v3 = vadd.f32 %v210_v1, %v209_v0  ;;  %v208_v4 = vld [vmem:[%s4800_s29 + $0x8] sm:$0xff]  ;;  %v329_v5 = vmul.f32 %v209_v0, %v209_v0  ;;  %v330_v6 = vmul.f32 %v210_v1, %v210_v1  ;;  %v327_v7 = vmul.f32 %v207_v2, %v207_v2  ;;  %v211_v8 = vld [vmem:[%s4800_s29 + $0x20] sm:$0xff]  ;;  %s3560_s25 = sshll.u32 %s7026_s8, 4  ;;  %s3546_s16 = scalar_lea.sflag [#allocation4], %s4794_s6  ;;  %s7127_s25 = int_to_ptr.vmem [resolvable:$true] %s3560_s25 }
  0x5b   : > { %v212_v9 = vld [vmem:[%s4800_s29 + $0x28] sm:$0xff]  ;;  %v255_v10 = vadd.f32 %v208_v4, %v207_v2  ;;  %v328_v11 = vmul.f32 %v208_v4, %v208_v4  ;;  %v331_v13 = vmul.f32 %v211_v8, %v211_v8  ;;  %v213_v16 = vld [vmem:[%s4800_s29 + $0x30] sm:$0xff]  ;;  %v214_v17 = vld [vmem:[%s4800_s29 + $0x38] sm:$0xff]  ;;  %s7125_s11 = scalar_lea.hbm %s7176_s3, %s3660_s9  ;;  %s4550_s27 = scalar_lea.vmem %s7127_s25, 6144 }
  0x5c   : > { %259 = vadd.xlane.f32.xlu1 %v258_v3  ;;  %v378_v12 = vadd.f32 %v330_v6, %v329_v5  ;;  %v332_v14 = vmul.f32 %v212_v9, %v212_v9  ;;  %v333_v19 = vmul.f32 %v213_v16, %v213_v16  ;;  %v334_v20 = vmul.f32 %v214_v17, %v214_v17  ;;  %v215_v22 = vld [vmem:[%s4800_s29 + $0x40] sm:$0xff]  ;;  %v216_v23 = vld [vmem:[%s4800_s29 + $0x48] sm:$0xff]  ;;  %v217_v27 = vld [vmem:[%s4800_s29 + $0x50] sm:$0xff]  ;;  %p4551_p4 = scmp.ne.s32.totalorder %s7127_s25, %s4550_s27  ;;  %s4626_s22 = smov [#allocation7]  }
  0x5d   : > { %256 = vadd.xlane.f32.xlu0 %v255_v10  ;;  %v375_v15 = vadd.f32 %v328_v11, %v327_v7  ;;  %v261_v21 = vadd.f32 %v212_v9, %v211_v8  ;;  %v335_v25 = vmul.f32 %v215_v22, %v215_v22  ;;  %v336_v26 = vmul.f32 %v216_v23, %v216_v23  ;;  %v218_v28 = vld [vmem:[%s4800_s29 + $0x58] sm:$0xff]  ;;  %v219_v30 = vld [vmem:[%s4800_s29 + $0x60] sm:$0xff]  ;;  %v220_v31 = vld [vmem:[%s4800_s29 + $0x68] sm:$0xff]  ;;  %s4554_s23 = sshll.u32 %s4626_s22, 4  ;;  %s4555_s23 = int_to_ptr.vmem [resolvable:$false] %s4554_s23 }
  0x5e   : > { %v381_v18 = vadd.f32 %v332_v14, %v331_v13  ;;  %v384_v24 = vadd.f32 %v334_v20, %v333_v19  ;;  %v264_v29 = vadd.f32 %v214_v17, %v213_v16  ;;  %v221_v32 = vld [vmem:[%s4800_s29 + $0x70] sm:$0xff]  ;;  %v337_v33 = vmul.f32 %v217_v27, %v217_v27  ;;  %v222_v35 = vld [vmem:[%s4800_s29 + $0x78] sm:$0xff]  ;;  %v223_v36 = vld [vmem:[%s4800_s29 + $0x80] sm:$0xff]  ;;  %p4552_p6 = pnand %p4551_p4, %p4743_p12  ;;  %s4556_s28 = scalar_lea.vmem %s4555_s23, 12288 }
  0x5f   : > { %v338_v34 = vmul.f32 %v218_v28, %v218_v28  ;;  %v224_v37 = vld [vmem:[%s4800_s29 + $0x88] sm:$0xff]  ;;  %v387_v38 = vadd.f32 %v336_v26, %v335_v25  ;;  %v225_v39 = vld [vmem:[%s4800_s29 + $0x90] sm:$0xff]  ;;  %v226_v40 = vld [vmem:[%s4800_s29 + $0x98] sm:$0xff]  ;;  %v267_v42 = vadd.f32 %v216_v23, %v215_v22  ;;  %v270_v43 = vadd.f32 %v218_v28, %v217_v27  ;;  %p4557_p10 = scmp.lt.s32.totalorder %s7127_s25, %s4555_s23  ;;  %p4558_p11 = scmp.lt.s32.totalorder %s4556_s28, %s4550_s27 }
  0x60   : > { %379 = vadd.xlane.f32.xlu1 %v378_v12  ;;  %v227_v41 = vld [vmem:[%s4800_s29 + $0xa0] sm:$0xff]  ;;  %v339_v44 = vmul.f32 %v219_v30, %v219_v30  ;;  %v340_v45 = vmul.f32 %v220_v31, %v220_v31  ;;  %v228_v46 = vld [vmem:[%s4800_s29 + $0xa8] sm:$0xff]  ;;  %v229_v47 = vld [vmem:[%s4800_s29 + $0xb0] sm:$0xff]  ;;  %v341_v49 = vmul.f32 %v221_v32, %v221_v32  ;;  %v342_v50 = vmul.f32 %v222_v35, %v222_v35  ;;  %p4553_p8 = pneg %p4552_p6 }
  0x61   : > { %376 = vadd.xlane.f32.xlu0 %v375_v15  ;;  %v230_v48 = vld [vmem:[%s4800_s29 + $0xb8] sm:$0xff]  ;;  %v343_v51 = vmul.f32 %v223_v36, %v223_v36  ;;  %v344_v52 = vmul.f32 %v224_v37, %v224_v37  ;;  %v390_v53 = vadd.f32 %v338_v34, %v337_v33  ;;  %v273_v54 = vadd.f32 %v220_v31, %v219_v30  ;;  %v231_v61 = vld [vmem:[%s4800_s29 + $0xc0] sm:$0xff]  ;;  %v232_v62 = vld [vmem:[%s4800_s29 + $0xc8] sm:$0xff]  ;;  %p4559_p3 = por %p4558_p11, %p4557_p10 }
  0x62   : > { %v345_v55 = vmul.f32 %v225_v39, %v225_v39  ;;  %v346_v56 = vmul.f32 %v226_v40, %v226_v40  ;;  %v347_v57 = vmul.f32 %v227_v41, %v227_v41  ;;  %v348_v58 = vmul.f32 %v228_v46, %v228_v46  ;;  %v233_v3 = vld [vmem:[%s4800_s29 + $0xd0] sm:$0xff]  ;;  %v234_v4 = vld [vmem:[%s4800_s29 + $0xd8] sm:$0xff]  ;;  %v235_v5 = vld [vmem:[%s4800_s29 + $0xe0] sm:$0xff] }
  0x63   : > { %v349_v59 = vmul.f32 %v229_v47, %v229_v47  ;;  %v350_v60 = vmul.f32 %v230_v48, %v230_v48  ;;  %v393_v63 = vadd.f32 %v340_v45, %v339_v44  ;;  %v4836_v0 = vadd.f32 %v222_v35, %v221_v32  ;;  %v236_v10 = vld [vmem:[%s4800_s29 + $0xe8] sm:$0xff]  ;;  %v4856_v12 = vld [vmem:[#allocation5 + $0x18] sm:$0xff]  ;;  %v711_v17 = vld [vmem:[#allocation5] sm:$0xff]  ;;  %p4560_p7 = pnand %p4559_p3, %p4553_p8 }
  0x64   : > { %382 = vadd.xlane.f32.xlu1 %v381_v18  ;;  %v4838_v1 = vadd.f32 %v224_v37, %v223_v36  ;;  %v4840_v2 = vadd.f32 %v226_v40, %v225_v39  ;;  %v4845_v6 = vadd.f32 %v342_v50, %v341_v49  ;;  %v4847_v7 = vadd.f32 %v344_v52, %v343_v51  ;;  %v4854_v11 = vld [vmem:[#allocation5 + $0x8] sm:$0xff]  ;;  %v713_v18 = vld [vmem:[#allocation5 + $0x10] sm:$0xff]  ;;  %v4874_v25 = vld [vmem:[%s4800_s29 + $0xf8] sm:$0xff] }
  0x65   : > { %262 = vadd.xlane.f32.xlu0 %v261_v21  ;;  %v4849_v8 = vadd.f32 %v228_v46, %v227_v41  ;;  %v4851_v9 = vadd.f32 %v230_v48, %v229_v47  ;;  %v4858_v13 = vadd.f32 %v346_v56, %v345_v55  ;;  %v4860_v14 = vadd.f32 %v232_v62, %v231_v61  ;;  %v716_v19 = vld [vmem:[#allocation5 + $0x28] sm:$0xff]  ;;  %v718_v30 = vld [vmem:[#allocation5 + $0x38] sm:$0xff]  ;;  %v715_v35 = vld [vmem:[#allocation5 + $0x20] sm:$0xff] }
  0x66   : > { %v351_v15 = vmul.f32 %v231_v61, %v231_v61  ;;  %v352_v16 = vmul.f32 %v232_v62, %v232_v62  ;;  %v4862_v20 = vadd.f32 %v348_v58, %v347_v57  ;;  %v4864_v21 = vadd.f32 %v350_v60, %v349_v59  ;;  %v717_v36 = vld [vmem:[#allocation5 + $0x30] sm:$0xff]  ;;  %v720_v37 = vld [vmem:[#allocation5 + $0x48] sm:$0xff]  ;;  %v723_v59 = vld [vmem:[#allocation5 + $0x60] sm:$0xff] }
  0x67   : > { %v4866_v22 = vadd.f32 %v234_v4, %v233_v3  ;;  %v4868_v23 = vmul.f32 %v233_v3, %v233_v3  ;;  %v4876_v26 = vmul.f32 %v234_v4, %v234_v4  ;;  %v4878_v27 = vadd.f32 %v236_v10, %v235_v5  ;;  %v721_v52 = vld [vmem:[#allocation5 + $0x50] sm:$0xff]  ;;  %v728_v4 = vld [vmem:[#allocation5 + $0x88] sm:$0xff] }
  0x68   : > { %385 = vadd.xlane.f32.xlu1 %v384_v24  ;;  %v4871_v24 = vld [vmem:[%s4800_s29 + $0xf0] sm:$0xff]  ;;  %v7181_v28 = vand.u32 4294901760, %v4854_v11  ;;  %v4882_v31 = vmul.f32 %v235_v5, %v235_v5  ;;  %v789_v32 = vand.u32 4294901760, %v711_v17  ;;  %v793_v33 = vand.u32 4294901760, %v713_v18  ;;  %v730_v5 = vld [vmem:[#allocation5 + $0x98] sm:$0xff] }
  0x69   : > { %265 = vadd.xlane.f32.xlu0 %v264_v29  ;;  %v7180_v29 = vand.u32 4294901760, %v4856_v12  ;;  %v795_v34 = vand.u32 4294901760, %v716_v19  ;;  %v4886_v39 = vmul.f32 %v236_v10, %v236_v10  ;;  %v4890_v40 = vadd.f32 %v4874_v25, %v4871_v24  ;;  %v725_v60 = vld [vmem:[#allocation5 + $0x70] sm:$0xff] }
  0x6a   : > { %v4898_v44 = vpack.c.bf16 %v793_v33, %v789_v32  ;;  %v4900_v45 = vsub.f32 %v711_v17, %v789_v32  ;;  %v4902_v46 = vsub.f32 %v713_v18, %v793_v33  ;;  %v799_v47 = vand.u32 4294901760, %v718_v30  ;;  %v727_v18 = vld [vmem:[#allocation5 + $0x80] sm:$0xff] }
  0x6b   : > { %v4896_v41 = vpack.c.bf16 %v7180_v29, %v7181_v28  ;;  %v4905_v48 = vsub.f32 %v716_v19, %v795_v34  ;;  %v797_v49 = vand.u32 4294901760, %v715_v35  ;;  %v801_v50 = vand.u32 4294901760, %v717_v36 }
  0x6c   : > { %388 = vadd.xlane.f32.xlu1 %v387_v38  ;;  %v4884_v38 = vadd.f32 %v352_v16, %v351_v15  ;;  %7416 = vst [vmem:[#allocation12_spill] sm:$0xff] %v4898_v44  ;;  %7417 = vst [vmem:[#allocation13_spill] sm:$0xff] %v4900_v45  ;;  %v803_v51 = vand.u32 4294901760, %v720_v37  ;;  %v4909_v55 = vpack.c.bf16 %v799_v47, %v795_v34  ;;  %v809_v16 = vand.u32 4294901760, %v721_v52  ;;  %v729_v34 = vld [vmem:[#allocation5 + $0x90] sm:$0xff] }
  0x6d   : > { %268 = vadd.xlane.f32.xlu0 %v267_v42  ;;  %7415 = vst [vmem:[#allocation11_spill] sm:$0xff] %v4896_v41  ;;  %v722_v42 = vld [vmem:[#allocation5 + $0x58] sm:$0xff]  ;;  %7418 = vst [vmem:[#allocation14_spill] sm:$0xff] %v4902_v46  ;;  %3854 = vmatprep.subr.bf16.mxu0 %v4896_v41  ;;  %v4911_v56 = vsub.f32 %v718_v30, %v799_v47  ;;  %v4914_v61 = vpack.c.bf16 %v801_v50, %v797_v49  ;;  %v813_v32 = vand.u32 4294901760, %v723_v59 }
  0x6e   : > { %7419 = vst [vmem:[#allocation15_spill] sm:$0xff] %v4905_v48  ;;  %3856 = vmatpush1.bf16.msra.mxu0 %v4898_v44  ;;  %3662 = vmatprep.subr.bf16.mxu1 %v4896_v41  ;;  %7420 = vst [vmem:[#allocation16_spill] sm:$0xff] %v4909_v55  ;;  %v807_v57 = vand.u32 4294901760, %v722_v42  ;;  %v4916_v62 = vsub.f32 %v715_v35, %v797_v49  ;;  %v4920_v3 = vsub.f32 %v720_v37, %v803_v51  ;;  %v732_v49 = vld [vmem:[#allocation5 + $0xa8] sm:$0xff] }
  0x6f   : > { %7421 = vst [vmem:[#allocation17_spill] sm:$0xff] %v4911_v56  ;;  %3664 = vmatpush1.bf16.msra.mxu1 %v4898_v44  ;;  %7422 = vst [vmem:[#allocation18_spill] sm:$0xff] %v4914_v61  ;;  %3858 = vmatprep.subr.bf16.mxu0 %v4909_v55  ;;  %v817_v33 = vand.u32 4294901760, %v725_v60  ;;  %v4935_v35 = vsub.f32 %v721_v52, %v809_v16  ;;  %v823_v37 = vand.u32 4294901760, %v730_v5  ;;  %v821_v47 = vand.u32 4294901760, %v727_v18  ;;  %v5009_v44 = vld [vmem:[#allocation5 + $0xf0] sm:$0xff] }
  0x70   : > { %391 = vadd.xlane.f32.xlu1 %v390_v53  ;;  %v724_v53 = vld [vmem:[#allocation5 + $0x68] sm:$0xff]  ;;  %7423 = vst [vmem:[#allocation19_spill] sm:$0xff] %v4916_v62  ;;  %7425 = vst [vmem:[#allocation21_spill] sm:$0xff] %v4920_v3  ;;  %v4924_v10 = vpack.c.bf16 %v807_v57, %v803_v51  ;;  %v4926_v15 = vsub.f32 %v722_v42, %v807_v57  ;;  %3666 = vmatprep.subr.bf16.mxu1 %v4909_v55 }
  0x71   : > { %271 = vadd.xlane.f32.xlu0 %v270_v43  ;;  %v719_v43 = vld [vmem:[#allocation5 + $0x40] sm:$0xff]  ;;  %v811_v19 = vand.u32 4294901760, %v724_v53  ;;  %7430 = vst [vmem:[#allocation26_spill] sm:$0xff] %v4935_v35  ;;  %v4948_v51 = vmul.f32 %v4871_v24, %v4871_v24  ;;  %v4951_v52 = vsub.f32 %v723_v59, %v813_v32  ;;  %v4953_v57 = vsub.f32 %v725_v60, %v817_v33  ;;  %v738_v59 = vld [vmem:[#allocation5 + $0xd8] sm:$0xff] }
  0x72   : > { %v805_v58 = vand.u32 4294901760, %v719_v43  ;;  %7426 = vst [vmem:[#allocation22_spill] sm:$0xff] %v4924_v10  ;;  %7427 = vst [vmem:[#allocation23_spill] sm:$0xff] %v4926_v15  ;;  %3860 = vmatpush1.bf16.msra.mxu0 %v4914_v61  ;;  %v4964_v24 = vsub.f32 %v730_v5, %v823_v37  ;;  %v4968_v60 = vld [vmem:[#allocation5 + $0xc0] sm:$0xff]  ;;  %v4971_v29 = vpack.c.bf16 %v817_v33, %v813_v32 }
  0x73   : > { %3668 = vmatpush1.bf16.msra.mxu1 %v4914_v61  ;;  %3862 = vmatprep.subr.bf16.mxu0 %v4924_v10  ;;  %v4941_v42 = vsub.f32 %v724_v53, %v811_v19  ;;  %7434 = vst [vmem:[#allocation30_spill] sm:$0xff] %v4951_v52  ;;  %7435 = vst [vmem:[#allocation31_spill] sm:$0xff] %v4953_v57  ;;  %v731_v53 = vld [vmem:[#allocation5 + $0xa0] sm:$0xff]  ;;  %v4994_v61 = vld [vmem:[#allocation5 + $0xf8] sm:$0xff] }
  0x74   : > { %394 = vadd.xlane.f32.xlu1 %v393_v63  ;;  %v4918_v63 = vsub.f32 %v717_v36, %v801_v50  ;;  %v4928_v17 = vsub.f32 %v719_v43, %v805_v58  ;;  %v819_v36 = vand.u32 4294901760, %v728_v4  ;;  %v734_v50 = vld [vmem:[#allocation5 + $0xb8] sm:$0xff]  ;;  %3670 = vmatprep.subr.bf16.mxu1 %v4924_v10  ;;  %7437 = vst [vmem:[#allocation33_spill] sm:$0xff] %v4964_v24  ;;  %7439 = vst [vmem:[#allocation35_spill] sm:$0xff] %v4971_v29  ;;  %v4984_v32 = vld [vmem:[%s4800_s29 + $0x100] sm:$0xff] }
  0x75   : > { %274 = vadd.xlane.f32.xlu0 %v273_v54  ;;  %v726_v54 = vld [vmem:[#allocation5 + $0x78] sm:$0xff]  ;;  %7432 = vst [vmem:[#allocation28_spill] sm:$0xff] %v4941_v42  ;;  %v831_v10 = vand.u32 4294901760, %v734_v50 }
  0x76   : > { %7424 = vst [vmem:[#allocation20_spill] sm:$0xff] %v4918_v63  ;;  %7428 = vst [vmem:[#allocation24_spill] sm:$0xff] %v4928_v17  ;;  %v815_v30 = vand.u32 4294901760, %v726_v54 }
  0x78   : > { %397 = vadd.xlane.f32.xlu1 %v4845_v6  ;;  %v4933_v6 = vpack.c.bf16 %v809_v16, %v805_v58  ;;  %v4943_v43 = vsub.f32 %v726_v54, %v815_v30  ;;  %v825_v58 = vand.u32 4294901760, %v729_v34  ;;  %v733_v16 = vld [vmem:[#allocation5 + $0xb0] sm:$0xff]  ;;  %v4955_v54 = vld [vmem:[#allocation5 + $0xc8] sm:$0xff] }
  0x79   : > { %277 = vadd.xlane.f32.xlu0 %v4836_v0  ;;  %v4939_v0 = vpack.c.bf16 %v815_v30, %v811_v19  ;;  %v4962_v19 = vsub.f32 %v728_v4, %v819_v36  ;;  %v4966_v30 = vsub.f32 %v727_v18, %v821_v47  ;;  %v833_v4 = vand.u32 4294901760, %v733_v16  ;;  %v4980_v18 = vld [vmem:[#allocation5 + $0xd0] sm:$0xff] }
  0x7a   : > { %7429 = vst [vmem:[#allocation25_spill] sm:$0xff] %v4933_v6  ;;  %7433 = vst [vmem:[#allocation29_spill] sm:$0xff] %v4943_v43  ;;  %3864 = vmatpush1.bf16.msra.mxu0 %v4933_v6  ;;  %v4973_v28 = vsub.f32 %v729_v34, %v825_v58  ;;  %3672 = vmatpush1.bf16.msra.mxu1 %v4933_v6  ;;  %v835_v5 = vand.u32 4294901760, %v4955_v54  ;;  %v4989_v34 = vsub.f32 %v734_v50, %v831_v10  ;;  %v5007_v50 = vld [vmem:[#allocation5 + $0xe0] sm:$0xff] }
  0x7b   : > { %7431 = vst [vmem:[#allocation27_spill] sm:$0xff] %v4939_v0  ;;  %7436 = vst [vmem:[#allocation32_spill] sm:$0xff] %v4962_v19  ;;  %3866 = vmatprep.subr.bf16.mxu0 %v4939_v0  ;;  %3674 = vmatprep.subr.bf16.mxu1 %v4939_v0  ;;  %v839_v6 = vand.u32 4294901760, %v738_v59  ;;  %v5001_v55 = vpack.c.bf16 %v825_v58, %v821_v47  ;;  %v7449_v47 = vand.u32 4294901760, %v4968_v60 }
  0x7c   : > { %400 = vadd.xlane.f32.xlu1 %v4847_v7  ;;  %v4960_v7 = vadd.f32 %v4876_v26, %v4868_v23  ;;  %7438 = vst [vmem:[#allocation34_spill] sm:$0xff] %v4966_v30  ;;  %7440 = vst [vmem:[#allocation36_spill] sm:$0xff] %v4973_v28  ;;  %v4977_v23 = vpack.c.bf16 %v823_v37, %v819_v36  ;;  %v829_v26 = vand.u32 4294901760, %v731_v53  ;;  %v4992_v37 = vld [vmem:[#allocation5 + $0xe8] sm:$0xff]  ;;  %v5223_v28 = vld [vmem:[#allocation5 + $0x190] sm:$0xff] }
  0x7d   : > { %280 = vadd.xlane.f32.xlu0 %v4838_v1  ;;  %v827_v1 = vand.u32 4294901760, %v732_v49  ;;  %7443 = vst [vmem:[#allocation39_spill] sm:$0xff] %v4989_v34  ;;  %7444 = vst [vmem:[#allocation40_spill] sm:$0xff] %v5001_v55  ;;  %v5011_v36 = vld [vmem:[#allocation5 + $0x108] sm:$0xff]  ;;  %v5017_v41 = vsub.f32 %v738_v59, %v839_v6  ;;  %v5023_v58 = vsub.f32 %v4968_v60, %v7449_v47  ;;  %v843_v59 = vand.u32 4294901760, %v4992_v37  ;;  %v5156_v34 = vld [vmem:[#allocation5 + $0x160] sm:$0xff] }
  0x7e   : > { %7441 = vst [vmem:[#allocation37_spill] sm:$0xff] %v4977_v23  ;;  %v5003_v0 = vsub.f32 %v731_v53, %v829_v26  ;;  %3868 = vmatpush1.bf16.msra.mxu0 %v4971_v29  ;;  %v5025_v53 = vld [vmem:[#allocation5 + $0x118] sm:$0xff]  ;;  %3676 = vmatpush1.bf16.msra.mxu1 %v4971_v29  ;;  %v5063_v29 = vld [vmem:[#allocation5 + $0x120] sm:$0xff]  ;;  %v5225_v30 = vld [vmem:[#allocation5 + $0x1a8] sm:$0xff] }
  0x7f   : > { %v4987_v33 = vsub.f32 %v732_v49, %v827_v1  ;;  %v5005_v49 = vsub.f32 %v733_v16, %v833_v4  ;;  %7448 = vst [vmem:[#allocation44_spill] sm:$0xff] %v5017_v41  ;;  %7450 = vst [vmem:[#allocation45_spill] sm:$0xff] %v5023_v58  ;;  %v5029_v16 = vmul.f32 %v4984_v32, %v4984_v32  ;;  %3870 = vmatprep.subr.bf16.mxu0 %v4977_v23  ;;  %v5061_v58 = vld [vmem:[#allocation5 + $0x138] sm:$0xff] }
  0x80   : > { %403 = vadd.xlane.f32.xlu1 %v4858_v13  ;;  %v4999_v13 = vmul.f32 %v4874_v25, %v4874_v25  ;;  %7445 = vst [vmem:[#allocation41_spill] sm:$0xff] %v5003_v0  ;;  %v841_v25 = vand.u32 4294901760, %v4980_v18  ;;  %v847_v41 = vand.u32 4294901760, %v4994_v61  ;;  %3678 = vmatprep.subr.bf16.mxu1 %v4977_v23  ;;  %v5055_v23 = vsub.f32 %v4992_v37, %v843_v59 }
  0x81   : > { %7442 = vst [vmem:[#allocation38_spill] sm:$0xff] %v4987_v33  ;;  %283 = vadd.xlane.f32.xlu0 %v4840_v2  ;;  %7446 = vst [vmem:[#allocation42_spill] sm:$0xff] %v5005_v49  ;;  %v5015_v2 = vsub.f32 %v4955_v54, %v835_v5  ;;  %v5033_v54 = vpack.c.bf16 %v831_v10, %v827_v1  ;;  %v5045_v49 = vld [vmem:[#allocation5 + $0x100] sm:$0xff]  ;;  %v5047_v10 = vld [vmem:[#allocation5 + $0x110] sm:$0xff] }
  0x82   : > { %v5040_v47 = vsub.f32 %v4980_v18, %v841_v25  ;;  %v5049_v1 = vld [vmem:[#allocation5 + $0x128] sm:$0xff]  ;;  %7454 = vst [vmem:[#allocation49_spill] sm:$0xff] %v5055_v23  ;;  %v5058_v18 = vsub.f32 %v4994_v61, %v847_v41  ;;  %3872 = vmatpush1.bf16.msra.mxu0 %v5001_v55  ;;  %v7459_v61 = vand.u32 4294901760, %v5009_v44  ;;  %3680 = vmatpush1.bf16.msra.mxu1 %v5001_v55 }
  0x83   : > { %7447 = vst [vmem:[#allocation43_spill] sm:$0xff] %v5015_v2  ;;  %7451 = vst [vmem:[#allocation46_spill] sm:$0xff] %v5033_v54  ;;  %v7461_v2 = vand.u32 4294901760, %v5011_v36  ;;  %v5085_v23 = vld [vmem:[#allocation5 + $0x148] sm:$0xff]  ;;  %3874 = vmatprep.subr.bf16.mxu0 %v5033_v54  ;;  %3682 = vmatprep.subr.bf16.mxu1 %v5033_v54  ;;  %v5142_v0 = vpack.c.bf16 %v847_v41, %v843_v59 }
  0x84   : > { %406 = vadd.xlane.f32.xlu1 %v4862_v20  ;;  %7452 = vst [vmem:[#allocation47_spill] sm:$0xff] %v5040_v47  ;;  %v5052_v20 = vpack.c.bf16 %v833_v4, %v829_v26  ;;  %7455 = vst [vmem:[#allocation50_spill] sm:$0xff] %v5058_v18  ;;  %v5065_v47 = vld [vmem:[#allocation5 + $0x130] sm:$0xff]  ;;  %v7457_v26 = vand.u32 4294901760, %v5007_v50  ;;  %v5078_v37 = vsub.f32 %v5009_v44, %v7459_v61  ;;  %v5103_v55 = vld [vmem:[%s4800_s29 + $0x108] sm:$0xff]  ;;  %v7480_v59 = vand.u32 4294901760, %v5085_v23 }
  0x85   : > { %286 = vadd.xlane.f32.xlu0 %v4849_v8  ;;  %v5068_v8 = vpack.c.bf16 %v839_v6, %v835_v5  ;;  %v5083_v18 = vsub.f32 %v5011_v36, %v7461_v2  ;;  %v7463_v6 = vand.u32 4294901760, %v5025_v53  ;;  %v5100_v2 = vadd.f32 %v4886_v39, %v4882_v31  ;;  %v5111_v61 = vld [vmem:[#allocation5 + $0x140] sm:$0xff]  ;;  %7473 = vst [vmem:[#allocation60_spill] sm:$0xff] %v5142_v0 }
  0x86   : > { %7453 = vst [vmem:[#allocation48_spill] sm:$0xff] %v5052_v20  ;;  %v5073_v4 = vsub.f32 %v5007_v50, %v7457_v26  ;;  %7460 = vst [vmem:[#allocation53_spill] sm:$0xff] %v5078_v37  ;;  %v7465_v31 = vand.u32 4294901760, %v5045_v49  ;;  %v7467_v37 = vand.u32 4294901760, %v5047_v10  ;;  %v7469_v26 = vand.u32 4294901760, %v5049_v1  ;;  %3876 = vmatpush1.bf16.msra.mxu0 %v5052_v20  ;;  %3684 = vmatpush1.bf16.msra.mxu1 %v5052_v20 }
  0x87   : > { %7456 = vst [vmem:[#allocation51_spill] sm:$0xff] %v5068_v8  ;;  %7462 = vst [vmem:[#allocation54_spill] sm:$0xff] %v5083_v18  ;;  %v5092_v5 = vsub.f32 %v5025_v53, %v7463_v6  ;;  %3878 = vmatprep.subr.bf16.mxu0 %v5068_v8  ;;  %v7478_v41 = vand.u32 4294901760, %v5065_v47  ;;  %v5177_v20 = vmul.f32 %v5103_v55, %v5103_v55  ;;  %3686 = vmatprep.subr.bf16.mxu1 %v5068_v8 }
  0x88   : > { %7458 = vst [vmem:[#allocation52_spill] sm:$0xff] %v5073_v4  ;;  %409 = vadd.xlane.f32.xlu1 %v4864_v21  ;;  %v5115_v21 = vld [vmem:[%s4800_s29 + $0x110] sm:$0xff]  ;;  %v5120_v39 = vsub.f32 %v5045_v49, %v7465_v31  ;;  %v5125_v18 = vsub.f32 %v5047_v10, %v7467_v37  ;;  %v5130_v6 = vsub.f32 %v5049_v1, %v7469_v26  ;;  %v5135_v4 = vld [vmem:[#allocation5 + $0x168] sm:$0xff]  ;;  %v7471_v31 = vand.u32 4294901760, %v4968_v60 }
  0x89   : > { %7464 = vst [vmem:[#allocation55_spill] sm:$0xff] %v5092_v5  ;;  %v5109_v5 = vld [vmem:[#allocation5 + $0x158] sm:$0xff]  ;;  %289 = vadd.xlane.f32.xlu0 %v4851_v9  ;;  %v5133_v9 = vld [vmem:[#allocation5 + $0x150] sm:$0xff]  ;;  %v7474_v37 = vand.u32 4294901760, %v5061_v58  ;;  %v7476_v26 = vand.u32 4294901760, %v5063_v29  ;;  %v5163_v60 = vsub.f32 %v5065_v47, %v7478_v41  ;;  %v5181_v41 = vmul.f32 %v5115_v21, %v5115_v21 }
  0x8a   : > { %7466 = vst [vmem:[#allocation56_spill] sm:$0xff] %v5120_v39  ;;  %7468 = vst [vmem:[#allocation57_spill] sm:$0xff] %v5125_v18  ;;  %v5140_v39 = vpack.c.bf16 %v841_v25, %v7471_v31  ;;  %v5169_v31 = vsub.f32 %v5085_v23, %v7480_v59  ;;  %v5203_v59 = vld [vmem:[#allocation5 + $0x180] sm:$0xff]  ;;  %v7489_v33 = vand.u32 4294901760, %v5133_v9  ;;  %v7491_v8 = vand.u32 4294901760, %v5135_v4 }
  0x8b   : > { %7470 = vst [vmem:[#allocation58_spill] sm:$0xff] %v5130_v6  ;;  %v5147_v18 = vsub.f32 %v5061_v58, %v7474_v37  ;;  %v5152_v54 = vsub.f32 %v5063_v29, %v7476_v26  ;;  %v5154_v6 = vld [vmem:[#allocation5 + $0x178] sm:$0xff]  ;;  %7479 = vst [vmem:[#allocation63_spill] sm:$0xff] %v5163_v60  ;;  %v5172_v26 = vld [vmem:[#allocation5 + $0x170] sm:$0xff]  ;;  %v7484_v60 = vand.u32 4294901760, %v5111_v61 }
  0x8c   : > { %7472 = vst [vmem:[#allocation59_spill] sm:$0xff] %v5140_v39  ;;  %7481 = vst [vmem:[#allocation64_spill] sm:$0xff] %v5169_v31  ;;  %412 = vadd.xlane.f32.xlu1 %v4884_v38  ;;  %v5186_v31 = vld [vmem:[#allocation5 + $0x188] sm:$0xff]  ;;  %v7482_v38 = vand.u32 4294901760, %v5109_v5  ;;  %3880 = vmatpush1.bf16.msra.mxu0 %v5140_v39  ;;  %v5220_v25 = vsub.f32 %v5135_v4, %v7491_v8 }
  0x8d   : > { %7475 = vst [vmem:[#allocation61_spill] sm:$0xff] %v5147_v18  ;;  %7477 = vst [vmem:[#allocation62_spill] sm:$0xff] %v5152_v54  ;;  %292 = vadd.xlane.f32.xlu0 %v4860_v14  ;;  %v5197_v54 = vsub.f32 %v5111_v61, %v7484_v60  ;;  %v5201_v18 = vld [vmem:[#allocation5 + $0x198] sm:$0xff]  ;;  %v7486_v14 = vand.u32 4294901760, %v5007_v50  ;;  %v5215_v60 = vsub.f32 %v5133_v9, %v7489_v33  ;;  %3688 = vmatpush1.bf16.msra.mxu1 %v5140_v39  ;;  %v5261_v39 = vld [vmem:[#allocation5 + $0x1b0] sm:$0xff] }
  0x8e   : > { %v5192_v37 = vsub.f32 %v5109_v5, %v7482_v38  ;;  %v7487_v38 = vand.u32 4294901760, %v5009_v44  ;;  %7492 = vst [vmem:[#allocation69_spill] sm:$0xff] %v5220_v25  ;;  %3882 = vmatprep.subr.bf16.mxu0 %v5142_v0  ;;  %v7493_v44 = vand.u32 4294901760, %v5011_v36  ;;  %v7494_v33 = vand.u32 4294901760, %v5025_v53  ;;  %v5246_v25 = vld [vmem:[#allocation5 + $0x1b8] sm:$0xff]  ;;  %v5248_v36 = vld [vmem:[#allocation5 + $0x1a0] sm:$0xff]  ;;  %3690 = vmatprep.subr.bf16.mxu1 %v5142_v0 }
  0x8f   : > { %7485 = vst [vmem:[#allocation66_spill] sm:$0xff] %v5197_v54  ;;  %7490 = vst [vmem:[#allocation68_spill] sm:$0xff] %v5215_v60  ;;  %v420_v53 = vadd.f32 %v4999_v13, %v4948_v51  ;;  %v7505_v13 = vand.u32 4294901760, %v5186_v31  ;;  %v5320_v60 = vld [vmem:[#allocation5 + $0x1e8] sm:$0xff] }
  0x90   : > { %7483 = vst [vmem:[#allocation65_spill] sm:$0xff] %v5192_v37  ;;  %v5210_v37 = vpack.c.bf16 %v7487_v38, %v7486_v14  ;;  %v5233_v50 = vpack.c.bf16 %v7494_v33, %v7493_v44  ;;  %v7496_v14 = vand.u32 4294901760, %v5154_v6  ;;  %v7498_v38 = vand.u32 4294901760, %v5156_v34  ;;  %415 = vadd.xlane.f32.xlu1 %v4960_v7 }
  0x91   : > { %v7500_v44 = vand.u32 4294901760, %v5172_v26  ;;  %295 = vadd.xlane.f32.xlu0 %v4866_v22  ;;  %v7502_v7 = vand.u32 4294901760, %v5045_v49  ;;  %v5273_v0 = vsub.f32 %v5186_v31, %v7505_v13  ;;  %v5282_v22 = vld [vmem:[%s4800_s29 + $0x118] sm:$0xff]  ;;  %v7507_v49 = vand.u32 4294901760, %v5201_v18 }
  0x92   : > { %7488 = vst [vmem:[#allocation67_spill] sm:$0xff] %v5210_v37  ;;  %7495 = vst [vmem:[#allocation70_spill] sm:$0xff] %v5233_v50  ;;  %v5238_v8 = vsub.f32 %v5154_v6, %v7496_v14  ;;  %v5243_v54 = vsub.f32 %v5156_v34, %v7498_v38  ;;  %v5277_v38 = vld [vmem:[#allocation5 + $0x1c8] sm:$0xff]  ;;  %3884 = vmatpush1.bf16.msra.mxu0 %v5210_v37  ;;  %3692 = vmatpush1.bf16.msra.mxu1 %v5210_v37  ;;  %v7516_v14 = vand.u32 4294901760, %v5225_v30  ;;  %v5336_v37 = vld [vmem:[#allocation5 + $0x1f8] sm:$0xff] }
  0x93   : > { %v5257_v33 = vsub.f32 %v5172_v26, %v7500_v44  ;;  %7506 = vst [vmem:[#allocation75_spill] sm:$0xff] %v5273_v0  ;;  %v5297_v44 = vld [vmem:[#allocation5 + $0x1c0] sm:$0xff]  ;;  %v5299_v0 = vld [vmem:[#allocation5 + $0x1d0] sm:$0xff]  ;;  %3886 = vmatprep.subr.bf16.mxu0 %v5233_v50  ;;  %3694 = vmatprep.subr.bf16.mxu1 %v5233_v50  ;;  %v7522_v50 = vand.u32 4294901760, %v5261_v39 }
  0x94   : > { %7497 = vst [vmem:[#allocation71_spill] sm:$0xff] %v5238_v8  ;;  %7499 = vst [vmem:[#allocation72_spill] sm:$0xff] %v5243_v54  ;;  %v7503_v54 = vand.u32 4294901760, %v5047_v10  ;;  %v7509_v10 = vand.u32 4294901760, %v5203_v59  ;;  %418 = vadd.xlane.f32.xlu1 %v5100_v2  ;;  %v362_v2 = vmul.f32 %v5282_v22, %v5282_v22 }
  0x95   : > { %7501 = vst [vmem:[#allocation73_spill] sm:$0xff] %v5257_v33  ;;  %v5279_v33 = vld [vmem:[#allocation5 + $0x1d8] sm:$0xff]  ;;  %298 = vadd.xlane.f32.xlu0 %v4878_v27  ;;  %v7524_v27 = vand.u32 4294901760, %v5063_v29  ;;  %v7531_v29 = vand.u32 4294901760, %v5085_v23  ;;  %v423_v23 = vadd.f32 %v5177_v20, %v5029_v16  ;;  %v244_v16 = vld [vmem:[%s4800_s29 + $0x128] sm:$0xff] }
  0x96   : > { %v5268_v51 = vpack.c.bf16 %v7503_v54, %v7502_v7  ;;  %v5288_v54 = vsub.f32 %v5201_v18, %v7507_v49  ;;  %v5293_v7 = vsub.f32 %v5203_v59, %v7509_v10  ;;  %v7511_v49 = vand.u32 4294901760, %v5049_v1 }
  0x97   : > { %v7514_v10 = vand.u32 4294901760, %v5223_v28 }
  0x98   : > { %7504 = vst [vmem:[#allocation74_spill] sm:$0xff] %v5268_v51  ;;  %7508 = vst [vmem:[#allocation76_spill] sm:$0xff] %v5288_v54  ;;  %v7512_v54 = vand.u32 4294901760, %v5061_v58  ;;  %v7518_v58 = vand.u32 4294901760, %v5246_v25  ;;  %3888 = vmatpush1.bf16.msra.mxu0 %v5268_v51  ;;  %3696 = vmatpush1.bf16.msra.mxu1 %v5268_v51  ;;  %v7239_v51 = vand.u32 4294901760, %v5336_v37 }
  0x99   : > { %7510 = vst [vmem:[#allocation77_spill] sm:$0xff] %v5293_v7  ;;  %v5312_v13 = vsub.f32 %v5223_v28, %v7514_v10  ;;  %v5317_v7 = vsub.f32 %v5225_v30, %v7516_v14  ;;  %v5350_v14 = vld [vmem:[#allocation5 + $0x1f0] sm:$0xff]  ;;  %v7525_v10 = vand.u32 4294901760, %v5065_v47  ;;  %v7532_v47 = vand.u32 4294901760, %v5109_v5  ;;  %421 = vadd.xlane.f32.xlu1 %v420_v53  ;;  %301 = vadd.xlane.f32.xlu0 %v4890_v40 }
  0x9a   : > { %v5307_v8 = vpack.c.bf16 %v7512_v54, %v7511_v49  ;;  %v5327_v1 = vsub.f32 %v5246_v25, %v7518_v58  ;;  %v7520_v54 = vand.u32 4294901760, %v5248_v36  ;;  %v5344_v58 = vsub.f32 %v5261_v39, %v7522_v50 }
  0x9b   : > { %7515 = vst [vmem:[#allocation79_spill] sm:$0xff] %v5312_v13  ;;  %7517 = vst [vmem:[#allocation80_spill] sm:$0xff] %v5317_v7  ;;  %v5357_v7 = vpack.c.bf16 %v7525_v10, %v7524_v27  ;;  %v7527_v13 = vand.u32 4294901760, %v5277_v38  ;;  %v5376_v10 = vpack.c.bf16 %v7532_v47, %v7531_v29  ;;  %v7538_v5 = vand.u32 4294901760, %v5320_v60 }
  0x9c   : > { %7513 = vst [vmem:[#allocation78_spill] sm:$0xff] %v5307_v8  ;;  %7519 = vst [vmem:[#allocation81_spill] sm:$0xff] %v5327_v1  ;;  %v5332_v49 = vsub.f32 %v5248_v36, %v7520_v54  ;;  %v7529_v1 = vand.u32 4294901760, %v5279_v33  ;;  %3890 = vmatprep.subr.bf16.mxu0 %v5307_v8  ;;  %3698 = vmatprep.subr.bf16.mxu1 %v5307_v8  ;;  %v303_v53 = vadd.f32 %v5103_v55, %v4984_v32 }
  0x9d   : > { %7523 = vst [vmem:[#allocation83_spill] sm:$0xff] %v5344_v58  ;;  %7526 = vst [vmem:[#allocation84_spill] sm:$0xff] %v5357_v7  ;;  %v5362_v50 = vsub.f32 %v5277_v38, %v7527_v13  ;;  %v7534_v13 = vand.u32 4294901760, %v5297_v44  ;;  %v5395_v29 = vsub.f32 %v5320_v60, %v7538_v5  ;;  %v5407_v20 = vsub.f32 %v5336_v37, %v7239_v51 }
  0x9e   : > { %7521 = vst [vmem:[#allocation82_spill] sm:$0xff] %v5332_v49  ;;  %v5348_v49 = vld [vmem:[#allocation5 + $0x1e0] sm:$0xff]  ;;  %v5367_v54 = vsub.f32 %v5279_v33, %v7529_v1  ;;  %7533 = vst [vmem:[#allocation87_spill] sm:$0xff] %v5376_v10  ;;  %v7536_v1 = vand.u32 4294901760, %v5299_v0  ;;  %3892 = vmatpush1.bf16.msra.mxu0 %v5357_v7  ;;  %v7541_v5 = vand.u32 4294901760, %v5111_v61  ;;  %v7546_v32 = vand.u32 4294901760, %v5350_v14  ;;  %3700 = vmatpush1.bf16.msra.mxu1 %v5357_v7 }
  0x9f   : > { %7528 = vst [vmem:[#allocation85_spill] sm:$0xff] %v5362_v50  ;;  %v5381_v27 = vsub.f32 %v5297_v44, %v7534_v13  ;;  %7539 = vst [vmem:[#allocation90_spill] sm:$0xff] %v5395_v29  ;;  %v7542_v13 = vand.u32 4294901760, %v5133_v9  ;;  %v7544_v40 = vand.u32 4294901760, %v5348_v49  ;;  %3894 = vmatprep.subr.bf16.mxu0 %v5376_v10  ;;  %v7548_v61 = vand.u32 4294901760, %v5135_v4  ;;  %424 = vadd.xlane.f32.xlu1 %v423_v23 }
  0xa0   : > { %7530 = vst [vmem:[#allocation86_spill] sm:$0xff] %v5367_v54  ;;  %v5386_v58 = vsub.f32 %v5299_v0, %v7536_v1  ;;  %v243_v1 = vld [vmem:[%s4800_s29 + $0x120] sm:$0xff]  ;;  %7540 = vst [vmem:[#allocation91_spill] sm:$0xff] %v5407_v20  ;;  %v5424_v8 = vsub.f32 %v5350_v14, %v7546_v32  ;;  %v7549_v9 = vand.u32 4294901760, %v5154_v6  ;;  %v364_v51 = vmul.f32 %v244_v16, %v244_v16  ;;  %v246_v20 = vld [vmem:[%s4800_s29 + $0x138] sm:$0xff] }
  0xa1   : > { %7535 = vst [vmem:[#allocation88_spill] sm:$0xff] %v5381_v27  ;;  %v5414_v47 = vpack.c.bf16 %v7542_v13, %v7541_v5  ;;  %v5419_v55 = vsub.f32 %v5348_v49, %v7544_v40  ;;  %v426_v5 = vadd.f32 %v362_v2, %v5181_v41  ;;  %v363_v40 = vmul.f32 %v243_v1, %v243_v1 }
  0xa2   : > { %7537 = vst [vmem:[#allocation89_spill] sm:$0xff] %v5386_v58  ;;  %7547 = vst [vmem:[#allocation94_spill] sm:$0xff] %v5424_v8  ;;  %v5432_v13 = vpack.c.bf16 %v7549_v9, %v7548_v61  ;;  %3702 = vmatprep.subr.bf16.mxu1 %v5376_v10  ;;  %304 = vadd.xlane.f32.xlu0 %v303_v53  ;;  %v306_v32 = vadd.f32 %v5282_v22, %v5115_v21  ;;  %v7551_v4 = vand.u32 4294901760, %v5156_v34  ;;  %v247_v9 = vld [vmem:[%s4800_s29 + $0x140] sm:$0xff]  ;;  %v7607_v8 = vld [vmem:[#allocation62_spill] sm:$0xff] }
  0xa3   : > { %7543 = vst [vmem:[#allocation92_spill] sm:$0xff] %v5414_v47  ;;  %7545 = vst [vmem:[#allocation93_spill] sm:$0xff] %v5419_v55  ;;  %v245_v55 = vld [vmem:[%s4800_s29 + $0x130] sm:$0xff]  ;;  %3896 = vmatpush1.bf16.msra.mxu0 %v5414_v47  ;;  %v7552_v6 = vand.u32 4294901760, %v5172_v26  ;;  %v366_v2 = vmul.f32 %v246_v20, %v246_v20  ;;  %3704 = vmatpush1.bf16.msra.mxu1 %v5414_v47  ;;  %v7554_v53 = vand.u32 4294901760, %v5186_v31  ;;  %v7555_v61 = vand.u32 4294901760, %v5201_v18 }
  0xa4   : > { %7550 = vst [vmem:[#allocation95_spill] sm:$0xff] %v5432_v13  ;;  %v365_v41 = vmul.f32 %v245_v55, %v245_v55  ;;  %3898 = vmatprep.subr.bf16.mxu0 %v5432_v13  ;;  %427 = vadd.xlane.f32.xlu1 %v426_v5  ;;  %v429_v22 = vadd.f32 %v364_v51, %v363_v40  ;;  %v7557_v34 = vand.u32 4294901760, %v4854_v11  ;;  %v248_v31 = vld [vmem:[%s4800_s29 + $0x148] sm:$0xff]  ;;  %v7561_v51 = vand.u32 4294901760, %v5203_v59  ;;  %v250_v59 = vld [vmem:[%s4800_s29 + $0x158] sm:$0xff] }
  0xa5   : > { %v5445_v23 = vpack.c.bf16 %v7552_v6, %v7551_v4  ;;  %v5453_v21 = vpack.c.bf16 %v7555_v61, %v7554_v53  ;;  %v7559_v4 = vand.u32 4294901760, %v4856_v12  ;;  %3706 = vmatprep.subr.bf16.mxu1 %v5432_v13  ;;  %v309_v18 = vadd.f32 %v244_v16, %v243_v1  ;;  %v249_v61 = vld [vmem:[%s4800_s29 + $0x150] sm:$0xff] }
  0xa6   : > { %v5459_v26 = vsub.f32 %v4854_v11, %v7557_v34  ;;  %307 = vadd.xlane.f32.xlu0 %v306_v32  ;;  %v7562_v5 = vand.u32 4294901760, %v5223_v28  ;;  %v367_v11 = vmul.f32 %v247_v9, %v247_v9  ;;  %v7565_v53 = vand.u32 4294901760, %v5246_v25 }
  0xa7   : > { %7553 = vst [vmem:[#allocation96_spill] sm:$0xff] %v5445_v23  ;;  %7556 = vst [vmem:[#allocation97_spill] sm:$0xff] %v5453_v21  ;;  %v5464_v6 = vsub.f32 %v4856_v12, %v7559_v4  ;;  %3900 = vmatpush1.bf16.msra.mxu0 %v5445_v23  ;;  %3708 = vmatpush1.bf16.msra.mxu1 %v5445_v23  ;;  %v7564_v12 = vand.u32 4294901760, %v5225_v30  ;;  %v432_v1 = vadd.f32 %v366_v2, %v365_v41 }
  0xa8   : > { %7558 = vst [vmem:[#allocation98_spill] sm:$0xff] %v5459_v26  ;;  %v5473_v40 = vpack.c.bf16 %v7562_v5, %v7561_v51  ;;  %3902 = vmatprep.subr.bf16.mxu0 %v5453_v21  ;;  %430 = vadd.xlane.f32.xlu1 %v429_v22  ;;  %v368_v16 = vmul.f32 %v248_v31, %v248_v31  ;;  %v1302_v28 = vand.u32 4294901760, %v5459_v26  ;;  %v7567_v30 = vand.u32 4294901760, %v5248_v36  ;;  %v251_v5 = vld [vmem:[%s4800_s29 + $0x160] sm:$0xff] }
  0xa9   : > { %7560 = vst [vmem:[#allocation99_spill] sm:$0xff] %v5464_v6  ;;  %v5481_v32 = vpack.c.bf16 %v7565_v53, %v7564_v12  ;;  %3710 = vmatprep.subr.bf16.mxu1 %v5453_v21  ;;  %v1314_v34 = vand.u32 4294901760, %v5464_v6  ;;  %v312_v4 = vadd.f32 %v246_v20, %v245_v55  ;;  %v7568_v25 = vand.u32 4294901760, %v5261_v39  ;;  %v252_v53 = vld [vmem:[%s4800_s29 + $0x168] sm:$0xff] }
  0xaa   : > { %7563 = vst [vmem:[#allocation100_spill] sm:$0xff] %v5473_v40  ;;  %310 = vadd.xlane.f32.xlu0 %v309_v18  ;;  %v369_v2 = vmul.f32 %v249_v61, %v249_v61  ;;  %v370_v22 = vmul.f32 %v250_v59, %v250_v59  ;;  %v7570_v51 = vand.u32 4294901760, %v5277_v38  ;;  %v7571_v18 = vand.u32 4294901760, %v5279_v33  ;;  %v7583_v21 = vld [vmem:[#allocation36_spill] sm:$0xff] }
  0xab   : > { %7566 = vst [vmem:[#allocation101_spill] sm:$0xff] %v5481_v32  ;;  %3904 = vmatpush1.bf16.msra.mxu0 %v5473_v40  ;;  %v5493_v41 = vpack.c.bf16 %v7568_v25, %v7567_v30  ;;  %3712 = vmatpush1.bf16.msra.mxu1 %v5473_v40  ;;  %v435_v55 = vadd.f32 %v368_v16, %v367_v11  ;;  %v7573_v33 = vand.u32 4294901760, %v5297_v44  ;;  %v7574_v38 = vand.u32 4294901760, %v5299_v0  ;;  %v253_v25 = vld [vmem:[%s4800_s29 + $0x170] sm:$0xff] }
  0xac   : > { %3906 = vmatprep.subr.bf16.mxu0 %v5481_v32  ;;  %v5501_v20 = vpack.c.bf16 %v7571_v18, %v7570_v51  ;;  %433 = vadd.xlane.f32.xlu1 %v432_v1  ;;  %v1303_v39 = vsub.f32 %v5459_v26, %v1302_v28  ;;  %v1315_v36 = vsub.f32 %v5464_v6, %v1314_v34  ;;  %v7576_v16 = vand.u32 4294901760, %v5320_v60  ;;  %v254_v18 = vld [vmem:[%s4800_s29 + $0x178] sm:$0xff]  ;;  %v7602_v6 = vld [vmem:[#allocation57_spill] sm:$0xff] }
  0xad   : > { %7569 = vst [vmem:[#allocation102_spill] sm:$0xff] %v5493_v41  ;;  %3714 = vmatprep.subr.bf16.mxu1 %v5481_v32  ;;  %v315_v12 = vadd.f32 %v248_v31, %v247_v9  ;;  %v5513_v1 = vpack.c.bf16 %v7574_v38, %v7573_v33  ;;  %v371_v11 = vmul.f32 %v251_v5, %v251_v5  ;;  %v7579_v33 = vand.u32 4294901760, %v5348_v49  ;;  %v7582_v32 = vld [vmem:[#allocation34_spill] sm:$0xff] }
  0xae   : > { %7572 = vst [vmem:[#allocation103_spill] sm:$0xff] %v5501_v20  ;;  %313 = vadd.xlane.f32.xlu0 %v312_v4  ;;  %v7577_v4 = vand.u32 4294901760, %v5336_v37  ;;  %v438_v31 = vadd.f32 %v370_v22, %v369_v2  ;;  %v372_v30 = vmul.f32 %v252_v53, %v252_v53  ;;  %v1304_v0 = vand.u32 4294901760, %v1303_v39 }
  0xaf   : > { %3908 = vmatpush1.bf16.msra.mxu0 %v5493_v41  ;;  %7575 = vst [vmem:[#allocation104_spill] sm:$0xff] %v5513_v1  ;;  %3716 = vmatpush1.bf16.msra.mxu1 %v5493_v41  ;;  %v1316_v44 = vand.u32 4294901760, %v1315_v36  ;;  %v318_v51 = vadd.f32 %v250_v59, %v249_v61  ;;  %v7580_v60 = vand.u32 4294901760, %v5350_v14  ;;  %v373_v38 = vmul.f32 %v253_v25, %v253_v25 }
  0xb0   : > { %3910 = vmatprep.subr.bf16.mxu0 %v5501_v20  ;;  %v5521_v9 = vpack.c.bf16 %v7577_v4, %v7576_v16  ;;  %436 = vadd.xlane.f32.xlu1 %v435_v55  ;;  %v3917_v2 = vpack.c.bf16 %v1314_v34, %v1302_v28  ;;  %v441_v22 = vadd.f32 %v372_v30, %v371_v11  ;;  %v1308_v28 = vand.u32 4294901760, %v4900_v45 }
  0xb1   : > { %3718 = vmatprep.subr.bf16.mxu1 %v5501_v20  ;;  %v5531_v37 = vpack.c.bf16 %v7580_v60, %v7579_v33  ;;  %v374_v55 = vmul.f32 %v254_v18, %v254_v18  ;;  %v3725_v61 = vpack.c.bf16 %v1316_v44, %v1304_v0  ;;  %v321_v59 = vadd.f32 %v252_v53, %v251_v5 }
  0xb2   : > { %7578 = vst [vmem:[#allocation105_spill] sm:$0xff] %v5521_v9  ;;  %316 = vadd.xlane.f32.xlu0 %v315_v12  ;;  %v324_v14 = vadd.f32 %v254_v18, %v253_v25  ;;  %v1320_v34 = vand.u32 4294901760, %v4902_v46  ;;  %v1326_v39 = vand.u32 4294901760, %v4905_v48  ;;  %v1338_v5 = vand.u32 4294901760, %v4911_v56 }
  0xb3   : > { %3912 = vmatpush1.bf16.msra.mxu0 %v5513_v1  ;;  %7581 = vst [vmem:[#allocation106_spill] sm:$0xff] %v5531_v37  ;;  %3720 = vmatpush1.bf16.msra.mxu1 %v5513_v1  ;;  %v444_v49 = vadd.f32 %v374_v55, %v373_v38  ;;  %v1332_v36 = vand.u32 4294901760, %v4916_v62  ;;  %v1344_v12 = vand.u32 4294901760, %v4918_v63  ;;  %v1309_v53 = vsub.f32 %v4900_v45, %v1308_v28 }
  0xb4   : > { %3914 = vmatprep.subr.bf16.mxu0 %v5521_v9  ;;  %439 = vadd.xlane.f32.xlu1 %v438_v31  ;;  %v1321_v11 = vsub.f32 %v4902_v46, %v1320_v34  ;;  %v1327_v16 = vsub.f32 %v4905_v48, %v1326_v39  ;;  %v1339_v4 = vsub.f32 %v4911_v56, %v1338_v5  ;;  %v1350_v25 = vand.u32 4294901760, %v4920_v3  ;;  %v7601_v46 = vld [vmem:[#allocation56_spill] sm:$0xff] }
  0xb5   : > { %3722 = vmatprep.subr.bf16.mxu1 %v5521_v9  ;;  %v1333_v31 = vsub.f32 %v4916_v62, %v1332_v36  ;;  %v1345_v30 = vsub.f32 %v4918_v63, %v1344_v12  ;;  %v1362_v0 = vand.u32 4294901760, %v4926_v15  ;;  %v1310_v44 = vand.u32 4294901760, %v1309_v53 }
  0xb6   : > { %319 = vadd.xlane.f32.xlu0 %v318_v51  ;;  %v1322_v51 = vand.u32 4294901760, %v1321_v11  ;;  %v1356_v18 = vand.u32 4294901760, %v4928_v17  ;;  %v1368_v33 = vand.u32 4294901760, %v4935_v35  ;;  %v1328_v60 = vand.u32 4294901760, %v1327_v16 }
  0xb7   : > { %3916 = vmatpush1.bf16.msra.mxu0 %v5531_v37  ;;  %3724 = vmatpush1.bf16.msra.mxu1 %v5531_v37  ;;  %v1340_v38 = vand.u32 4294901760, %v1339_v4  ;;  %v1351_v55 = vsub.f32 %v4920_v3, %v1350_v25  ;;  %v1374_v11 = vand.u32 4294901760, %v4941_v42  ;;  %v1386_v37 = vand.u32 4294901760, %v4943_v43 }
  0xb8   : > { %3918 = vmatprep.subr.bf16.mxu0 %v3917_v2  ;;  %442 = vadd.xlane.f32.xlu1 %v441_v22  ;;  %v1334_v2 = vand.u32 4294901760, %v1333_v31  ;;  %v1346_v22 = vand.u32 4294901760, %v1345_v30  ;;  %v1369_v53 = vsub.f32 %v4935_v35, %v1368_v33  ;;  %v1380_v16 = vand.u32 4294901760, %v4951_v52 }
  0xb9   : > { %3726 = vmatprep.subr.bf16.mxu1 %v3725_v61  ;;  %v1363_v61 = vsub.f32 %v4926_v15, %v1362_v0  ;;  %v1392_v4 = vand.u32 4294901760, %v4953_v57  ;;  %v5566_v31 = vpack.c.bf16 %v1340_v38, %v1328_v60  ;;  %v1398_v9 = vand.u32 4294901760, %v4962_v19 }
  0xba   : > { %322 = vadd.xlane.f32.xlu0 %v321_v59  ;;  %v5556_v59 = vpack.c.bf16 %v1322_v51, %v1310_v44  ;;  %v5568_v30 = vpack.c.bf16 %v1346_v22, %v1334_v2  ;;  %v5570_v44 = vpack.c.bf16 %v1338_v5, %v1326_v39  ;;  %v1410_v1 = vand.u32 4294901760, %v4964_v24  ;;  %v7585_v2 = vld [vmem:[#allocation39_spill] sm:$0xff] }
  0xbb   : > { %v1364_v51 = vand.u32 4294901760, %v1363_v61  ;;  %v1370_v41 = vand.u32 4294901760, %v1369_v53  ;;  %v1404_v40 = vand.u32 4294901760, %v7582_v32  ;;  %v1416_v23 = vand.u32 4294901760, %v7583_v21 }
  0xbc   : > { %445 = vadd.xlane.f32.xlu1 %v444_v49  ;;  %v5558_v49 = vpack.c.bf16 %v1320_v34, %v1308_v28  ;;  %v5572_v28 = vpack.c.bf16 %v1344_v12, %v1332_v36  ;;  %v1352_v34 = vand.u32 4294901760, %v1351_v55  ;;  %v1375_v60 = vsub.f32 %v4941_v42, %v1374_v11  ;;  %v7584_v36 = vld [vmem:[#allocation38_spill] sm:$0xff]  ;;  %v7586_v55 = vld [vmem:[#allocation41_spill] sm:$0xff] }
  0xbd   : > { %v1387_v38 = vsub.f32 %v4943_v43, %v1386_v37  ;;  %v1381_v39 = vsub.f32 %v4951_v52, %v1380_v16  ;;  %v1393_v5 = vsub.f32 %v4953_v57, %v1392_v4  ;;  %v1422_v12 = vand.u32 4294901760, %v7584_v36 }
  0xbe   : > { %325 = vadd.xlane.f32.xlu0 %v324_v14  ;;  %v1357_v14 = vsub.f32 %v4928_v17, %v1356_v18  ;;  %v1434_v22 = vand.u32 4294901760, %v7585_v2  ;;  %v1428_v61 = vand.u32 4294901760, %v7586_v55  ;;  %v5586_v13 = vpack.c.bf16 %v1362_v0, %v1350_v25 }
  0xbf   : > { %v5588_v47 = vpack.c.bf16 %v1368_v33, %v1356_v18  ;;  %v1399_v10 = vsub.f32 %v4962_v19, %v1398_v9  ;;  %v1411_v7 = vsub.f32 %v4964_v24, %v1410_v1  ;;  %v5592_v43 = vpack.c.bf16 %v1364_v51, %v1352_v34  ;;  %v7589_v24 = vld [vmem:[#allocation44_spill] sm:$0xff] }
  0xc0   : > { %v1358_v20 = vand.u32 4294901760, %v1357_v14  ;;  %v7587_v14 = vld [vmem:[#allocation42_spill] sm:$0xff]  ;;  %v1405_v57 = vsub.f32 %v7582_v32, %v1404_v40  ;;  %v1417_v42 = vsub.f32 %v7583_v21, %v1416_v23  ;;  %v1376_v35 = vand.u32 4294901760, %v1375_v60  ;;  %v7590_v60 = vld [vmem:[#allocation45_spill] sm:$0xff] }
  0xc1   : > { %v1440_v53 = vand.u32 4294901760, %v7587_v14  ;;  %v1388_v17 = vand.u32 4294901760, %v1387_v38  ;;  %v1382_v15 = vand.u32 4294901760, %v1381_v39  ;;  %v1394_v3 = vand.u32 4294901760, %v1393_v5  ;;  %v7591_v39 = vld [vmem:[#allocation47_spill] sm:$0xff] }
  0xc2   : > { %v5594_v52 = vpack.c.bf16 %v1370_v41, %v1358_v20  ;;  %v1423_v25 = vsub.f32 %v7584_v36, %v1422_v12  ;;  %v1435_v0 = vsub.f32 %v7585_v2, %v1434_v22  ;;  %v1429_v18 = vsub.f32 %v7586_v55, %v1428_v61  ;;  %v7588_v41 = vld [vmem:[#allocation43_spill] sm:$0xff] }
  0xc3   : > { %v1441_v33 = vsub.f32 %v7587_v14, %v1440_v53  ;;  %v1400_v34 = vand.u32 4294901760, %v1399_v10  ;;  %v1412_v51 = vand.u32 4294901760, %v1411_v7  ;;  %v1446_v20 = vand.u32 4294901760, %v7588_v41 }
  0xc4   : > { %v1458_v32 = vand.u32 4294901760, %v7589_v24  ;;  %v1406_v19 = vand.u32 4294901760, %v1405_v57  ;;  %v1418_v21 = vand.u32 4294901760, %v1417_v42  ;;  %v1452_v38 = vand.u32 4294901760, %v7590_v60 }
  0xc5   : > { %v1464_v5 = vand.u32 4294901760, %v7591_v39  ;;  %v5606_v63 = vpack.c.bf16 %v1388_v17, %v1376_v35  ;;  %v5608_v36 = vpack.c.bf16 %v1394_v3, %v1382_v15  ;;  %v5610_v2 = vpack.c.bf16 %v1386_v37, %v1374_v11  ;;  %v7593_v37 = vld [vmem:[#allocation49_spill] sm:$0xff] }
  0xc6   : > { %v5612_v55 = vpack.c.bf16 %v1392_v4, %v1380_v16  ;;  %v1424_v10 = vand.u32 4294901760, %v1423_v25  ;;  %v1436_v7 = vand.u32 4294901760, %v1435_v0  ;;  %v1430_v14 = vand.u32 4294901760, %v1429_v18  ;;  %v7594_v16 = vld [vmem:[#allocation50_spill] sm:$0xff]  ;;  %v7595_v25 = vld [vmem:[#allocation52_spill] sm:$0xff] }
  0xc7   : > { %v1442_v62 = vand.u32 4294901760, %v1441_v33  ;;  %v5614_v56 = vpack.c.bf16 %v1412_v51, %v1400_v34  ;;  %v5616_v57 = vpack.c.bf16 %v1410_v1, %v1398_v9  ;;  %v1447_v42 = vsub.f32 %v7588_v41, %v1446_v20  ;;  %v7596_v1 = vld [vmem:[#allocation53_spill] sm:$0xff]  ;;  %v7599_v34 = vld [vmem:[#allocation54_spill] sm:$0xff] }
  0xc8   : > { %v1459_v48 = vsub.f32 %v7589_v24, %v1458_v32  ;;  %v5620_v17 = vpack.c.bf16 %v1418_v21, %v1406_v19  ;;  %v5622_v3 = vpack.c.bf16 %v1416_v23, %v1404_v40  ;;  %v1453_v15 = vsub.f32 %v7590_v60, %v1452_v38 }
  0xc9   : > { %v1465_v35 = vsub.f32 %v7591_v39, %v1464_v5  ;;  %v1470_v11 = vand.u32 4294901760, %v7593_v37  ;;  %v1482_v4 = vand.u32 4294901760, %v7594_v16  ;;  %v1476_v0 = vand.u32 4294901760, %v7595_v25  ;;  %v7600_v39 = vld [vmem:[#allocation55_spill] sm:$0xff] }
  0xca   : > { %7592 = vst [vmem:[#allocation107_spill] sm:$0xff] %v5620_v17  ;;  %v1488_v9 = vand.u32 4294901760, %v7596_v1  ;;  %v5630_v18 = vpack.c.bf16 %v1436_v7, %v1424_v10  ;;  %v5632_v33 = vpack.c.bf16 %v1442_v62, %v1430_v14  ;;  %v5634_v19 = vpack.c.bf16 %v1434_v22, %v1422_v12  ;;  %v7605_v14 = vld [vmem:[#allocation58_spill] sm:$0xff]  ;;  %v7606_v7 = vld [vmem:[#allocation61_spill] sm:$0xff] }
  0xcb   : > { %v5636_v23 = vpack.c.bf16 %v1440_v53, %v1428_v61  ;;  %v1448_v21 = vand.u32 4294901760, %v1447_v42  ;;  %v1460_v40 = vand.u32 4294901760, %v1459_v48  ;;  %v1494_v51 = vand.u32 4294901760, %v7599_v34 }
  0xcc   : > { %7597 = vst [vmem:[#allocation108_spill] sm:$0xff] %v5630_v18  ;;  %7598 = vst [vmem:[#allocation109_spill] sm:$0xff] %v5632_v33  ;;  %v1506_v60 = vand.u32 4294901760, %v7600_v39  ;;  %v1454_v24 = vand.u32 4294901760, %v1453_v15  ;;  %v1466_v41 = vand.u32 4294901760, %v1465_v35  ;;  %v1500_v45 = vand.u32 4294901760, %v7601_v46 }
  0xcd   : > { %v1512_v26 = vand.u32 4294901760, %v7602_v6  ;;  %v1471_v10 = vsub.f32 %v7593_v37, %v1470_v11  ;;  %v1483_v62 = vsub.f32 %v7594_v16, %v1482_v4  ;;  %v1477_v12 = vsub.f32 %v7595_v25, %v1476_v0  ;;  %v7608_v33 = vld [vmem:[#allocation63_spill] sm:$0xff] }
  0xce   : > { %v1489_v22 = vsub.f32 %v7596_v1, %v1488_v9  ;;  %v5646_v61 = vpack.c.bf16 %v1458_v32, %v1446_v20  ;;  %v5648_v48 = vpack.c.bf16 %v1464_v5, %v1452_v38  ;;  %v1518_v53 = vand.u32 4294901760, %v7605_v14 }
  0xcf   : > { %v1530_v42 = vand.u32 4294901760, %v7606_v7  ;;  %v1495_v15 = vsub.f32 %v7599_v34, %v1494_v51  ;;  %v1507_v35 = vsub.f32 %v7600_v39, %v1506_v60  ;;  %v1524_v37 = vand.u32 4294901760, %v7607_v8 }
  0xd0   : > { %7603 = vst [vmem:[#allocation110_spill] sm:$0xff] %v5646_v61  ;;  %7604 = vst [vmem:[#allocation111_spill] sm:$0xff] %v5648_v48  ;;  %v1536_v16 = vand.u32 4294901760, %v7608_v33  ;;  %v5656_v18 = vpack.c.bf16 %v1460_v40, %v1448_v21  ;;  %v5658_v25 = vpack.c.bf16 %v1466_v41, %v1454_v24  ;;  %v1501_v32 = vsub.f32 %v7601_v46, %v1500_v45 }
  0xd1   : > { %v1513_v20 = vsub.f32 %v7602_v6, %v1512_v26  ;;  %v1472_v38 = vand.u32 4294901760, %v1471_v10  ;;  %v1484_v5 = vand.u32 4294901760, %v1483_v62  ;;  %v1478_v1 = vand.u32 4294901760, %v1477_v12  ;;  %v7612_v10 = vld [vmem:[#allocation64_spill] sm:$0xff]  ;;  %v7613_v12 = vld [vmem:[#allocation65_spill] sm:$0xff] }
  0xd2   : > { %7609 = vst [vmem:[#allocation112_spill] sm:$0xff] %v5656_v18  ;;  %7610 = vst [vmem:[#allocation113_spill] sm:$0xff] %v5658_v25  ;;  %v1490_v48 = vand.u32 4294901760, %v1489_v22  ;;  %v5662_v17 = vpack.c.bf16 %v1482_v4, %v1470_v11  ;;  %v5664_v34 = vpack.c.bf16 %v1488_v9, %v1476_v0  ;;  %v1519_v39 = vsub.f32 %v7605_v14, %v1518_v53  ;;  %v7616_v0 = vld [vmem:[#allocation66_spill] sm:$0xff]  ;;  %v7617_v14 = vld [vmem:[#allocation68_spill] sm:$0xff] }
  0xd3   : > { %v1531_v61 = vsub.f32 %v7606_v7, %v1530_v42  ;;  %v1496_v21 = vand.u32 4294901760, %v1495_v15  ;;  %v1508_v40 = vand.u32 4294901760, %v1507_v35  ;;  %v1525_v24 = vsub.f32 %v7607_v8, %v1524_v37  ;;  %v7621_v18 = vld [vmem:[#allocation72_spill] sm:$0xff] }
  0xd4   : > { %7611 = vst [vmem:[#allocation114_spill] sm:$0xff] %v5664_v34  ;;  %v1537_v41 = vsub.f32 %v7608_v33, %v1536_v16  ;;  %v1502_v46 = vand.u32 4294901760, %v1501_v32  ;;  %v1514_v6 = vand.u32 4294901760, %v1513_v20  ;;  %v1542_v62 = vand.u32 4294901760, %v7612_v10 }
  0xd5   : > { %v1554_v22 = vand.u32 4294901760, %v7613_v12  ;;  %v5672_v11 = vpack.c.bf16 %v1484_v5, %v1472_v38  ;;  %v5674_v4 = vpack.c.bf16 %v1490_v48, %v1478_v1  ;;  %v1548_v9 = vand.u32 4294901760, %v7616_v0 }
  0xd6   : > { %v1560_v7 = vand.u32 4294901760, %v7617_v14  ;;  %v1520_v15 = vand.u32 4294901760, %v1519_v39  ;;  %v1532_v35 = vand.u32 4294901760, %v1531_v61  ;;  %v1543_v8 = vsub.f32 %v7612_v10, %v1542_v62 }
  0xd7   : > { %7614 = vst [vmem:[#allocation115_spill] sm:$0xff] %v5672_v11  ;;  %7615 = vst [vmem:[#allocation116_spill] sm:$0xff] %v5674_v4  ;;  %v1555_v33 = vsub.f32 %v7613_v12, %v1554_v22  ;;  %v1526_v32 = vand.u32 4294901760, %v1525_v24  ;;  %v1538_v20 = vand.u32 4294901760, %v1537_v41  ;;  %v1549_v25 = vsub.f32 %v7616_v0, %v1548_v9  ;;  %v7619_v24 = vld [vmem:[#allocation69_spill] sm:$0xff]  ;;  %v7620_v11 = vld [vmem:[#allocation71_spill] sm:$0xff] }
  0xd8   : > { %v1561_v34 = vsub.f32 %v7617_v14, %v1560_v7  ;;  %v5682_v38 = vpack.c.bf16 %v1508_v40, %v1496_v21  ;;  %v5684_v1 = vpack.c.bf16 %v1514_v6, %v1502_v46  ;;  %v5686_v48 = vpack.c.bf16 %v1506_v60, %v1494_v51 }
  0xd9   : > { %v5688_v5 = vpack.c.bf16 %v1512_v26, %v1500_v45  ;;  %v5690_v39 = vpack.c.bf16 %v1530_v42, %v1518_v53  ;;  %v1544_v61 = vand.u32 4294901760, %v1543_v8  ;;  %v1556_v10 = vand.u32 4294901760, %v1555_v33  ;;  %v7625_v45 = vld [vmem:[#allocation73_spill] sm:$0xff] }
  0xda   : > { %7618 = vst [vmem:[#allocation117_spill] sm:$0xff] %v5684_v1  ;;  %v1550_v4 = vand.u32 4294901760, %v1549_v25  ;;  %v1562_v12 = vand.u32 4294901760, %v1561_v34  ;;  %v1566_v41 = vand.u32 4294901760, %v7619_v24  ;;  %v1578_v0 = vand.u32 4294901760, %v7620_v11 }
  0xdb   : > { %v1572_v14 = vand.u32 4294901760, %v7621_v18  ;;  %v5695_v21 = vpack.c.bf16 %v1532_v35, %v1520_v15  ;;  %v5697_v46 = vpack.c.bf16 %v1538_v20, %v1526_v32  ;;  %v5699_v6 = vpack.c.bf16 %v1536_v16, %v1524_v37 }
  0xdc   : > { %v1584_v26 = vand.u32 4294901760, %v7625_v45  ;;  %v5702_v51 = vpack.c.bf16 %v1554_v22, %v1542_v62  ;;  %v1567_v8 = vsub.f32 %v7619_v24, %v1566_v41  ;;  %v1579_v25 = vsub.f32 %v7620_v11, %v1578_v0  ;;  %v7634_v11 = vld [vmem:[#allocation77_spill] sm:$0xff] }
  0xdd   : > { %7622 = vst [vmem:[#allocation118_spill] sm:$0xff] %v5695_v21  ;;  %7623 = vst [vmem:[#allocation119_spill] sm:$0xff] %v5697_v46  ;;  %v1573_v33 = vsub.f32 %v7621_v18, %v1572_v14  ;;  %v5709_v42 = vpack.c.bf16 %v1556_v10, %v1544_v61  ;;  %v5711_v37 = vpack.c.bf16 %v1560_v7, %v1548_v9  ;;  %v5725_v61 = vld [vmem:[%s4800_s29 + $0x10] sm:$0xff]  ;;  %v5730_v9 = vld [vmem:[%s4800_s29 + $0x18] sm:$0xff]  ;;  %v1596_v24 = vand.u32 4294901760, %v7634_v11 }
  0xde   : > { %7624 = vst [vmem:[#allocation120_spill] sm:$0xff] %v5699_v6  ;;  %7626 = vst [vmem:[#allocation121_spill] sm:$0xff] %v5702_v51  ;;  %v1585_v16 = vsub.f32 %v7625_v45, %v1584_v26  ;;  %v5716_v62 = vpack.c.bf16 %v1562_v12, %v1550_v4  ;;  %v5718_v22 = vpack.c.bf16 %v1578_v0, %v1566_v41  ;;  %v1568_v32 = vand.u32 4294901760, %v1567_v8  ;;  %v5735_v4 = vld [vmem:[%s4800_s29] sm:$0xff]  ;;  %v7633_v7 = vld [vmem:[#allocation76_spill] sm:$0xff] }
  0xdf   : > { %7627 = vst [vmem:[#allocation122_spill] sm:$0xff] %v5709_v42  ;;  %7628 = vst [vmem:[#allocation123_spill] sm:$0xff] %v5711_v37  ;;  %v5720_v15 = vpack.c.bf16 %v1584_v26, %v1572_v14  ;;  %v1580_v20 = vand.u32 4294901760, %v1579_v25  ;;  %v1574_v10 = vand.u32 4294901760, %v1573_v33  ;;  %v5740_v26 = vld [vmem:[%s4800_s29 + $0x8] sm:$0xff]  ;;  %v7632_v33 = vld [vmem:[#allocation75_spill] sm:$0xff]  ;;  %v1597_v46 = vsub.f32 %v7634_v11, %v1596_v24 }
  0xe0   : > { %7629 = vst [vmem:[#allocation124_spill] sm:$0xff] %v5716_v62  ;;  %7630 = vst [vmem:[#allocation125_spill] sm:$0xff] %v5718_v22  ;;  %v1586_v41 = vand.u32 4294901760, %v1585_v16  ;;  %v1602_v45 = vand.u32 4294901760, %v7633_v7  ;;  %v7635_v14 = vld [vmem:[#allocation79_spill] sm:$0xff] }
  0xe1   : > { %7631 = vst [vmem:[#allocation126_spill] sm:$0xff] %v5720_v15  ;;  %v1608_v15 = vand.u32 4294901760, %v7635_v14  ;;  %v5750_v62 = vpack.c.bf16 %v1580_v20, %v1568_v32 }
  0xe2   : > { %v5754_v42 = vpack.c.bf16 %v1586_v41, %v1574_v10  ;;  %v7639_v10 = vld [vmem:[#allocation80_spill] sm:$0xff] }
  0xe3   : > { %7636 = vst [vmem:[#allocation127_spill] sm:$0xff] %v5750_v62  ;;  %v1609_v51 = vsub.f32 %v7635_v14, %v1608_v15  ;;  %v1614_v41 = vand.u32 4294901760, %v7639_v10 }
  0xe4   : > { %7637 = vst [vmem:[#allocation128_spill] sm:$0xff] %v5754_v42 }
  0xe9   : > { %v260_v60 = vpop.xlane.xlu1 %259 }
  0xea   : > { %v5707_v34 = vmul.f32 0.00390625, %v260_v60  ;;  %v257_v53 = vpop.xlane.xlu0 %256 }
  0xeb   : > { %v5714_v40 = vmul.f32 0.00390625, %v257_v53  ;;  %v1590_v53 = vand.u32 4294901760, %v7632_v33 }
  0xec   : > { %v496_v35 = vmul.f32 %v5707_v34, %v5707_v34 }
  0xed   : > { %v380_v0 = vpop.xlane.xlu1 %379  ;;  %v495_v12 = vmul.f32 %v5714_v40, %v5714_v40  ;;  %v1591_v22 = vsub.f32 %v7632_v33, %v1590_v53  ;;  %v7640_v33 = vld [vmem:[#allocation81_spill] sm:$0xff] }
  0xee   : > { %v472_v8 = vmul.f32 0.00390625, %v380_v0  ;;  %v377_v25 = vpop.xlane.xlu0 %376  ;;  %v1603_v0 = vsub.f32 %v7633_v7, %v1602_v45  ;;  %v1598_v7 = vand.u32 4294901760, %v1597_v46  ;;  %v1626_v11 = vand.u32 4294901760, %v7640_v33 }
  0xef   : > { %v471_v18 = vmul.f32 0.00390625, %v377_v25  ;;  %v1592_v21 = vand.u32 4294901760, %v1591_v22 }
  0xf0   : > { %v520_v16 = vsub.f32 %v472_v8, %v496_v35  ;;  %v1604_v1 = vand.u32 4294901760, %v1603_v0  ;;  %v5758_v35 = vpack.c.bf16 %v1602_v45, %v1590_v53  ;;  %v5768_v45 = vpack.c.bf16 %v1608_v15, %v1596_v24 }
  0xf1   : > { %v519_v60 = vsub.f32 %v471_v18, %v495_v12  ;;  %v383_v37 = vpop.xlane.xlu1 %382  ;;  %v1610_v12 = vand.u32 4294901760, %v1609_v51 }
  0xf2   : > { %v544_v25 = vmax.f32 %v520_v16, 0.0  ;;  %v263_v6 = vpop.xlane.xlu0 %262  ;;  %7638 = vst [vmem:[#allocation129_spill] sm:$0xff] %v5758_v35  ;;  %v473_v8 = vmul.f32 0.00390625, %v383_v37  ;;  %v5766_v0 = vpack.c.bf16 %v1604_v1, %v1592_v21  ;;  %7642 = vst [vmem:[#allocation131_spill] sm:$0xff] %v5768_v45  ;;  %v1627_v1 = vsub.f32 %v7640_v33, %v1626_v11  ;;  %v5780_v21 = vld [vmem:[%s4800_s29 + $0x28] sm:$0xff]  ;;  %v5793_v33 = vld [vmem:[%s4800_s29 + $0x30] sm:$0xff] }
  0xf3   : > { %v543_v32 = vmax.f32 %v519_v60, 0.0  ;;  %v5760_v20 = vmul.f32 0.00390625, %v263_v6  ;;  %v5771_v6 = vld [vmem:[%s4800_s29 + $0x20] sm:$0xff]  ;;  %v1615_v60 = vsub.f32 %v7639_v10, %v1614_v41  ;;  %v5784_v15 = vpack.c.bf16 %v1610_v12, %v1598_v7  ;;  %v5800_v45 = vld [vmem:[%s4800_s29 + $0x38] sm:$0xff] }
  0xf4   : > { %v616_v18 = vadd.f32 1e-12, %v544_v25  ;;  %7641 = vst [vmem:[#allocation130_spill] sm:$0xff] %v5766_v0  ;;  %v1628_v7 = vand.u32 4294901760, %v1627_v1  ;;  %v7312_v1 = vand.u32 4294901760, %v5362_v50 }
  0xf5   : > { %v615_v14 = vadd.f32 1e-12, %v543_v32  ;;  %v497_v22 = vmul.f32 %v5760_v20, %v5760_v20  ;;  %v386_v16 = vpop.xlane.xlu1 %385  ;;  %7643 = vst [vmem:[#allocation132_spill] sm:$0xff] %v5784_v15  ;;  %v7644_v32 = vld [vmem:[#allocation82_spill] sm:$0xff] }
  0xf6   : > { %4396 = vrsqrt.f32 %v616_v18  ;;  %v266_v51 = vpop.xlane.xlu0 %265  ;;  %v474_v37 = vmul.f32 0.00390625, %v386_v16  ;;  %v1620_v18 = vand.u32 4294901760, %v7644_v32  ;;  %v7645_v16 = vld [vmem:[#allocation83_spill] sm:$0xff] }
  0xf7   : > { %4398 = vrsqrt.f32 %v615_v14  ;;  %v521_v53 = vsub.f32 %v473_v8, %v497_v22  ;;  %v5776_v25 = vmul.f32 0.00390625, %v266_v51  ;;  %v1632_v46 = vand.u32 4294901760, %v7645_v16 }
  0xf8   : > { %v1616_v22 = vand.u32 4294901760, %v1615_v60  ;;  %v5790_v51 = vpack.c.bf16 %v1626_v11, %v1614_v41  ;;  %v1621_v12 = vsub.f32 %v7644_v32, %v1620_v18 }
  0xf9   : > { %v545_v0 = vmax.f32 %v521_v53, 0.0  ;;  %v498_v14 = vmul.f32 %v5776_v25, %v5776_v25  ;;  %v389_v8 = vpop.xlane.xlu1 %388  ;;  %v1633_v15 = vsub.f32 %v7645_v16, %v1632_v46  ;;  %v5812_v16 = vld [vmem:[%s4800_s29 + $0x40] sm:$0xff] }
  0xfa   : > { %7646 = vst [vmem:[#allocation133_spill] sm:$0xff] %v5790_v51  ;;  %v269_v10 = vpop.xlane.xlu0 %268  ;;  %v475_v51 = vmul.f32 0.00390625, %v389_v8  ;;  %v1622_v42 = vand.u32 4294901760, %v1621_v12  ;;  %v5807_v62 = vpack.c.bf16 %v1628_v7, %v1616_v22  ;;  %v5826_v8 = vsub.f32 %v5362_v50, %v7312_v1 }
  0xfb   : > { %v617_v53 = vadd.f32 1e-12, %v545_v0  ;;  %v522_v41 = vsub.f32 %v474_v37, %v498_v14  ;;  %v5804_v60 = vmul.f32 0.00390625, %v269_v10  ;;  %v1634_v24 = vand.u32 4294901760, %v1633_v15  ;;  %v5817_v37 = vld [vmem:[%s4800_s29 + $0x48] sm:$0xff] }
  0xfc   : > { %7647 = vst [vmem:[#allocation134_spill] sm:$0xff] %v5807_v62  ;;  %v5809_v0 = vpack.c.bf16 %v1632_v46, %v1620_v18  ;;  %7649 = vst [vmem:[#allocation136_spill] sm:$0xff] %v5826_v8  ;;  %v7651_v10 = vsub.f32 %v5740_v26, %v5714_v40  ;;  %v7656_v26 = vsub.f32 %v5725_v61, %v5707_v34  ;;  %v5863_v8 = vld [vmem:[%s4800_s29 + $0x58] sm:$0xff] }
  0xfd   : > { %4400 = vrsqrt.f32 %v617_v53  ;;  %v546_v32 = vmax.f32 %v522_v41, 0.0  ;;  %v392_v35 = vpop.xlane.xlu1 %391  ;;  %v499_v15 = vmul.f32 %v5804_v60, %v5804_v60  ;;  %v5830_v7 = vpack.c.bf16 %v1634_v24, %v1622_v42  ;;  %v5840_v24 = vld [vmem:[%s4800_s29 + $0x50] sm:$0xff] }
  0xfe   : > { %7648 = vst [vmem:[#allocation135_spill] sm:$0xff] %v5809_v0  ;;  %v272_v14 = vpop.xlane.xlu0 %271  ;;  %v476_v22 = vmul.f32 0.00390625, %v392_v35  ;;  %v7652_v41 = vsub.f32 %v5735_v4, %v5714_v40 }
  0xff   : > { %v618_v46 = vadd.f32 1e-12, %v546_v32  ;;  %v5828_v18 = vmul.f32 0.00390625, %v272_v14  ;;  %7650 = vst [vmem:[#allocation137_spill] sm:$0xff] %v5830_v7  ;;  %v523_v53 = vsub.f32 %v475_v51, %v499_v15 }
 0x100   : > { %v4397_v12 = vpop.eup %4396 }
 0x101   : > { %v4399_v0 = vpop.eup %4398  ;;  %4402 = vrsqrt.f32 %v618_v46  ;;  %v500_v1 = vmul.f32 %v5828_v18, %v5828_v18  ;;  %v395_v32 = vpop.xlane.xlu1 %394  ;;  %v547_v35 = vmax.f32 %v523_v53, 0.0  ;;  %v7653_v53 = vsub.f32 %v5730_v9, %v5707_v34 }
 0x102   : > { %v275_v15 = vpop.xlane.xlu0 %274  ;;  %v664_v46 = vmul.f32 %v4399_v0, %v7651_v10  ;;  %v663_v11 = vmul.f32 %v4399_v0, %v7652_v41  ;;  %v477_v58 = vmul.f32 0.00390625, %v395_v32  ;;  %v665_v10 = vmul.f32 %v4397_v12, %v7656_v26 }
 0x103   : > { %v524_v50 = vsub.f32 %v476_v22, %v500_v1  ;;  %v5850_v14 = vmul.f32 0.00390625, %v275_v15  ;;  %v666_v42 = vmul.f32 %v4397_v12, %v7653_v53  ;;  %v619_v29 = vadd.f32 1e-12, %v547_v35 }
 0x104   : > { %v5855_v27 = vand.u32 4294901760, %v664_v46  ;;  %v5857_v51 = vand.u32 4294901760, %v663_v11  ;;  %v7657_v0 = vand.u32 4294901760, %v5367_v54 }
 0x105   : > { %v548_v4 = vmax.f32 %v524_v50, 0.0  ;;  %v501_v1 = vmul.f32 %v5850_v14, %v5850_v14  ;;  %v398_v9 = vpop.xlane.xlu1 %397  ;;  %4404 = vrsqrt.f32 %v619_v29  ;;  %v5882_v53 = vand.u32 4294901760, %v666_v42 }
 0x106   : > { %7654 = vst [vmem:[#allocation138_spill] sm:$0xff] %v5855_v27  ;;  %7655 = vst [vmem:[#allocation139_spill] sm:$0xff] %v5857_v51  ;;  %v5872_v22 = vsub.f32 %v5367_v54, %v7657_v0  ;;  %v278_v41 = vpop.xlane.xlu0 %277  ;;  %v478_v34 = vmul.f32 0.00390625, %v398_v9  ;;  %v5875_v61 = vsub.f32 %v664_v46, %v5855_v27  ;;  %v5878_v12 = vsub.f32 %v663_v11, %v5857_v51  ;;  %v5892_v11 = vld [vmem:[%s4800_s29 + $0x60] sm:$0xff] }
 0x107   : > { %v4401_v50 = vpop.eup %4400  ;;  %v620_v32 = vadd.f32 1e-12, %v548_v4  ;;  %v525_v35 = vsub.f32 %v477_v58, %v501_v1  ;;  %v5880_v15 = vmul.f32 0.00390625, %v278_v41  ;;  %7661 = vst [vmem:[#allocation143_spill] sm:$0xff] %v5882_v53  ;;  %v5886_v0 = vand.u32 4294901760, %v665_v10  ;;  %v5897_v4 = vld [vmem:[%s4800_s29 + $0x68] sm:$0xff] }
 0x108   : > { %7658 = vst [vmem:[#allocation140_spill] sm:$0xff] %v5872_v22  ;;  %7659 = vst [vmem:[#allocation141_spill] sm:$0xff] %v5875_v61  ;;  %v917_v26 = vand.u32 4294901760, %v5875_v61  ;;  %v923_v29 = vand.u32 4294901760, %v5878_v12  ;;  %v7663_v46 = vsub.f32 %v5780_v21, %v5760_v20 }
 0x109   : > { %7660 = vst [vmem:[#allocation142_spill] sm:$0xff] %v5878_v12  ;;  %7662 = vst [vmem:[#allocation144_spill] sm:$0xff] %v5886_v0  ;;  %4406 = vrsqrt.f32 %v620_v32  ;;  %v549_v41 = vmax.f32 %v525_v35, 0.0  ;;  %v401_v40 = vpop.xlane.xlu1 %400  ;;  %v502_v51 = vmul.f32 %v5880_v15, %v5880_v15  ;;  %v5904_v32 = vsub.f32 %v666_v42, %v5882_v53 }
 0x10a   : > { %v668_v9 = vmul.f32 %v4401_v50, %v7663_v46  ;;  %2441 = vmatprep.mubr.f32.mxu0 %v917_v26  ;;  %v281_v27 = vpop.xlane.xlu0 %280  ;;  %v479_v21 = vmul.f32 0.00390625, %v401_v40  ;;  %v918_v46 = vsub.f32 %v5875_v61, %v917_v26  ;;  %v924_v35 = vsub.f32 %v5878_v12, %v923_v29  ;;  %v5920_v26 = vld [vmem:[%s4800_s29 + $0x70] sm:$0xff] }
 0x10b   : > { %7664 = vst [vmem:[#allocation145_spill] sm:$0xff] %v5904_v32  ;;  %v5907_v58 = vpop.eup %4402  ;;  %v621_v54 = vadd.f32 1e-12, %v549_v41  ;;  %v5909_v22 = vmul.f32 0.00390625, %v281_v27  ;;  %2445 = vmatmul.mubr.f32.vlgmr.msra.gmra.mrb[0].mxu0 %v923_v29  ;;  %v5913_v1 = vsub.f32 %v665_v10, %v5886_v0  ;;  %v526_v7 = vsub.f32 %v478_v34, %v502_v51  ;;  %v5925_v41 = vld [vmem:[%s4800_s29 + $0x78] sm:$0xff] }
 0x10c   : > { %v933_v40 = vand.u32 4294901760, %v5904_v32  ;;  %v919_v62 = vand.u32 4294901760, %v918_v46  ;;  %v5916_v42 = vand.u32 4294901760, %v668_v9  ;;  %3920 = vmatpush1.bf16.msra.mxu0 %v5558_v49  ;;  %v925_v49 = vand.u32 4294901760, %v924_v35 }
 0x10d   : > { %7665 = vst [vmem:[#allocation146_spill] sm:$0xff] %v5913_v1  ;;  %4408 = vrsqrt.f32 %v621_v54  ;;  %v503_v51 = vmul.f32 %v5909_v22, %v5909_v22  ;;  %v404_v34 = vpop.xlane.xlu1 %403  ;;  %3922 = vmatprep.subr.bf16.mxu0 %v5570_v44  ;;  %v550_v29 = vmax.f32 %v526_v7, 0.0  ;;  %v939_v46 = vand.u32 4294901760, %v5913_v1 }
 0x10e   : > { %2453 = vmatprep.mubr.f32.mxu0 %v933_v40  ;;  %920 = vmatprep.mubr.f32.mxu1 %v919_v62  ;;  %v284_v54 = vpop.xlane.xlu0 %283  ;;  %v480_v27 = vmul.f32 0.00390625, %v404_v34  ;;  %v934_v10 = vsub.f32 %v5904_v32, %v933_v40  ;;  %v5937_v0 = vsub.f32 %v668_v9, %v5916_v42  ;;  %v7667_v7 = vsub.f32 %v5771_v6, %v5760_v20  ;;  %v5950_v40 = vld [vmem:[%s4800_s29 + $0x80] sm:$0xff]  ;;  %v5955_v34 = vld [vmem:[%s4800_s29 + $0x88] sm:$0xff] }
 0x10f   : > { %v527_v12 = vsub.f32 %v479_v21, %v503_v51  ;;  %v5933_v61 = vmul.f32 0.00390625, %v284_v54  ;;  %v5939_v53 = vpop.eup %4404  ;;  %v622_v44 = vadd.f32 1e-12, %v550_v29  ;;  %926 = vmatmul.mubr.f32.vlgmr.msra.gmra.mrb[0].mxu1 %v925_v49  ;;  %2457 = vmatmul.mubr.f32.gmra.mrb[2].mxu0 %v939_v46  ;;  %v940_v62 = vsub.f32 %v5913_v1, %v939_v46 }
 0x110   : > { %7666 = vst [vmem:[#allocation147_spill] sm:$0xff] %v5937_v0  ;;  %v667_v35 = vmul.f32 %v4401_v50, %v7667_v7  ;;  %v7668_v21 = vsub.f32 %v5800_v45, %v5776_v25  ;;  %3728 = vmatpush1.bf16.msra.mxu1 %v5556_v59  ;;  %3924 = vmatpush1.bf16.msra.mxu0 %v5572_v28  ;;  %v935_v45 = vand.u32 4294901760, %v934_v10  ;;  %v949_v50 = vand.u32 4294901760, %v5937_v0 }
 0x111   : > { %v551_v54 = vmax.f32 %v527_v12, 0.0  ;;  %v504_v20 = vmul.f32 %v5933_v61, %v5933_v61  ;;  %v407_v6 = vpop.xlane.xlu1 %406  ;;  %4410 = vrsqrt.f32 %v622_v44  ;;  %v941_v46 = vand.u32 4294901760, %v940_v62  ;;  %3730 = vmatprep.subr.bf16.mxu1 %v5566_v31  ;;  %3926 = vmatprep.subr.bf16.mxu0 %v5586_v13  ;;  %v5980_v62 = vld [vmem:[%s4800_s29 + $0x90] sm:$0xff] }
 0x112   : > { %v670_v51 = vmul.f32 %v5907_v58, %v7668_v21  ;;  %v287_v49 = vpop.xlane.xlu0 %286  ;;  %v5970_v9 = vand.u32 4294901760, %v667_v35  ;;  %936 = vmatprep.mubr.f32.mxu1 %v935_v45  ;;  %2465 = vmatprep.mubr.f32.mxu0 %v949_v50  ;;  %v481_v28 = vmul.f32 0.00390625, %v407_v6  ;;  %v950_v10 = vsub.f32 %v5937_v0, %v949_v50  ;;  %v7694_v0 = vld [vmem:[#allocation113_spill] sm:$0xff] }
 0x113   : > { %v5966_v12 = vpop.eup %4406  ;;  %v623_v59 = vadd.f32 1e-12, %v551_v54  ;;  %v528_v7 = vsub.f32 %v480_v27, %v504_v20  ;;  %v5968_v21 = vmul.f32 0.00390625, %v287_v49  ;;  %v7669_v31 = vsub.f32 %v5793_v33, %v5776_v25  ;;  %v5985_v54 = vld [vmem:[%s4800_s29 + $0x98] sm:$0xff]  ;;  %942 = vmatmul.mubr.f32.gmra.mrb[2].mxu1 %v941_v46  ;;  %v6045_v20 = vld [vmem:[%s4800_s29 + $0xb0] sm:$0xff] }
 0x114   : > { %v5973_v44 = vand.u32 4294901760, %v670_v51  ;;  %3928 = vmatpush1.bf16.msra.mxu0 %v5588_v47  ;;  %v5991_v33 = vsub.f32 %v667_v35, %v5970_v9  ;;  %3732 = vmatpush1.bf16.msra.mxu1 %v5568_v30 }
 0x115   : > { %v669_v13 = vmul.f32 %v5907_v58, %v7669_v31  ;;  %4412 = vrsqrt.f32 %v623_v59  ;;  %v552_v6 = vmax.f32 %v528_v7, 0.0  ;;  %v410_v45 = vpop.xlane.xlu1 %409  ;;  %v505_v25 = vmul.f32 %v5968_v21, %v5968_v21  ;;  %3930 = vmatprep.subr.bf16.mxu0 %v5610_v2  ;;  %3734 = vmatprep.subr.bf16.mxu1 %v5592_v43 }
 0x116   : > { %7670 = vst [vmem:[#allocation148_spill] sm:$0xff] %v5991_v33  ;;  %v951_v58 = vand.u32 4294901760, %v950_v10  ;;  %v5996_v50 = vsub.f32 %v670_v51, %v5973_v44  ;;  %v290_v49 = vpop.xlane.xlu0 %289  ;;  %v482_v7 = vmul.f32 0.00390625, %v410_v45  ;;  %v955_v51 = vand.u32 4294901760, %v5991_v33  ;;  %v6019_v45 = vld [vmem:[%s4800_s29 + $0xa8] sm:$0xff] }
 0x117   : > { %v6000_v46 = vpop.eup %4408  ;;  %v624_v47 = vadd.f32 1e-12, %v552_v6  ;;  %v6002_v59 = vmul.f32 0.00390625, %v290_v49  ;;  %v6004_v35 = vand.u32 4294901760, %v669_v13  ;;  %v529_v10 = vsub.f32 %v481_v28, %v505_v25  ;;  %v6014_v6 = vld [vmem:[%s4800_s29 + $0xa0] sm:$0xff] }
 0x118   : > { %7671 = vst [vmem:[#allocation149_spill] sm:$0xff] %v5996_v50  ;;  %952 = vmatprep.mubr.f32.mxu1 %v951_v58  ;;  %v965_v30 = vand.u32 4294901760, %v5996_v50  ;;  %v7672_v31 = vsub.f32 %v5817_v37, %v5804_v60  ;;  %3932 = vmatpush1.bf16.msra.mxu0 %v5612_v55  ;;  %v956_v58 = vsub.f32 %v5991_v33, %v955_v51  ;;  %v6051_v33 = vld [vmem:[%s4800_s29 + $0xb8] sm:$0xff] }
 0x119   : > { %4414 = vrsqrt.f32 %v624_v47  ;;  %v6024_v28 = vsub.f32 %v669_v13, %v6004_v35  ;;  %v413_v25 = vpop.xlane.xlu1 %412  ;;  %2469 = vmatmul.mubr.f32.gmra.mrb[4].mxu0 %v955_v51  ;;  %v553_v37 = vmax.f32 %v529_v10, 0.0  ;;  %v506_v47 = vmul.f32 %v6002_v59, %v6002_v59  ;;  %3736 = vmatpush1.bf16.msra.mxu1 %v5594_v52 }
 0x11a   : > { %v672_v2 = vmul.f32 %v5939_v53, %v7672_v31  ;;  %v966_v31 = vsub.f32 %v5996_v50, %v965_v30  ;;  %v293_v49 = vpop.xlane.xlu0 %292  ;;  %2477 = vmatprep.mubr.f32.mxu0 %v965_v30  ;;  %v7674_v55 = vsub.f32 %v5812_v16, %v5804_v60  ;;  %3738 = vmatprep.subr.bf16.mxu1 %v5606_v63  ;;  %v957_v30 = vand.u32 4294901760, %v956_v58  ;;  %v6061_v58 = vld [vmem:[%s4800_s29 + $0xc0] sm:$0xff] }
 0x11b   : > { %7673 = vst [vmem:[#allocation150_spill] sm:$0xff] %v6024_v28  ;;  %v971_v13 = vand.u32 4294901760, %v6024_v28  ;;  %v6035_v27 = vmul.f32 0.00390625, %v293_v49  ;;  %v6042_v10 = vpop.eup %4410  ;;  %v530_v29 = vsub.f32 %v482_v7, %v506_v47  ;;  %3934 = vmatprep.subr.bf16.mxu0 %v5616_v57  ;;  %v625_v49 = vadd.f32 1e-12, %v553_v37 }
 0x11c   : > { %v6033_v43 = vand.u32 4294901760, %v672_v2  ;;  %v671_v51 = vmul.f32 %v5939_v53, %v7674_v55  ;;  %v967_v50 = vand.u32 4294901760, %v966_v31  ;;  %3936 = vmatpush1.bf16.msra.mxu0 %v5622_v3  ;;  %958 = vmatmul.mubr.f32.gmra.mrb[4].mxu1 %v957_v30  ;;  %v483_v47 = vmul.f32 0.00390625, %v413_v25 }
 0x11d   : > { %v972_v60 = vsub.f32 %v6024_v28, %v971_v13  ;;  %v416_v53 = vpop.xlane.xlu1 %415  ;;  %2481 = vmatmul.mubr.f32.gmra.mrb[6].mxu0 %v971_v13  ;;  %v554_v7 = vmax.f32 %v530_v29, 0.0  ;;  %v507_v3 = vmul.f32 %v6035_v27, %v6035_v27  ;;  %v7676_v29 = vsub.f32 %v5863_v8, %v5828_v18  ;;  %3740 = vmatpush1.bf16.msra.mxu1 %v5608_v36  ;;  %v6089_v8 = vld [vmem:[%s4800_s29 + $0xc8] sm:$0xff] }
 0x11e   : > { %v6056_v63 = vsub.f32 %v672_v2, %v6033_v43  ;;  %v6065_v37 = vand.u32 4294901760, %v671_v51  ;;  %v296_v31 = vpop.xlane.xlu0 %295  ;;  %968 = vmatprep.mubr.f32.mxu1 %v967_v50  ;;  %v7678_v50 = vsub.f32 %v5840_v24, %v5828_v18  ;;  %3742 = vmatprep.subr.bf16.mxu1 %v5614_v56  ;;  %4416 = vrsqrt.f32 %v625_v49  ;;  %v6099_v18 = vld [vmem:[%s4800_s29 + $0xd0] sm:$0xff] }
 0x11f   : > { %v6067_v2 = vpop.eup %4412  ;;  %v973_v52 = vand.u32 4294901760, %v972_v60  ;;  %v674_v13 = vmul.f32 %v5966_v12, %v7676_v29  ;;  %v626_v30 = vadd.f32 1e-12, %v554_v7  ;;  %v6080_v57 = vmul.f32 0.00390625, %v296_v31  ;;  %3938 = vmatprep.subr.bf16.mxu0 %v5634_v19 }
 0x120   : > { %7675 = vst [vmem:[#allocation151_spill] sm:$0xff] %v6056_v63  ;;  %v981_v55 = vand.u32 4294901760, %v6056_v63  ;;  %v6078_v25 = vsub.f32 %v671_v51, %v6065_v37  ;;  %v673_v60 = vmul.f32 %v5966_v12, %v7678_v50  ;;  %v531_v51 = vsub.f32 %v483_v47, %v507_v3  ;;  %3940 = vmatpush1.bf16.msra.mxu0 %v5636_v23  ;;  %v7679_v50 = vld [vmem:[#allocation110_spill] sm:$0xff] }
 0x121   : > { %v6094_v31 = vand.u32 4294901760, %v674_v13  ;;  %v419_v29 = vpop.xlane.xlu1 %418  ;;  %974 = vmatmul.mubr.f32.gmra.mrb[6].mxu1 %v973_v52  ;;  %v484_v24 = vmul.f32 0.00390625, %v416_v53  ;;  %3942 = vmatprep.subr.bf16.mxu0 %v7679_v50  ;;  %v7681_v52 = vld [vmem:[#allocation107_spill] sm:$0xff]  ;;  %4418 = vrsqrt.f32 %v626_v30  ;;  %v508_v53 = vmul.f32 %v6080_v57, %v6080_v57 }
 0x122   : > { %7677 = vst [vmem:[#allocation152_spill] sm:$0xff] %v6078_v25  ;;  %2489 = vmatprep.mubr.f32.mxu0 %v981_v55  ;;  %v982_v7 = vsub.f32 %v6056_v63, %v981_v55  ;;  %v987_v56 = vand.u32 4294901760, %v6078_v25  ;;  %v299_v12 = vpop.xlane.xlu0 %298  ;;  %v555_v55 = vmax.f32 %v531_v51, 0.0  ;;  %v6109_v23 = vand.u32 4294901760, %v673_v60  ;;  %3744 = vmatpush1.bf16.msra.mxu1 %v7681_v52 }
 0x123   : > { %v6104_v47 = vpop.eup %4414  ;;  %v6107_v36 = vsub.f32 %v674_v13, %v6094_v31  ;;  %v7682_v50 = vsub.f32 %v5897_v4, %v5850_v14  ;;  %v6124_v30 = vmul.f32 0.00390625, %v299_v12  ;;  %v7686_v4 = vld [vmem:[#allocation111_spill] sm:$0xff] }
 0x124   : > { %v983_v3 = vand.u32 4294901760, %v982_v7  ;;  %2493 = vmatmul.mubr.f32.gmra.mrb[8].mxu0 %v987_v56  ;;  %v988_v49 = vsub.f32 %v6078_v25, %v987_v56  ;;  %v7683_v7 = vld [vmem:[#allocation108_spill] sm:$0xff]  ;;  %v6122_v19 = vsub.f32 %v673_v60, %v6109_v23  ;;  %v7685_v56 = vsub.f32 %v5892_v11, %v5850_v14 }
 0x125   : > { %7680 = vst [vmem:[#allocation110_spill] sm:$0xff] %v6107_v36  ;;  %v676_v51 = vmul.f32 %v6000_v46, %v7682_v50  ;;  %3746 = vmatprep.subr.bf16.mxu1 %v7683_v7  ;;  %v997_v13 = vand.u32 4294901760, %v6107_v36  ;;  %3944 = vmatpush1.bf16.msra.mxu0 %v7686_v4  ;;  %v6132_v50 = vld [vmem:[%s4800_s29 + $0xd8] sm:$0xff]  ;;  %v532_v25 = vsub.f32 %v484_v24, %v508_v53  ;;  %v627_v12 = vadd.f32 1e-12, %v555_v55  ;;  %v7687_v4 = vld [vmem:[#allocation109_spill] sm:$0xff] }
 0x126   : > { %984 = vmatprep.mubr.f32.mxu1 %v983_v3  ;;  %7684 = vst [vmem:[#allocation107_spill] sm:$0xff] %v6122_v19  ;;  %v675_v52 = vmul.f32 %v6000_v46, %v7685_v56  ;;  %v422_v16 = vpop.xlane.xlu1 %421  ;;  %v989_v7 = vand.u32 4294901760, %v988_v49  ;;  %v302_v63 = vpop.xlane.xlu0 %301  ;;  %3946 = vmatprep.subr.bf16.mxu0 %v5662_v17  ;;  %v1003_v14 = vand.u32 4294901760, %v6122_v19  ;;  %v6142_v46 = vld [vmem:[%s4800_s29 + $0xe0] sm:$0xff]  ;;  %v485_v17 = vmul.f32 0.00390625, %v419_v29  ;;  %v7689_v55 = vld [vmem:[#allocation112_spill] sm:$0xff] }
 0x127   : > { %v6136_v60 = vand.u32 4294901760, %v676_v51  ;;  %2501 = vmatprep.mubr.f32.mxu0 %v997_v13  ;;  %v998_v11 = vsub.f32 %v6107_v36, %v997_v13  ;;  %3748 = vmatpush1.bf16.msra.mxu1 %v7687_v4  ;;  %v556_v24 = vmax.f32 %v532_v25, 0.0  ;;  %v509_v36 = vmul.f32 %v6124_v30, %v6124_v30  ;;  %v7692_v56 = vld [vmem:[#allocation114_spill] sm:$0xff] }
 0x128   : > { %990 = vmatmul.mubr.f32.gmra.mrb[8].mxu1 %v989_v7  ;;  %v6150_v53 = vand.u32 4294901760, %v675_v52  ;;  %3750 = vmatprep.subr.bf16.mxu1 %v7689_v55  ;;  %v1004_v13 = vsub.f32 %v6122_v19, %v1003_v14  ;;  %v7690_v4 = vsub.f32 %v5925_v41, %v5880_v15  ;;  %v6164_v55 = vmul.f32 0.00390625, %v302_v63  ;;  %v6177_v63 = vld [vmem:[%s4800_s29 + $0xe8] sm:$0xff] }
 0x129   : > { %v6148_v49 = vsub.f32 %v676_v51, %v6136_v60  ;;  %2505 = vmatmul.mubr.f32.gmra.mrb[10].mxu0 %v1003_v14  ;;  %v999_v3 = vand.u32 4294901760, %v998_v11  ;;  %v628_v7 = vadd.f32 1e-12, %v556_v24  ;;  %v533_v19 = vsub.f32 %v485_v17, %v509_v36  ;;  %v7695_v17 = vld [vmem:[#allocation115_spill] sm:$0xff] }
 0x12a   : > { %v678_v25 = vmul.f32 %v6042_v10, %v7690_v4  ;;  %v6162_v29 = vsub.f32 %v675_v52, %v6150_v53  ;;  %3948 = vmatpush1.bf16.msra.mxu0 %v7692_v56  ;;  %v1005_v14 = vand.u32 4294901760, %v1004_v13  ;;  %v7693_v41 = vsub.f32 %v5920_v26, %v5880_v15  ;;  %v6174_v52 = vpop.eup %4416 }
 0x12b   : > { %7688 = vst [vmem:[#allocation108_spill] sm:$0xff] %v6148_v49  ;;  %v1013_v51 = vand.u32 4294901760, %v6148_v49  ;;  %1000 = vmatprep.mubr.f32.mxu1 %v999_v3  ;;  %3752 = vmatpush1.bf16.msra.mxu1 %v7694_v0  ;;  %4420 = vrsqrt.f32 %v627_v12  ;;  %v557_v15 = vmax.f32 %v533_v19, 0.0 }
 0x12c   : > { %7691 = vst [vmem:[#allocation111_spill] sm:$0xff] %v6162_v29  ;;  %v6167_v28 = vand.u32 4294901760, %v678_v25  ;;  %v677_v24 = vmul.f32 %v6042_v10, %v7693_v41  ;;  %v425_v4 = vpop.xlane.xlu1 %424  ;;  %v1019_v36 = vand.u32 4294901760, %v6162_v29  ;;  %3754 = vmatprep.subr.bf16.mxu1 %v7695_v17  ;;  %4422 = vrsqrt.f32 %v628_v7  ;;  %1006 = vmatmul.mubr.f32.gmra.mrb[10].mxu1 %v1005_v14  ;;  %v6190_v10 = vpop.eup %4418 }
 0x12d   : > { %2513 = vmatprep.mubr.f32.mxu0 %v1013_v51  ;;  %v1014_v56 = vsub.f32 %v6148_v49, %v1013_v51  ;;  %3950 = vmatprep.subr.bf16.mxu0 %v5686_v48  ;;  %v486_v41 = vmul.f32 0.00390625, %v422_v16  ;;  %v510_v7 = vmul.f32 %v6164_v55, %v6164_v55  ;;  %v629_v19 = vadd.f32 1e-12, %v557_v15 }
 0x12e   : > { %v6185_v0 = vsub.f32 %v678_v25, %v6167_v28  ;;  %v6187_v26 = vand.u32 4294901760, %v677_v24  ;;  %2517 = vmatmul.mubr.f32.gmra.mrb[12].mxu0 %v1019_v36  ;;  %v1020_v13 = vsub.f32 %v6162_v29, %v1019_v36  ;;  %v7698_v48 = vsub.f32 %v5955_v34, %v5909_v22  ;;  %v6213_v34 = vld [vmem:[%s4800_s29 + $0xf0] sm:$0xff] }
 0x12f   : > { %v305_v11 = vpop.xlane.xlu0 %304  ;;  %v1015_v12 = vand.u32 4294901760, %v1014_v56  ;;  %v7699_v56 = vld [vmem:[#allocation116_spill] sm:$0xff]  ;;  %3952 = vmatpush1.bf16.msra.mxu0 %v5688_v5  ;;  %v534_v36 = vsub.f32 %v486_v41, %v510_v7  ;;  %v7700_v15 = vsub.f32 %v5950_v40, %v5909_v22  ;;  %4424 = vrsqrt.f32 %v629_v19  ;;  %v6223_v22 = vld [vmem:[%s4800_s29 + $0xf8] sm:$0xff]  ;;  %v7702_v19 = vld [vmem:[#allocation117_spill] sm:$0xff] }
 0x130   : > { %7696 = vst [vmem:[#allocation109_spill] sm:$0xff] %v6185_v0  ;;  %v1029_v25 = vand.u32 4294901760, %v6185_v0  ;;  %v6197_v14 = vsub.f32 %v677_v24, %v6187_v26  ;;  %v680_v17 = vmul.f32 %v6067_v2, %v7698_v48  ;;  %3756 = vmatpush1.bf16.msra.mxu1 %v7699_v56  ;;  %v1021_v16 = vand.u32 4294901760, %v1020_v13  ;;  %3954 = vmatprep.subr.bf16.mxu0 %v5690_v39 }
 0x131   : > { %1016 = vmatprep.mubr.f32.mxu1 %v1015_v12  ;;  %v6205_v3 = vmul.f32 0.00390625, %v305_v11  ;;  %v679_v24 = vmul.f32 %v6067_v2, %v7700_v15  ;;  %3758 = vmatprep.subr.bf16.mxu1 %v5682_v38  ;;  %v428_v11 = vpop.xlane.xlu1 %427  ;;  %v558_v40 = vmax.f32 %v534_v36, 0.0  ;;  %v487_v56 = vmul.f32 0.00390625, %v425_v4 }
 0x132   : > { %7697 = vst [vmem:[#allocation112_spill] sm:$0xff] %v6197_v14  ;;  %2525 = vmatprep.mubr.f32.mxu0 %v1029_v25  ;;  %v1035_v5 = vand.u32 4294901760, %v6197_v14  ;;  %v1030_v12 = vsub.f32 %v6185_v0, %v1029_v25  ;;  %v6219_v13 = vand.u32 4294901760, %v680_v17  ;;  %1022 = vmatmul.mubr.f32.gmra.mrb[12].mxu1 %v1021_v16  ;;  %v7704_v36 = vsub.f32 %v5985_v54, %v5933_v61  ;;  %v7710_v0 = vld [vmem:[#allocation119_spill] sm:$0xff] }
 0x133   : > { %v308_v51 = vpop.xlane.xlu0 %307  ;;  %v6227_v2 = vand.u32 4294901760, %v679_v24  ;;  %v630_v15 = vadd.f32 1e-12, %v558_v40  ;;  %v511_v16 = vmul.f32 %v6205_v3, %v6205_v3 }
 0x134   : > { %2529 = vmatmul.mubr.f32.gmra.mrb[14].mxu0 %v1035_v5  ;;  %v1031_v41 = vand.u32 4294901760, %v1030_v12  ;;  %v6230_v7 = vsub.f32 %v680_v17, %v6219_v13  ;;  %v1036_v25 = vsub.f32 %v6197_v14, %v1035_v5  ;;  %3760 = vmatpush1.bf16.msra.mxu1 %v7702_v19  ;;  %v682_v17 = vmul.f32 %v6104_v47, %v7704_v36  ;;  %v7705_v12 = vld [vmem:[#allocation118_spill] sm:$0xff]  ;;  %v7706_v5 = vld [vmem:[#allocation120_spill] sm:$0xff]  ;;  %v7708_v14 = vld [vmem:[#allocation121_spill] sm:$0xff] }
 0x135   : > { %v6235_v48 = vsub.f32 %v679_v24, %v6227_v2  ;;  %3762 = vmatprep.subr.bf16.mxu1 %v7705_v12  ;;  %3956 = vmatpush1.bf16.msra.mxu0 %v7706_v5  ;;  %v6246_v19 = vmul.f32 0.00390625, %v308_v51  ;;  %v7707_v24 = vsub.f32 %v5980_v62, %v5933_v61  ;;  %v6253_v54 = vpop.eup %4420  ;;  %v6256_v36 = vld [vmem:[%s4800_s29 + $0x100] sm:$0xff]  ;;  %v535_v5 = vsub.f32 %v487_v56, %v511_v16  ;;  %v6266_v61 = vld [vmem:[%s4800_s29 + $0x108] sm:$0xff] }
 0x136   : > { %7701 = vst [vmem:[#allocation114_spill] sm:$0xff] %v6230_v7  ;;  %1032 = vmatprep.mubr.f32.mxu1 %v1031_v41  ;;  %v1045_v4 = vand.u32 4294901760, %v6230_v7  ;;  %v1037_v40 = vand.u32 4294901760, %v1036_v25  ;;  %3958 = vmatprep.subr.bf16.mxu0 %v7708_v14  ;;  %v6261_v25 = vand.u32 4294901760, %v682_v17  ;;  %v6263_v51 = vpop.eup %4422  ;;  %4426 = vrsqrt.f32 %v630_v15 }
 0x137   : > { %v311_v39 = vpop.xlane.xlu0 %310  ;;  %7703 = vst [vmem:[#allocation113_spill] sm:$0xff] %v6235_v48  ;;  %v681_v38 = vmul.f32 %v6104_v47, %v7707_v24  ;;  %v1051_v41 = vand.u32 4294901760, %v6235_v48  ;;  %v431_v24 = vpop.xlane.xlu1 %430  ;;  %v559_v12 = vmax.f32 %v535_v5, 0.0  ;;  %v488_v15 = vmul.f32 0.00390625, %v428_v11 }
 0x138   : > { %2537 = vmatprep.mubr.f32.mxu0 %v1045_v4  ;;  %1038 = vmatmul.mubr.f32.gmra.mrb[14].mxu1 %v1037_v40  ;;  %v1046_v47 = vsub.f32 %v6230_v7, %v1045_v4  ;;  %v6274_v56 = vsub.f32 %v682_v17, %v6261_v25  ;;  %v512_v4 = vmul.f32 %v6246_v19, %v6246_v19  ;;  %v7713_v17 = vld [vmem:[#allocation122_spill] sm:$0xff] }
 0x139   : > { %v6271_v14 = vand.u32 4294901760, %v681_v38  ;;  %2541 = vmatmul.mubr.f32.gmra.mrb[16].mxu0 %v1051_v41  ;;  %v1052_v16 = vsub.f32 %v6235_v48, %v1051_v41  ;;  %3764 = vmatpush1.bf16.msra.mxu1 %v7710_v0  ;;  %v7712_v40 = vsub.f32 %v6019_v45, %v5968_v21  ;;  %v7714_v41 = vld [vmem:[#allocation123_spill] sm:$0xff]  ;;  %v631_v0 = vadd.f32 1e-12, %v559_v12  ;;  %v7715_v48 = vld [vmem:[#allocation125_spill] sm:$0xff]  ;;  %v6300_v1 = vpop.eup %4424 }
 0x13a   : > { %7709 = vst [vmem:[#allocation115_spill] sm:$0xff] %v6274_v56  ;;  %v1047_v29 = vand.u32 4294901760, %v1046_v47  ;;  %3766 = vmatprep.subr.bf16.mxu1 %v7713_v17  ;;  %3960 = vmatpush1.bf16.msra.mxu0 %v7714_v41  ;;  %v1061_v11 = vand.u32 4294901760, %v6274_v56  ;;  %v6290_v47 = vmul.f32 0.00390625, %v311_v39  ;;  %v536_v7 = vsub.f32 %v488_v15, %v512_v4  ;;  %v6303_v12 = vld [vmem:[%s4800_s29 + $0x110] sm:$0xff] }
 0x13b   : > { %v6279_v49 = vsub.f32 %v681_v38, %v6271_v14  ;;  %v684_v5 = vmul.f32 %v6174_v52, %v7712_v40  ;;  %v314_v62 = vpop.xlane.xlu0 %313  ;;  %v1053_v38 = vand.u32 4294901760, %v1052_v16  ;;  %3962 = vmatprep.subr.bf16.mxu0 %v7715_v48  ;;  %v7717_v17 = vsub.f32 %v6014_v6, %v5968_v21  ;;  %v434_v4 = vpop.xlane.xlu1 %433 }
 0x13c   : > { %1048 = vmatprep.mubr.f32.mxu1 %v1047_v29  ;;  %4428 = vrsqrt.f32 %v631_v0  ;;  %2549 = vmatprep.mubr.f32.mxu0 %v1061_v11  ;;  %v6308_v29 = vld [vmem:[%s4800_s29 + $0x118] sm:$0xff]  ;;  %v1062_v16 = vsub.f32 %v6274_v56, %v1061_v11  ;;  %v560_v21 = vmax.f32 %v536_v7, 0.0  ;;  %v7720_v0 = vld [vmem:[#allocation124_spill] sm:$0xff]  ;;  %v489_v48 = vmul.f32 0.00390625, %v431_v24 }
 0x13d   : > { %7711 = vst [vmem:[#allocation116_spill] sm:$0xff] %v6279_v49  ;;  %v1067_v45 = vand.u32 4294901760, %v6279_v49  ;;  %v6294_v40 = vand.u32 4294901760, %v684_v5  ;;  %v683_v41 = vmul.f32 %v6174_v52, %v7717_v17  ;;  %1054 = vmatmul.mubr.f32.gmra.mrb[16].mxu1 %v1053_v38  ;;  %v513_v39 = vmul.f32 %v6290_v47, %v6290_v47  ;;  %v7722_v38 = vld [vmem:[#allocation127_spill] sm:$0xff] }
 0x13e   : > { %3768 = vmatpush1.bf16.msra.mxu1 %v7720_v0  ;;  %v1063_v17 = vand.u32 4294901760, %v1062_v16  ;;  %v7721_v11 = vsub.f32 %v6051_v33, %v6002_v59  ;;  %v7725_v0 = vld [vmem:[#allocation129_spill] sm:$0xff] }
 0x13f   : > { %7716 = vst [vmem:[#allocation117_spill] sm:$0xff] %v6294_v40  ;;  %2553 = vmatmul.mubr.f32.gmra.mrb[18].mxu0 %v1067_v45  ;;  %v6314_v6 = vsub.f32 %v684_v5, %v6294_v40  ;;  %v1068_v52 = vsub.f32 %v6279_v49, %v1067_v45  ;;  %v6317_v15 = vand.u32 4294901760, %v683_v41  ;;  %3770 = vmatprep.subr.bf16.mxu1 %v7722_v38  ;;  %v7723_v5 = vld [vmem:[#allocation126_spill] sm:$0xff]  ;;  %v632_v45 = vadd.f32 1e-12, %v560_v21  ;;  %v317_v24 = vpop.xlane.xlu0 %316 }
 0x140   : > { %v686_v7 = vmul.f32 %v6190_v10, %v7721_v11  ;;  %3964 = vmatpush1.bf16.msra.mxu0 %v7723_v5  ;;  %1064 = vmatprep.mubr.f32.mxu1 %v1063_v17  ;;  %v537_v33 = vsub.f32 %v489_v48, %v513_v39  ;;  %v6335_v11 = vmul.f32 0.00390625, %v314_v62  ;;  %v7727_v38 = vsub.f32 %v6045_v20, %v6002_v59  ;;  %v6341_v5 = vpop.eup %4426  ;;  %v6351_v17 = vld [vmem:[%s4800_s29 + $0x128] sm:$0xff]  ;;  %v7731_v20 = vld [vmem:[#allocation130_spill] sm:$0xff] }
 0x141   : > { %7718 = vst [vmem:[#allocation118_spill] sm:$0xff] %v6314_v6  ;;  %7719 = vst [vmem:[#allocation120_spill] sm:$0xff] %v6317_v15  ;;  %v1077_v49 = vand.u32 4294901760, %v6314_v6  ;;  %v1069_v56 = vand.u32 4294901760, %v1068_v52  ;;  %v6330_v16 = vsub.f32 %v683_v41, %v6317_v15  ;;  %3966 = vmatprep.subr.bf16.mxu0 %v7725_v0  ;;  %v6344_v41 = vld [vmem:[%s4800_s29 + $0x120] sm:$0xff]  ;;  %v490_v62 = vmul.f32 0.00390625, %v434_v4 }
 0x142   : > { %v6333_v32 = vand.u32 4294901760, %v686_v7  ;;  %v685_v21 = vmul.f32 %v6190_v10, %v7727_v38  ;;  %4430 = vrsqrt.f32 %v632_v45  ;;  %v561_v59 = vmax.f32 %v537_v33, 0.0  ;;  %v7729_v0 = vld [vmem:[#allocation128_spill] sm:$0xff]  ;;  %v7730_v38 = vld [vmem:[#allocation131_spill] sm:$0xff]  ;;  %v437_v45 = vpop.xlane.xlu1 %436 }
 0x143   : > { %7724 = vst [vmem:[#allocation121_spill] sm:$0xff] %v6330_v16  ;;  %2561 = vmatprep.mubr.f32.mxu0 %v1077_v49  ;;  %1070 = vmatmul.mubr.f32.gmra.mrb[18].mxu1 %v1069_v56  ;;  %v1083_v48 = vand.u32 4294901760, %v6330_v16  ;;  %v1078_v39 = vsub.f32 %v6314_v6, %v1077_v49  ;;  %v514_v4 = vmul.f32 %v6335_v11, %v6335_v11  ;;  %v320_v15 = vpop.xlane.xlu0 %319 }
 0x144   : > { %7726 = vst [vmem:[#allocation119_spill] sm:$0xff] %v6333_v32  ;;  %v6356_v10 = vsub.f32 %v686_v7, %v6333_v32  ;;  %3772 = vmatpush1.bf16.msra.mxu1 %v7729_v0  ;;  %3968 = vmatpush1.bf16.msra.mxu0 %v7730_v38  ;;  %v6361_v49 = vand.u32 4294901760, %v685_v21  ;;  %v633_v7 = vadd.f32 1e-12, %v561_v59  ;;  %v7732_v0 = vsub.f32 %v6089_v8, %v6035_v27  ;;  %v6384_v8 = vld [vmem:[%s4800_s29 + $0x130] sm:$0xff] }
 0x145   : > { %2565 = vmatmul.mubr.f32.gmra.mrb[20].mxu0 %v1083_v48  ;;  %v1079_v56 = vand.u32 4294901760, %v1078_v39  ;;  %v1084_v52 = vsub.f32 %v6330_v16, %v1083_v48  ;;  %3774 = vmatprep.subr.bf16.mxu1 %v7731_v20  ;;  %v6371_v38 = vmul.f32 0.00390625, %v317_v24  ;;  %v7733_v48 = vld [vmem:[#allocation133_spill] sm:$0xff]  ;;  %v538_v32 = vsub.f32 %v490_v62, %v514_v4 }
 0x146   : > { %7728 = vst [vmem:[#allocation122_spill] sm:$0xff] %v6356_v10  ;;  %v1093_v33 = vand.u32 4294901760, %v6356_v10  ;;  %v688_v39 = vmul.f32 %v6253_v54, %v7732_v0  ;;  %3970 = vmatprep.subr.bf16.mxu0 %v7733_v48  ;;  %v6375_v6 = vsub.f32 %v685_v21, %v6361_v49  ;;  %v7735_v20 = vsub.f32 %v6061_v58, %v6035_v27  ;;  %v6381_v40 = vpop.eup %4428  ;;  %v7737_v27 = vld [vmem:[#allocation132_spill] sm:$0xff]  ;;  %v7739_v0 = vld [vmem:[#allocation134_spill] sm:$0xff]  ;;  %v7741_v21 = vld [vmem:[#allocation135_spill] sm:$0xff] }
 0x147   : > { %1080 = vmatprep.mubr.f32.mxu1 %v1079_v56  ;;  %v1085_v16 = vand.u32 4294901760, %v1084_v52  ;;  %v6389_v56 = vld [vmem:[%s4800_s29 + $0x138] sm:$0xff]  ;;  %4432 = vrsqrt.f32 %v633_v7  ;;  %v491_v24 = vmul.f32 0.00390625, %v437_v45 }
 0x148   : > { %7734 = vst [vmem:[#allocation123_spill] sm:$0xff] %v6375_v6  ;;  %v687_v59 = vmul.f32 %v6253_v54, %v7735_v20  ;;  %2573 = vmatprep.mubr.f32.mxu0 %v1093_v33  ;;  %v1094_v52 = vsub.f32 %v6356_v10, %v1093_v33  ;;  %v6394_v62 = vand.u32 4294901760, %v688_v39  ;;  %3776 = vmatpush1.bf16.msra.mxu1 %v7737_v27  ;;  %v1099_v58 = vand.u32 4294901760, %v6375_v6  ;;  %v440_v27 = vpop.xlane.xlu1 %439 }
 0x149   : > { %1086 = vmatmul.mubr.f32.gmra.mrb[20].mxu1 %v1085_v16  ;;  %v562_v54 = vmax.f32 %v538_v32, 0.0  ;;  %3778 = vmatprep.subr.bf16.mxu1 %v7739_v0  ;;  %v515_v33 = vmul.f32 %v6371_v38, %v6371_v38  ;;  %v6416_v10 = vmul.f32 0.00390625, %v320_v15 }
 0x14a   : > { %7736 = vst [vmem:[#allocation125_spill] sm:$0xff] %v6394_v62  ;;  %v6398_v4 = vand.u32 4294901760, %v687_v59  ;;  %v1095_v48 = vand.u32 4294901760, %v1094_v52  ;;  %v6402_v20 = vsub.f32 %v688_v39, %v6394_v62  ;;  %3972 = vmatpush1.bf16.msra.mxu0 %v7741_v21  ;;  %v1100_v7 = vsub.f32 %v6375_v6, %v1099_v58 }
 0x14b   : > { %2577 = vmatmul.mubr.f32.gmra.mrb[22].mxu0 %v1099_v58  ;;  %v634_v16 = vadd.f32 1e-12, %v562_v54  ;;  %v7743_v52 = vsub.f32 %v6132_v50, %v6080_v57  ;;  %v539_v0 = vsub.f32 %v491_v24, %v515_v33  ;;  %v7744_v21 = vsub.f32 %v6099_v18, %v6080_v57  ;;  %v6424_v54 = vld [vmem:[%s4800_s29 + $0x140] sm:$0xff]  ;;  %v323_v24 = vpop.xlane.xlu0 %322  ;;  %v6434_v57 = vld [vmem:[%s4800_s29 + $0x148] sm:$0xff] }
 0x14c   : > { %7738 = vst [vmem:[#allocation124_spill] sm:$0xff] %v6398_v4  ;;  %7740 = vst [vmem:[#allocation127_spill] sm:$0xff] %v6402_v20  ;;  %v6409_v32 = vsub.f32 %v687_v59, %v6398_v4  ;;  %1096 = vmatprep.mubr.f32.mxu1 %v1095_v48  ;;  %v1109_v45 = vand.u32 4294901760, %v6402_v20  ;;  %v7745_v59 = vld [vmem:[#allocation137_spill] sm:$0xff]  ;;  %v6431_v15 = vpop.eup %4430  ;;  %v516_v62 = vmul.f32 %v6416_v10, %v6416_v10 }
 0x14d   : > { %v690_v39 = vmul.f32 %v6263_v51, %v7743_v52  ;;  %v689_v58 = vmul.f32 %v6263_v51, %v7744_v21  ;;  %3780 = vmatpush1.bf16.msra.mxu1 %v7745_v59  ;;  %v1101_v52 = vand.u32 4294901760, %v1100_v7  ;;  %4434 = vrsqrt.f32 %v634_v16 }
 0x14e   : > { %7742 = vst [vmem:[#allocation126_spill] sm:$0xff] %v6409_v32  ;;  %v1115_v48 = vand.u32 4294901760, %v6409_v32  ;;  %2585 = vmatprep.mubr.f32.mxu0 %v1109_v45  ;;  %v563_v51 = vmax.f32 %v539_v0, 0.0  ;;  %v1110_v33 = vsub.f32 %v6402_v20, %v1109_v45  ;;  %v492_v16 = vmul.f32 0.00390625, %v440_v27  ;;  %v443_v27 = vpop.xlane.xlu1 %442 }
 0x14f   : > { %v6429_v6 = vand.u32 4294901760, %v690_v39  ;;  %1102 = vmatmul.mubr.f32.gmra.mrb[22].mxu1 %v1101_v52  ;;  %v6443_v59 = vand.u32 4294901760, %v689_v58  ;;  %v7749_v0 = vsub.f32 %v6177_v63, %v6124_v30 }
 0x150   : > { %2589 = vmatmul.mubr.f32.gmra.mrb[24].mxu0 %v1115_v48  ;;  %v1116_v21 = vsub.f32 %v6409_v32, %v1115_v48  ;;  %v635_v50 = vadd.f32 1e-12, %v563_v51  ;;  %v1111_v4 = vand.u32 4294901760, %v1110_v33  ;;  %v6455_v48 = vmul.f32 0.00390625, %v323_v24  ;;  %v6458_v51 = vld [vmem:[%s4800_s29 + $0x150] sm:$0xff] }
 0x151   : > { %7746 = vst [vmem:[#allocation129_spill] sm:$0xff] %v6429_v6  ;;  %v6440_v7 = vsub.f32 %v690_v39, %v6429_v6  ;;  %7748 = vst [vmem:[#allocation131_spill] sm:$0xff] %v6443_v59  ;;  %v692_v45 = vmul.f32 %v6300_v1, %v7749_v0  ;;  %v6453_v18 = vsub.f32 %v689_v58, %v6443_v59  ;;  %v6468_v20 = vpop.eup %4432  ;;  %v6471_v58 = vld [vmem:[%s4800_s29 + $0x158] sm:$0xff] }
 0x152   : > { %v1117_v39 = vand.u32 4294901760, %v1116_v21  ;;  %1112 = vmatprep.mubr.f32.mxu1 %v1111_v4  ;;  %v540_v32 = vsub.f32 %v492_v16, %v516_v62  ;;  %v7752_v0 = vsub.f32 %v6142_v46, %v6124_v30  ;;  %4436 = vrsqrt.f32 %v635_v50  ;;  %v326_v16 = vpop.xlane.xlu0 %325  ;;  %v446_v59 = vpop.xlane.xlu1 %445 }
 0x153   : > { %7747 = vst [vmem:[#allocation128_spill] sm:$0xff] %v6440_v7  ;;  %v1125_v52 = vand.u32 4294901760, %v6440_v7  ;;  %7750 = vst [vmem:[#allocation130_spill] sm:$0xff] %v6453_v18  ;;  %v6462_v63 = vand.u32 4294901760, %v692_v45  ;;  %v1131_v24 = vand.u32 4294901760, %v6453_v18  ;;  %v493_v46 = vmul.f32 0.00390625, %v443_v27 }
 0x154   : > { %v691_v21 = vmul.f32 %v6300_v1, %v7752_v0  ;;  %1118 = vmatmul.mubr.f32.gmra.mrb[24].mxu1 %v1117_v39  ;;  %v564_v33 = vmax.f32 %v540_v32, 0.0  ;;  %v517_v39 = vmul.f32 %v6455_v48, %v6455_v48  ;;  %v7755_v4 = vsub.f32 %v6223_v22, %v6164_v55 }
 0x155   : > { %7751 = vst [vmem:[#allocation133_spill] sm:$0xff] %v6462_v63  ;;  %2597 = vmatprep.mubr.f32.mxu0 %v1125_v52  ;;  %v1126_v62 = vsub.f32 %v6440_v7, %v1125_v52  ;;  %v6478_v30 = vsub.f32 %v692_v45, %v6462_v63  ;;  %v1132_v0 = vsub.f32 %v6453_v18, %v1131_v24  ;;  %v6493_v27 = vmul.f32 0.00390625, %v326_v16  ;;  %v6509_v16 = vld [vmem:[%s4800_s29 + $0x168] sm:$0xff] }
 0x156   : > { %v6480_v1 = vand.u32 4294901760, %v691_v21  ;;  %2601 = vmatmul.mubr.f32.gmra.mrb[26].mxu0 %v1131_v24  ;;  %v694_v32 = vmul.f32 %v6341_v5, %v7755_v4  ;;  %v636_v52 = vadd.f32 1e-12, %v564_v33  ;;  %v541_v24 = vsub.f32 %v493_v46, %v517_v39  ;;  %v6504_v33 = vld [vmem:[%s4800_s29 + $0x160] sm:$0xff] }
 0x157   : > { %7753 = vst [vmem:[#allocation132_spill] sm:$0xff] %v6478_v30  ;;  %v1127_v50 = vand.u32 4294901760, %v1126_v62  ;;  %v1141_v45 = vand.u32 4294901760, %v6478_v30  ;;  %v1133_v62 = vand.u32 4294901760, %v1132_v0  ;;  %v7757_v63 = vsub.f32 %v6213_v34, %v6164_v55  ;;  %v6501_v4 = vpop.eup %4434 }
 0x158   : > { %7754 = vst [vmem:[#allocation134_spill] sm:$0xff] %v6480_v1  ;;  %v6491_v7 = vsub.f32 %v691_v21, %v6480_v1  ;;  %v6495_v18 = vand.u32 4294901760, %v694_v32  ;;  %4438 = vrsqrt.f32 %v636_v52  ;;  %v565_v34 = vmax.f32 %v541_v24, 0.0 }
 0x159   : > { %1128 = vmatprep.mubr.f32.mxu1 %v1127_v50  ;;  %v693_v22 = vmul.f32 %v6341_v5, %v7757_v63  ;;  %2609 = vmatprep.mubr.f32.mxu0 %v1141_v45  ;;  %v1142_v55 = vsub.f32 %v6478_v30, %v1141_v45  ;;  %v494_v21 = vmul.f32 0.00390625, %v446_v59  ;;  %v518_v46 = vmul.f32 %v6493_v27, %v6493_v27 }
 0x15a   : > { %7756 = vst [vmem:[#allocation135_spill] sm:$0xff] %v6491_v7  ;;  %v1147_v50 = vand.u32 4294901760, %v6491_v7  ;;  %1134 = vmatmul.mubr.f32.gmra.mrb[26].mxu1 %v1133_v62  ;;  %v6516_v5 = vsub.f32 %v694_v32, %v6495_v18  ;;  %v637_v1 = vadd.f32 1e-12, %v565_v34  ;;  %v7760_v32 = vsub.f32 %v6266_v61, %v6205_v3 }
 0x15b   : > { %v6518_v63 = vand.u32 4294901760, %v693_v22  ;;  %v1143_v0 = vand.u32 4294901760, %v1142_v55  ;;  %v542_v24 = vsub.f32 %v494_v21, %v518_v46  ;;  %v7761_v59 = vsub.f32 %v6256_v36, %v6205_v3 }
 0x15c   : > { %7758 = vst [vmem:[#allocation137_spill] sm:$0xff] %v6516_v5  ;;  %2613 = vmatmul.mubr.f32.gmra.mrb[28].mxu0 %v1147_v50  ;;  %v1148_v39 = vsub.f32 %v6491_v7, %v1147_v50  ;;  %v1157_v6 = vand.u32 4294901760, %v6516_v5  ;;  %v696_v45 = vmul.f32 %v6381_v40, %v7760_v32  ;;  %v7762_v55 = vsub.f32 %v6308_v29, %v6246_v19 }
 0x15d   : > { %v6525_v52 = vsub.f32 %v693_v22, %v6518_v63  ;;  %1144 = vmatprep.mubr.f32.mxu1 %v1143_v0  ;;  %v695_v50 = vmul.f32 %v6381_v40, %v7761_v59  ;;  %v4437_v22 = vpop.eup %4436  ;;  %4440 = vrsqrt.f32 %v637_v1  ;;  %v566_v21 = vmax.f32 %v542_v24, 0.0 }
 0x15e   : > { %v1149_v62 = vand.u32 4294901760, %v1148_v39  ;;  %v698_v34 = vmul.f32 %v6431_v15, %v7762_v55  ;;  %2621 = vmatprep.mubr.f32.mxu0 %v1157_v6  ;;  %v1158_v32 = vsub.f32 %v6516_v5, %v1157_v6  ;;  %v6541_v0 = vand.u32 4294901760, %v696_v45 }
 0x15f   : > { %7759 = vst [vmem:[#allocation153_spill] sm:$0xff] %v6525_v52  ;;  %v1163_v61 = vand.u32 4294901760, %v6525_v52  ;;  %v6543_v46 = vand.u32 4294901760, %v695_v50  ;;  %v7763_v36 = vsub.f32 %v6303_v12, %v6246_v19  ;;  %v7765_v39 = vsub.f32 %v6351_v17, %v6290_v47 }
 0x160   : > { %1150 = vmatmul.mubr.f32.gmra.mrb[28].mxu1 %v1149_v62  ;;  %v6545_v3 = vand.u32 4294901760, %v698_v34  ;;  %v1159_v29 = vand.u32 4294901760, %v1158_v32  ;;  %v6552_v1 = vsub.f32 %v696_v45, %v6541_v0  ;;  %v638_v24 = vadd.f32 1e-12, %v566_v21 }
 0x161   : > { %v697_v40 = vmul.f32 %v6431_v15, %v7763_v36  ;;  %2625 = vmatmul.mubr.f32.gmra.mrb[30].mxu0 %v1163_v61  ;;  %v1164_v6 = vsub.f32 %v6525_v52, %v1163_v61  ;;  %v700_v62 = vmul.f32 %v6468_v20, %v7765_v39  ;;  %v6560_v59 = vsub.f32 %v695_v50, %v6543_v46 }
 0x162   : > { %7764 = vst [vmem:[#allocation154_spill] sm:$0xff] %v6552_v1  ;;  %v6563_v19 = vsub.f32 %v698_v34, %v6545_v3  ;;  %1160 = vmatprep.mubr.f32.mxu1 %v1159_v29  ;;  %v1173_v15 = vand.u32 4294901760, %v6552_v1  ;;  %v7768_v17 = vsub.f32 %v6344_v41, %v6290_v47  ;;  %4442 = vrsqrt.f32 %v638_v24  ;;  %v4439_v21 = vpop.eup %4438 }
 0x163   : > { %7766 = vst [vmem:[#allocation155_spill] sm:$0xff] %v6560_v59  ;;  %v6565_v12 = vand.u32 4294901760, %v697_v40  ;;  %v1165_v45 = vand.u32 4294901760, %v1164_v6  ;;  %v6568_v55 = vand.u32 4294901760, %v700_v62  ;;  %v1179_v50 = vand.u32 4294901760, %v6560_v59 }
 0x164   : > { %7767 = vst [vmem:[#allocation156_spill] sm:$0xff] %v6563_v19  ;;  %v699_v61 = vmul.f32 %v6468_v20, %v7768_v17  ;;  %v1189_v32 = vand.u32 4294901760, %v6563_v19  ;;  %2633 = vmatprep.mubr.f32.mxu0 %v1173_v15  ;;  %v1174_v36 = vsub.f32 %v6552_v1, %v1173_v15  ;;  %v7771_v47 = vsub.f32 %v6389_v56, %v6335_v11 }
 0x165   : > { %v6577_v34 = vsub.f32 %v697_v40, %v6565_v12  ;;  %1166 = vmatmul.mubr.f32.gmra.mrb[30].mxu1 %v1165_v45  ;;  %v6581_v29 = vsub.f32 %v700_v62, %v6568_v55  ;;  %2637 = vmatmul.mubr.f32.gmra.mrb[32].mxu0 %v1179_v50  ;;  %v1180_v20 = vsub.f32 %v6560_v59, %v1179_v50 }
 0x166   : > { %v6583_v6 = vand.u32 4294901760, %v699_v61  ;;  %v702_v41 = vmul.f32 %v6501_v4, %v7771_v47  ;;  %v1190_v39 = vsub.f32 %v6563_v19, %v1189_v32  ;;  %v7772_v24 = vsub.f32 %v6384_v8, %v6335_v11  ;;  %2645 = vmatprep.mubr.f32.mxu0 %v1189_v32 }
 0x167   : > { %7769 = vst [vmem:[#allocation157_spill] sm:$0xff] %v6577_v34  ;;  %7770 = vst [vmem:[#allocation158_spill] sm:$0xff] %v6581_v29  ;;  %v1195_v40 = vand.u32 4294901760, %v6577_v34  ;;  %v1175_v15 = vand.u32 4294901760, %v1174_v36  ;;  %v1205_v45 = vand.u32 4294901760, %v6581_v29  ;;  %v1181_v47 = vand.u32 4294901760, %v1180_v20  ;;  %v4441_v19 = vpop.eup %4440 }
 0x168   : > { %v701_v62 = vmul.f32 %v6501_v4, %v7772_v24  ;;  %v6598_v56 = vsub.f32 %v699_v61, %v6583_v6  ;;  %v6600_v17 = vand.u32 4294901760, %v702_v41  ;;  %v1191_v50 = vand.u32 4294901760, %v1190_v39 }
 0x169   : > { %v1196_v59 = vsub.f32 %v6577_v34, %v1195_v40  ;;  %1176 = vmatprep.mubr.f32.mxu1 %v1175_v15  ;;  %v1206_v8 = vsub.f32 %v6581_v29, %v1205_v45  ;;  %v7775_v61 = vsub.f32 %v6434_v57, %v6371_v38  ;;  %2649 = vmatmul.mubr.f32.gmra.mrb[34].mxu0 %v1195_v40 }
 0x16a   : > { %7773 = vst [vmem:[#allocation159_spill] sm:$0xff] %v6598_v56  ;;  %v6603_v1 = vand.u32 4294901760, %v701_v62  ;;  %v1211_v11 = vand.u32 4294901760, %v6598_v56  ;;  %v6608_v4 = vsub.f32 %v702_v41, %v6600_v17  ;;  %1182 = vmatmul.mubr.f32.gmra.mrb[32].mxu1 %v1181_v47  ;;  %v7777_v39 = vsub.f32 %v6424_v54, %v6371_v38  ;;  %2657 = vmatprep.mubr.f32.mxu0 %v1205_v45 }
 0x16b   : > { %v704_v32 = vmul.f32 %v4437_v22, %v7775_v61  ;;  %v1197_v36 = vand.u32 4294901760, %v1196_v59  ;;  %v7778_v15 = vsub.f32 %v6471_v58, %v6416_v10  ;;  %1192 = vmatprep.mubr.f32.mxu1 %v1191_v50  ;;  %v1207_v29 = vand.u32 4294901760, %v1206_v8  ;;  %v4490_v58 = vld [vmem:[%s4800_s29 + $0x178] sm:$0xff] }
 0x16c   : > { %7774 = vst [vmem:[#allocation160_spill] sm:$0xff] %v6608_v4  ;;  %v6614_v20 = vsub.f32 %v701_v62, %v6603_v1  ;;  %v703_v24 = vmul.f32 %v4437_v22, %v7777_v39  ;;  %v1221_v57 = vand.u32 4294901760, %v6608_v4  ;;  %v1212_v47 = vsub.f32 %v6598_v56, %v1211_v11 }
 0x16d   : > { %v706_v41 = vmul.f32 %v4439_v21, %v7778_v15  ;;  %v6624_v40 = vand.u32 4294901760, %v704_v32  ;;  %v7781_v38 = vsub.f32 %v6458_v51, %v6416_v10  ;;  %v614_v22 = vsub.f32 %v4490_v58, %v6493_v27  ;;  %v4443_v15 = vpop.eup %4442  ;;  %2661 = vmatmul.mubr.f32.gmra.mrb[36].mxu0 %v1211_v11 }
 0x16e   : > { %7776 = vst [vmem:[#allocation161_spill] sm:$0xff] %v6614_v20  ;;  %v1227_v59 = vand.u32 4294901760, %v6614_v20  ;;  %v6627_v62 = vand.u32 4294901760, %v703_v24  ;;  %v1222_v45 = vsub.f32 %v6608_v4, %v1221_v57  ;;  %v7783_v8 = vsub.f32 %v6509_v16, %v6455_v48  ;;  %1198 = vmatmul.mubr.f32.gmra.mrb[34].mxu1 %v1197_v36  ;;  %2669 = vmatprep.mubr.f32.mxu0 %v1221_v57  ;;  %v7788_v16 = vld [vmem:[#allocation140_spill] sm:$0xff] }
 0x16f   : > { %v6629_v61 = vand.u32 4294901760, %v706_v41  ;;  %v705_v54 = vmul.f32 %v4439_v21, %v7781_v38  ;;  %v6638_v50 = vsub.f32 %v704_v32, %v6624_v40  ;;  %v1213_v56 = vand.u32 4294901760, %v1212_v47  ;;  %1208 = vmatprep.mubr.f32.mxu1 %v1207_v29  ;;  %v7791_v57 = vld [vmem:[#allocation136_spill] sm:$0xff] }
 0x170   : > { %7779 = vst [vmem:[#allocation162_spill] sm:$0xff] %v6627_v62  ;;  %v708_v39 = vmul.f32 %v4441_v19, %v7783_v8  ;;  %v6644_v34 = vsub.f32 %v703_v24, %v6627_v62  ;;  %v1223_v21 = vand.u32 4294901760, %v1222_v45  ;;  %v1652_v58 = vand.u32 4294901760, %v7788_v16  ;;  %v7793_v4 = vld [vmem:[#allocation88_spill] sm:$0xff] }
 0x171   : > { %7780 = vst [vmem:[#allocation163_spill] sm:$0xff] %v6629_v61  ;;  %7782 = vst [vmem:[#allocation164_spill] sm:$0xff] %v6638_v50  ;;  %v6647_v10 = vsub.f32 %v706_v41, %v6629_v61  ;;  %v6649_v51 = vand.u32 4294901760, %v705_v54  ;;  %v1237_v32 = vand.u32 4294901760, %v6638_v50  ;;  %v1228_v11 = vsub.f32 %v6614_v20, %v1227_v59  ;;  %2673 = vmatmul.mubr.f32.gmra.mrb[38].mxu0 %v1227_v59 }
 0x172   : > { %7784 = vst [vmem:[#allocation165_spill] sm:$0xff] %v6644_v34  ;;  %v6652_v38 = vand.u32 4294901760, %v708_v39  ;;  %v1243_v36 = vand.u32 4294901760, %v6644_v34  ;;  %v7792_v45 = vand.u32 4294901760, %v7791_v57  ;;  %v7794_v16 = vand.u32 4294901760, %v7793_v4  ;;  %1214 = vmatmul.mubr.f32.gmra.mrb[36].mxu1 %v1213_v56 }
 0x173   : > { %7785 = vst [vmem:[#allocation166_spill] sm:$0xff] %v6647_v10  ;;  %7786 = vst [vmem:[#allocation167_spill] sm:$0xff] %v6649_v51  ;;  %v1253_v24 = vand.u32 4294901760, %v6647_v10  ;;  %v6659_v41 = vsub.f32 %v705_v54, %v6649_v51  ;;  %v1238_v47 = vsub.f32 %v6638_v50, %v1237_v32  ;;  %v7795_v50 = vld [vmem:[#allocation89_spill] sm:$0xff]  ;;  %1224 = vmatprep.mubr.f32.mxu1 %v1223_v21  ;;  %2681 = vmatprep.mubr.f32.mxu0 %v1237_v32 }
 0x174   : > { %7787 = vst [vmem:[#allocation168_spill] sm:$0xff] %v6652_v38  ;;  %v6663_v29 = vsub.f32 %v708_v39, %v6652_v38  ;;  %v3781_v8 = vpack.c.bf16 %v1652_v58, %v7792_v45  ;;  %v1645_v20 = vsub.f32 %v7793_v4, %v7794_v16  ;;  %v1244_v52 = vsub.f32 %v6644_v34, %v1243_v36  ;;  %v4491_v16 = vld [vmem:[%s4800_s29 + $0x170] sm:$0xff] }
 0x175   : > { %7789 = vst [vmem:[#allocation140_spill] sm:$0xff] %v6659_v41  ;;  %v1259_v54 = vand.u32 4294901760, %v6659_v41  ;;  %v1254_v5 = vsub.f32 %v6647_v10, %v1253_v24  ;;  %v7796_v7 = vand.u32 4294901760, %v7795_v50  ;;  %v1239_v57 = vand.u32 4294901760, %v1238_v47  ;;  %v7798_v21 = vld [vmem:[#allocation85_spill] sm:$0xff]  ;;  %v7800_v47 = vld [vmem:[#allocation86_spill] sm:$0xff]  ;;  %2685 = vmatmul.mubr.f32.gmra.mrb[40].mxu0 %v1243_v36 }
 0x176   : > { %7790 = vst [vmem:[#allocation169_spill] sm:$0xff] %v6663_v29  ;;  %v1269_v58 = vand.u32 4294901760, %v6663_v29  ;;  %v1646_v45 = vand.u32 4294901760, %v1645_v20  ;;  %v7797_v56 = vsub.f32 %v6504_v33, %v6455_v48  ;;  %v613_v34 = vsub.f32 %v4491_v16, %v6493_v27  ;;  %3782 = vmatprep.subr.bf16.mxu1 %v3781_v8  ;;  %2693 = vmatprep.mubr.f32.mxu0 %v1253_v24  ;;  %v7809_v24 = vld [vmem:[#allocation94_spill] sm:$0xff] }
 0x177   : > { %v1657_v39 = vsub.f32 %v7795_v50, %v7796_v7  ;;  %v1229_v30 = vand.u32 4294901760, %v1228_v11  ;;  %v1245_v38 = vand.u32 4294901760, %v1244_v52  ;;  %v1260_v51 = vsub.f32 %v6659_v41, %v1259_v54 }
 0x178   : > { %v707_v59 = vmul.f32 %v4441_v19, %v7797_v56  ;;  %v7799_v32 = vand.u32 4294901760, %v7798_v21  ;;  %v7801_v61 = vand.u32 4294901760, %v7800_v47  ;;  %v710_v62 = vmul.f32 %v4443_v15, %v614_v22  ;;  %v7806_v22 = vld [vmem:[#allocation90_spill] sm:$0xff] }
 0x179   : > { %v1658_v10 = vand.u32 4294901760, %v1657_v39  ;;  %1230 = vmatmul.mubr.f32.gmra.mrb[38].mxu1 %v1229_v30  ;;  %v1255_v48 = vand.u32 4294901760, %v1254_v5  ;;  %v7802_v27 = vand.u32 4294901760, %v7793_v4  ;;  %v7803_v52 = vand.u32 4294901760, %v7795_v50  ;;  %2697 = vmatmul.mubr.f32.gmra.mrb[42].mxu0 %v1259_v54 }
 0x17a   : > { %v6683_v7 = vand.u32 4294901760, %v707_v59  ;;  %v3973_v20 = vpack.c.bf16 %v7801_v61, %v7799_v32  ;;  %v709_v11 = vmul.f32 %v4443_v15, %v613_v34  ;;  %1240 = vmatprep.mubr.f32.mxu1 %v1239_v57  ;;  %v1270_v39 = vsub.f32 %v6663_v29, %v1269_v58  ;;  %v7805_v61 = vld [vmem:[#allocation91_spill] sm:$0xff]  ;;  %v7808_v34 = vld [vmem:[#allocation93_spill] sm:$0xff]  ;;  %2705 = vmatprep.mubr.f32.mxu0 %v1269_v58 }
 0x17b   : > { %v3783_v33 = vpack.c.bf16 %v1658_v10, %v1646_v45  ;;  %v3975_v19 = vpack.c.bf16 %v7803_v52, %v7802_v27  ;;  %v6697_v56 = vand.u32 4294901760, %v710_v62  ;;  %v1674_v30 = vand.u32 4294901760, %v7805_v61 }
 0x17c   : > { %v6694_v8 = vsub.f32 %v707_v59, %v6683_v7  ;;  %3974 = vmatprep.subr.bf16.mxu0 %v3973_v20  ;;  %v6700_v5 = vand.u32 4294901760, %v709_v11  ;;  %v7807_v10 = vand.u32 4294901760, %v7806_v22  ;;  %v1668_v15 = vand.u32 4294901760, %v7808_v34 }
 0x17d   : > { %3784 = vmatpush1.bf16.msra.mxu1 %v3783_v33  ;;  %v1680_v57 = vand.u32 4294901760, %v7809_v24  ;;  %v6709_v59 = vsub.f32 %v710_v62, %v6697_v56  ;;  %3976 = vmatpush1.bf16.msra.mxu0 %v3975_v19  ;;  %v1675_v20 = vsub.f32 %v7805_v61, %v1674_v30  ;;  %v1271_v29 = vand.u32 4294901760, %v1270_v39 }
 0x17e   : > { %7804 = vst [vmem:[#allocation136_spill] sm:$0xff] %v6694_v8  ;;  %v1663_v36 = vsub.f32 %v7806_v22, %v7807_v10  ;;  %v1275_v45 = vand.u32 4294901760, %v6694_v8  ;;  %v7810_v16 = vmov %v7807_v10  ;;  %1246 = vmatmul.mubr.f32.gmra.mrb[40].mxu1 %v1245_v38  ;;  %v6715_v33 = vsub.f32 %v709_v11, %v6700_v5 }
 0x17f   : > { %v3977_v32 = vpack.c.bf16 %v1674_v30, %v7810_v16  ;;  %v3979_v52 = vpack.c.bf16 %v1680_v57, %v1668_v15  ;;  %v1669_v10 = vsub.f32 %v7808_v34, %v1668_v15  ;;  %1256 = vmatprep.mubr.f32.mxu1 %v1255_v48  ;;  %v1285_v62 = vand.u32 4294901760, %v6709_v59 }
 0x180   : > { %v1664_v27 = vand.u32 4294901760, %v1663_v36  ;;  %v1676_v19 = vand.u32 4294901760, %v1675_v20  ;;  %v1681_v41 = vsub.f32 %v7809_v24, %v1680_v57  ;;  %v1261_v16 = vand.u32 4294901760, %v1260_v51  ;;  %2709 = vmatmul.mubr.f32.gmra.mrb[44].mxu0 %v1275_v45  ;;  %v7811_v57 = vld [vmem:[#allocation98_spill] sm:$0xff]  ;;  %v7812_v20 = vld [vmem:[#allocation99_spill] sm:$0xff] }
 0x181   : > { %v1276_v30 = vsub.f32 %v6694_v8, %v1275_v45  ;;  %v1291_v38 = vand.u32 4294901760, %v6715_v33  ;;  %3978 = vmatprep.subr.bf16.mxu0 %v3977_v32  ;;  %v1670_v54 = vand.u32 4294901760, %v1669_v10  ;;  %v1286_v11 = vsub.f32 %v6709_v59, %v1285_v62  ;;  %2717 = vmatprep.mubr.f32.mxu0 %v1285_v62  ;;  %v7813_v32 = vld [vmem:[#allocation11_spill] sm:$0xff]  ;;  %v7818_v10 = vld [vmem:[#allocation14_spill] sm:$0xff] }
 0x182   : > { %v3785_v36 = vpack.c.bf16 %v1676_v19, %v1664_v27  ;;  %3980 = vmatpush1.bf16.msra.mxu0 %v3979_v52  ;;  %v1682_v15 = vand.u32 4294901760, %v1681_v41  ;;  %1262 = vmatmul.mubr.f32.gmra.mrb[42].mxu1 %v1261_v16  ;;  %v3789_v8 = vpack.c.bf16 %v7812_v20, %v7811_v57  ;;  %v7814_v41 = vld [vmem:[#allocation138_spill] sm:$0xff]  ;;  %v7816_v27 = vld [vmem:[#allocation143_spill] sm:$0xff]  ;;  %v7817_v52 = vld [vmem:[#allocation13_spill] sm:$0xff] }
 0x183   : > { %1272 = vmatprep.mubr.f32.mxu1 %v1271_v29  ;;  %v1287_v58 = vand.u32 4294901760, %v1286_v11  ;;  %v1277_v39 = vand.u32 4294901760, %v1276_v30  ;;  %v1292_v51 = vsub.f32 %v6715_v33, %v1291_v38  ;;  %3982 = vmatprep.subr.bf16.mxu0 %v7813_v32  ;;  %v7815_v29 = vld [vmem:[#allocation139_spill] sm:$0xff]  ;;  %v3791_v62 = vpack.c.bf16 %v7818_v10, %v7817_v52  ;;  %v7819_v16 = vld [vmem:[#allocation12_spill] sm:$0xff]  ;;  %v7830_v32 = vld [vmem:[#allocation26_spill] sm:$0xff] }
 0x184   : > { %v3787_v48 = vpack.c.bf16 %v1682_v15, %v1670_v54  ;;  %3786 = vmatprep.subr.bf16.mxu1 %v3785_v36  ;;  %2721 = vmatmul.mubr.f32.gmra.mrb[46].mxu0 %v1291_v38  ;;  %v7820_v30 = vld [vmem:[#allocation15_spill] sm:$0xff]  ;;  %v7821_v38 = vld [vmem:[#allocation17_spill] sm:$0xff]  ;;  %v7822_v11 = vld [vmem:[#allocation16_spill] sm:$0xff] }
 0x185   : > { %2984 = vmatprep.mubr.f32.mxu0 %v7814_v41  ;;  %v1293_v45 = vand.u32 4294901760, %v1292_v51  ;;  %v3793_v54 = vpack.c.bf16 %v7821_v38, %v7820_v30  ;;  %v7824_v36 = vld [vmem:[#allocation19_spill] sm:$0xff]  ;;  %v7825_v15 = vld [vmem:[#allocation20_spill] sm:$0xff]  ;;  %v7831_v52 = vld [vmem:[#allocation22_spill] sm:$0xff] }
 0x186   : > { %3788 = vmatpush1.bf16.msra.mxu1 %v3787_v48  ;;  %v7826_v48 = vld [vmem:[#allocation18_spill] sm:$0xff]  ;;  %v7828_v51 = vld [vmem:[#allocation23_spill] sm:$0xff]  ;;  %v7829_v20 = vld [vmem:[#allocation24_spill] sm:$0xff] }
 0x187   : > { %1278 = vmatmul.mubr.f32.gmra.mrb[44].mxu1 %v1277_v39  ;;  %3790 = vmatprep.subr.bf16.mxu1 %v3789_v8  ;;  %v7823_v8 = vld [vmem:[#allocation144_spill] sm:$0xff]  ;;  %v7827_v39 = vld [vmem:[#allocation21_spill] sm:$0xff]  ;;  %v7835_v38 = vld [vmem:[#allocation30_spill] sm:$0xff] }
 0x188   : > { %1288 = vmatprep.mubr.f32.mxu1 %v1287_v58  ;;  %2986 = vmatmul.mubr.f32.vlgmr.msra.gmra.mrb[0].mxu0 %v7815_v29  ;;  %v3795_v58 = vpack.c.bf16 %v7825_v15, %v7824_v36  ;;  %v3797_v57 = vpack.c.bf16 %v7828_v51, %v7827_v39  ;;  %v7832_v10 = vld [vmem:[#allocation25_spill] sm:$0xff]  ;;  %v7837_v36 = vld [vmem:[#allocation27_spill] sm:$0xff]  ;;  %v7841_v51 = vld [vmem:[#allocation34_spill] sm:$0xff] }
 0x189   : > { %2992 = vmatprep.mubr.f32.mxu0 %v7816_v27  ;;  %3984 = vmatpush1.bf16.msra.mxu0 %v7819_v16  ;;  %v7834_v16 = vld [vmem:[#allocation29_spill] sm:$0xff]  ;;  %v7838_v15 = vld [vmem:[#allocation35_spill] sm:$0xff] }
 0x18a   : > { %3986 = vmatprep.subr.bf16.mxu0 %v7822_v11  ;;  %v7904_v19 = vld [vmem:[#allocation83_spill] sm:$0xff] }
 0x18b   : > { %1294 = vmatmul.mubr.f32.gmra.mrb[46].mxu1 %v1293_v45  ;;  %v3799_v45 = vpack.c.bf16 %v7830_v32, %v7829_v20  ;;  %v7843_v32 = vld [vmem:[#allocation37_spill] sm:$0xff] }
 0x18c   : > { %1685 = vmatprep.mubr.f32.mxu1 %v7814_v41  ;;  %2994 = vmatmul.mubr.f32.gmra.mrb[2].mxu0 %v7823_v8 }
 0x18d   : > { %3000 = vmatprep.mubr.f32.mxu0 %v5916_v42  ;;  %3988 = vmatpush1.bf16.msra.mxu0 %v7826_v48  ;;  %v7840_v48 = vld [vmem:[#allocation33_spill] sm:$0xff] }
 0x18e   : > { %3990 = vmatprep.subr.bf16.mxu0 %v7831_v52  ;;  %v7845_v52 = vld [vmem:[#allocation38_spill] sm:$0xff] }
 0x18f   : > { %1687 = vmatmul.mubr.f32.vlgmr.msra.gmra.mrb[0].mxu1 %v7815_v29 }
 0x190   : > { %3792 = vmatpush1.bf16.msra.mxu1 %v3791_v62  ;;  %1693 = vmatprep.mubr.f32.mxu1 %v7816_v27  ;;  %v7833_v62 = vld [vmem:[#allocation28_spill] sm:$0xff] }
 0x191   : > { %3794 = vmatprep.subr.bf16.mxu1 %v3793_v54  ;;  %3002 = vmatmul.mubr.f32.gmra.mrb[4].mxu0 %v5970_v9  ;;  %v3801_v30 = vpack.c.bf16 %v7834_v16, %v7833_v62  ;;  %v7836_v54 = vld [vmem:[#allocation31_spill] sm:$0xff]  ;;  %v7847_v16 = vld [vmem:[#allocation41_spill] sm:$0xff] }
 0x192   : > { %3008 = vmatprep.mubr.f32.mxu0 %v5973_v44  ;;  %3992 = vmatpush1.bf16.msra.mxu0 %v7832_v10  ;;  %v3803_v11 = vpack.c.bf16 %v7836_v54, %v7835_v38  ;;  %v7846_v10 = vld [vmem:[#allocation39_spill] sm:$0xff]  ;;  %v7849_v54 = vld [vmem:[#allocation46_spill] sm:$0xff] }
 0x193   : > { %1695 = vmatmul.mubr.f32.gmra.mrb[2].mxu1 %v7823_v8  ;;  %3994 = vmatprep.subr.bf16.mxu0 %v7837_v36  ;;  %v3809_v62 = vpack.c.bf16 %v7846_v10, %v7845_v52  ;;  %v7851_v36 = vld [vmem:[#allocation43_spill] sm:$0xff]  ;;  %v7859_v10 = vld [vmem:[#allocation52_spill] sm:$0xff] }
 0x194   : > { %1701 = vmatprep.mubr.f32.mxu1 %v5916_v42  ;;  %3796 = vmatpush1.bf16.msra.mxu1 %v3795_v58  ;;  %v7839_v58 = vld [vmem:[#allocation32_spill] sm:$0xff] }
 0x195   : > { %3798 = vmatprep.subr.bf16.mxu1 %v3797_v57  ;;  %3010 = vmatmul.mubr.f32.gmra.mrb[6].mxu0 %v6004_v35  ;;  %v3805_v39 = vpack.c.bf16 %v7840_v48, %v7839_v58  ;;  %v7842_v57 = vld [vmem:[#allocation36_spill] sm:$0xff]  ;;  %v7853_v48 = vld [vmem:[#allocation45_spill] sm:$0xff] }
 0x196   : > { %3016 = vmatprep.mubr.f32.mxu0 %v6033_v43  ;;  %3996 = vmatpush1.bf16.msra.mxu0 %v7838_v15  ;;  %v3807_v20 = vpack.c.bf16 %v7842_v57, %v7841_v51  ;;  %v7852_v15 = vld [vmem:[#allocation44_spill] sm:$0xff]  ;;  %v7855_v57 = vld [vmem:[#allocation51_spill] sm:$0xff] }
 0x197   : > { %1703 = vmatmul.mubr.f32.gmra.mrb[4].mxu1 %v5970_v9  ;;  %3998 = vmatprep.subr.bf16.mxu0 %v7843_v32  ;;  %v3813_v58 = vpack.c.bf16 %v7852_v15, %v7851_v36  ;;  %v7857_v32 = vld [vmem:[#allocation49_spill] sm:$0xff]  ;;  %v7865_v15 = vld [vmem:[#allocation56_spill] sm:$0xff] }
 0x198   : > { %1709 = vmatprep.mubr.f32.mxu1 %v5973_v44  ;;  %3800 = vmatpush1.bf16.msra.mxu1 %v3799_v45  ;;  %v7844_v45 = vld [vmem:[#allocation40_spill] sm:$0xff] }
 0x199   : > { %3802 = vmatprep.subr.bf16.mxu1 %v3801_v30  ;;  %3018 = vmatmul.mubr.f32.gmra.mrb[8].mxu0 %v6065_v37  ;;  %v7848_v30 = vld [vmem:[#allocation42_spill] sm:$0xff] }
 0x19a   : > { %3024 = vmatprep.mubr.f32.mxu0 %v6094_v31  ;;  %4000 = vmatpush1.bf16.msra.mxu0 %v7844_v45  ;;  %v3811_v38 = vpack.c.bf16 %v7848_v30, %v7847_v16  ;;  %v7858_v45 = vld [vmem:[#allocation50_spill] sm:$0xff]  ;;  %v7861_v30 = vld [vmem:[#allocation60_spill] sm:$0xff] }
 0x19b   : > { %1711 = vmatmul.mubr.f32.gmra.mrb[6].mxu1 %v6004_v35  ;;  %4002 = vmatprep.subr.bf16.mxu0 %v7849_v54  ;;  %v3817_v52 = vpack.c.bf16 %v7858_v45, %v7857_v32  ;;  %v7863_v54 = vld [vmem:[#allocation54_spill] sm:$0xff]  ;;  %v7871_v45 = vld [vmem:[#allocation117_spill] sm:$0xff] }
 0x19c   : > { %1717 = vmatprep.mubr.f32.mxu1 %v6033_v43  ;;  %3804 = vmatpush1.bf16.msra.mxu1 %v3803_v11  ;;  %v7850_v11 = vld [vmem:[#allocation48_spill] sm:$0xff] }
 0x19d   : > { %3806 = vmatprep.subr.bf16.mxu1 %v3805_v39  ;;  %3026 = vmatmul.mubr.f32.gmra.mrb[10].mxu0 %v6109_v23  ;;  %v7854_v39 = vld [vmem:[#allocation47_spill] sm:$0xff] }
 0x19e   : > { %3032 = vmatprep.mubr.f32.mxu0 %v6136_v60  ;;  %4004 = vmatpush1.bf16.msra.mxu0 %v7850_v11  ;;  %v3815_v51 = vpack.c.bf16 %v7854_v39, %v7853_v48  ;;  %v7864_v11 = vld [vmem:[#allocation55_spill] sm:$0xff]  ;;  %v7867_v39 = vld [vmem:[#allocation70_spill] sm:$0xff] }
 0x19f   : > { %1719 = vmatmul.mubr.f32.gmra.mrb[8].mxu1 %v6065_v37  ;;  %4006 = vmatprep.subr.bf16.mxu0 %v7855_v57  ;;  %v3821_v36 = vpack.c.bf16 %v7864_v11, %v7863_v54  ;;  %v7869_v57 = vld [vmem:[#allocation58_spill] sm:$0xff]  ;;  %v7877_v54 = vld [vmem:[#allocation65_spill] sm:$0xff] }
 0x1a0   : > { %1725 = vmatprep.mubr.f32.mxu1 %v6094_v31  ;;  %3808 = vmatpush1.bf16.msra.mxu1 %v3807_v20  ;;  %v7856_v20 = vld [vmem:[#allocation59_spill] sm:$0xff] }
 0x1a1   : > { %3810 = vmatprep.subr.bf16.mxu1 %v3809_v62  ;;  %3034 = vmatmul.mubr.f32.gmra.mrb[12].mxu0 %v6150_v53  ;;  %v7860_v62 = vld [vmem:[#allocation53_spill] sm:$0xff] }
 0x1a2   : > { %3040 = vmatprep.mubr.f32.mxu0 %v6167_v28  ;;  %4008 = vmatpush1.bf16.msra.mxu0 %v7856_v20  ;;  %v3819_v16 = vpack.c.bf16 %v7860_v62, %v7859_v10  ;;  %v7870_v20 = vld [vmem:[#allocation61_spill] sm:$0xff]  ;;  %v7873_v10 = vld [vmem:[#allocation63_spill] sm:$0xff] }
 0x1a3   : > { %1727 = vmatmul.mubr.f32.gmra.mrb[10].mxu1 %v6109_v23  ;;  %4010 = vmatprep.subr.bf16.mxu0 %v7861_v30  ;;  %v3825_v32 = vpack.c.bf16 %v7870_v20, %v7869_v57  ;;  %v7875_v30 = vld [vmem:[#allocation84_spill] sm:$0xff]  ;;  %v7884_v20 = vld [vmem:[#allocation69_spill] sm:$0xff] }
 0x1a4   : > { %1733 = vmatprep.mubr.f32.mxu1 %v6136_v60  ;;  %3812 = vmatpush1.bf16.msra.mxu1 %v3811_v38  ;;  %v7862_v38 = vld [vmem:[#allocation67_spill] sm:$0xff]  ;;  %v7883_v57 = vld [vmem:[#allocation92_spill] sm:$0xff] }
 0x1a5   : > { %3814 = vmatprep.subr.bf16.mxu1 %v3813_v58  ;;  %3042 = vmatmul.mubr.f32.gmra.mrb[14].mxu0 %v6187_v26  ;;  %v7866_v58 = vld [vmem:[#allocation57_spill] sm:$0xff] }
 0x1a6   : > { %3048 = vmatprep.mubr.f32.mxu0 %v6219_v13  ;;  %4012 = vmatpush1.bf16.msra.mxu0 %v7862_v38  ;;  %v3823_v48 = vpack.c.bf16 %v7866_v58, %v7865_v15  ;;  %v7876_v38 = vld [vmem:[#allocation64_spill] sm:$0xff]  ;;  %v7879_v15 = vld [vmem:[#allocation119_spill] sm:$0xff]  ;;  %v7880_v58 = vld [vmem:[#allocation66_spill] sm:$0xff] }
 0x1a7   : > { %1735 = vmatmul.mubr.f32.gmra.mrb[12].mxu1 %v6150_v53  ;;  %4014 = vmatprep.subr.bf16.mxu0 %v7867_v39  ;;  %v3829_v11 = vpack.c.bf16 %v7877_v54, %v7876_v38  ;;  %v7889_v38 = vld [vmem:[#allocation95_spill] sm:$0xff]  ;;  %v7890_v54 = vld [vmem:[#allocation96_spill] sm:$0xff] }
 0x1a8   : > { %1741 = vmatprep.mubr.f32.mxu1 %v6167_v28  ;;  %3816 = vmatpush1.bf16.msra.mxu1 %v3815_v51  ;;  %v7868_v51 = vld [vmem:[#allocation74_spill] sm:$0xff] }
 0x1a9   : > { %3818 = vmatprep.subr.bf16.mxu1 %v3817_v52  ;;  %3050 = vmatmul.mubr.f32.gmra.mrb[16].mxu0 %v6227_v2  ;;  %v7872_v52 = vld [vmem:[#allocation62_spill] sm:$0xff] }
 0x1aa   : > { %3056 = vmatprep.mubr.f32.mxu0 %v6261_v25  ;;  %4016 = vmatpush1.bf16.msra.mxu0 %v7868_v51  ;;  %v3827_v62 = vpack.c.bf16 %v7873_v10, %v7872_v52  ;;  %v7882_v51 = vld [vmem:[#allocation87_spill] sm:$0xff]  ;;  %v7886_v10 = vld [vmem:[#allocation125_spill] sm:$0xff] }
 0x1ab   : > { %1743 = vmatmul.mubr.f32.gmra.mrb[14].mxu1 %v6187_v26 }
 0x1ac   : > { %1749 = vmatprep.mubr.f32.mxu1 %v6219_v13  ;;  %3820 = vmatpush1.bf16.msra.mxu1 %v3819_v16  ;;  %v7874_v16 = vld [vmem:[#allocation78_spill] sm:$0xff] }
 0x1ad   : > { %3822 = vmatprep.subr.bf16.mxu1 %v3821_v36  ;;  %3058 = vmatmul.mubr.f32.gmra.mrb[18].mxu0 %v6271_v14  ;;  %v7878_v36 = vld [vmem:[#allocation120_spill] sm:$0xff] }
 0x1ae   : > { %3064 = vmatprep.mubr.f32.mxu0 %v7871_v45  ;;  %4018 = vmatprep.subr.bf16.mxu0 %v7874_v16  ;;  %v7888_v16 = vld [vmem:[#allocation73_spill] sm:$0xff] }
 0x1af   : > { %1751 = vmatmul.mubr.f32.gmra.mrb[16].mxu1 %v6227_v2  ;;  %4020 = vmatpush1.bf16.msra.mxu0 %v7875_v30 }
 0x1b0   : > { %1757 = vmatprep.mubr.f32.mxu1 %v6261_v25  ;;  %3824 = vmatpush1.bf16.msra.mxu1 %v3823_v48  ;;  %v7881_v48 = vld [vmem:[#allocation68_spill] sm:$0xff] }
 0x1b1   : > { %3826 = vmatprep.subr.bf16.mxu1 %v3825_v32  ;;  %3066 = vmatmul.mubr.f32.gmra.mrb[20].mxu0 %v7878_v36  ;;  %v3831_v39 = vpack.c.bf16 %v7881_v48, %v7880_v58  ;;  %v7885_v32 = vld [vmem:[#allocation71_spill] sm:$0xff]  ;;  %v7892_v58 = vld [vmem:[#allocation76_spill] sm:$0xff] }
 0x1b2   : > { %3072 = vmatprep.mubr.f32.mxu0 %v7879_v15  ;;  %4022 = vmatprep.subr.bf16.mxu0 %v7882_v51  ;;  %v3833_v52 = vpack.c.bf16 %v7885_v32, %v7884_v20  ;;  %v7893_v51 = vld [vmem:[#allocation124_spill] sm:$0xff]  ;;  %v7896_v20 = vld [vmem:[#allocation79_spill] sm:$0xff] }
 0x1b3   : > { %1759 = vmatmul.mubr.f32.gmra.mrb[18].mxu1 %v6271_v14  ;;  %4024 = vmatpush1.bf16.msra.mxu0 %v7883_v57  ;;  %v7894_v57 = vld [vmem:[#allocation129_spill] sm:$0xff] }
 0x1b4   : > { %1765 = vmatprep.mubr.f32.mxu1 %v7871_v45  ;;  %3828 = vmatpush1.bf16.msra.mxu1 %v3827_v62  ;;  %v7887_v62 = vld [vmem:[#allocation72_spill] sm:$0xff] }
 0x1b5   : > { %3830 = vmatprep.subr.bf16.mxu1 %v3829_v11  ;;  %3074 = vmatmul.mubr.f32.gmra.mrb[22].mxu0 %v6361_v49  ;;  %v3835_v30 = vpack.c.bf16 %v7888_v16, %v7887_v62  ;;  %v7891_v11 = vld [vmem:[#allocation75_spill] sm:$0xff]  ;;  %v7897_v62 = vld [vmem:[#allocation97_spill] sm:$0xff]  ;;  %v7899_v16 = vld [vmem:[#allocation80_spill] sm:$0xff] }
 0x1b6   : > { %3080 = vmatprep.mubr.f32.mxu0 %v7886_v10  ;;  %4026 = vmatprep.subr.bf16.mxu0 %v7889_v38  ;;  %v3837_v48 = vpack.c.bf16 %v7892_v58, %v7891_v11  ;;  %v7900_v38 = vld [vmem:[#allocation81_spill] sm:$0xff]  ;;  %v7901_v11 = vld [vmem:[#allocation131_spill] sm:$0xff] }
 0x1b7   : > { %1767 = vmatmul.mubr.f32.gmra.mrb[20].mxu1 %v7878_v36  ;;  %4028 = vmatpush1.bf16.msra.mxu0 %v7890_v54  ;;  %v3841_v54 = vpack.c.bf16 %v7900_v38, %v7899_v16  ;;  %v7902_v58 = vld [vmem:[#allocation133_spill] sm:$0xff]  ;;  %v7909_v16 = vld [vmem:[#allocation104_spill] sm:$0xff] }
 0x1b8   : > { %1773 = vmatprep.mubr.f32.mxu1 %v7879_v15  ;;  %3832 = vmatpush1.bf16.msra.mxu1 %v3831_v39  ;;  %v7895_v39 = vld [vmem:[#allocation77_spill] sm:$0xff] }
 0x1b9   : > { %3834 = vmatprep.subr.bf16.mxu1 %v3833_v52  ;;  %3082 = vmatmul.mubr.f32.gmra.mrb[24].mxu0 %v7893_v51  ;;  %v3839_v32 = vpack.c.bf16 %v7896_v20, %v7895_v39  ;;  %v7898_v52 = vld [vmem:[#allocation100_spill] sm:$0xff]  ;;  %v7905_v20 = vld [vmem:[#allocation101_spill] sm:$0xff] }
 0x1ba   : > { %3088 = vmatprep.mubr.f32.mxu0 %v7894_v57  ;;  %4030 = vmatprep.subr.bf16.mxu0 %v7897_v62  ;;  %v3845_v62 = vpack.c.bf16 %v7800_v47, %v7798_v21  ;;  %v3849_v21 = vpack.c.bf16 %v7805_v61, %v7806_v22  ;;  %v7910_v47 = vld [vmem:[#allocation105_spill] sm:$0xff]  ;;  %v7913_v61 = vld [vmem:[#allocation162_spill] sm:$0xff]  ;;  %v7914_v22 = vld [vmem:[#allocation163_spill] sm:$0xff] }
 0x1bb   : > { %1775 = vmatmul.mubr.f32.gmra.mrb[22].mxu1 %v6361_v49  ;;  %4032 = vmatpush1.bf16.msra.mxu0 %v7898_v52  ;;  %v7907_v52 = vld [vmem:[#allocation134_spill] sm:$0xff]  ;;  %v7917_v38 = vld [vmem:[#allocation141_spill] sm:$0xff] }
 0x1bc   : > { %1781 = vmatprep.mubr.f32.mxu1 %v7886_v10  ;;  %3836 = vmatpush1.bf16.msra.mxu1 %v3835_v30  ;;  %v7903_v30 = vld [vmem:[#allocation82_spill] sm:$0xff] }
 0x1bd   : > { %3838 = vmatprep.subr.bf16.mxu1 %v3837_v48  ;;  %3090 = vmatmul.mubr.f32.gmra.mrb[26].mxu0 %v7901_v11  ;;  %v3843_v39 = vpack.c.bf16 %v7904_v19, %v7903_v30  ;;  %v7906_v48 = vld [vmem:[#allocation102_spill] sm:$0xff]  ;;  %v3847_v19 = vpack.c.bf16 %v7795_v50, %v7793_v4  ;;  %v7912_v50 = vpack.c.bf16 %v7809_v24, %v7808_v34  ;;  %v7915_v34 = vld [vmem:[#allocation167_spill] sm:$0xff]  ;;  %v7916_v24 = vld [vmem:[#allocation168_spill] sm:$0xff] }
 0x1be   : > { %3096 = vmatprep.mubr.f32.mxu0 %v7902_v58  ;;  %4034 = vmatprep.subr.bf16.mxu0 %v7905_v20  ;;  %v7911_v4 = vld [vmem:[#allocation106_spill] sm:$0xff]  ;;  %v7919_v30 = vld [vmem:[#allocation145_spill] sm:$0xff]  ;;  %v7950_v20 = vld [vmem:[#allocation155_spill] sm:$0xff] }
 0x1bf   : > { %1783 = vmatmul.mubr.f32.gmra.mrb[24].mxu1 %v7893_v51  ;;  %4036 = vmatpush1.bf16.msra.mxu0 %v7906_v48  ;;  %v7962_v48 = vld [vmem:[#allocation136_spill] sm:$0xff] }
 0x1c0   : > { %1789 = vmatprep.mubr.f32.mxu1 %v7894_v57  ;;  %3840 = vmatpush1.bf16.msra.mxu1 %v3839_v32  ;;  %v7908_v32 = vld [vmem:[#allocation103_spill] sm:$0xff] }
 0x1c1   : > { %3842 = vmatprep.subr.bf16.mxu1 %v3841_v54  ;;  %3098 = vmatmul.mubr.f32.gmra.mrb[28].mxu0 %v7907_v52  ;;  %v7918_v54 = vld [vmem:[#allocation142_spill] sm:$0xff] }
 0x1c2   : > { %3104 = vmatprep.mubr.f32.mxu0 %v6495_v18  ;;  %4038 = vmatprep.subr.bf16.mxu0 %v7908_v32  ;;  %v775_v32 = vld [vmem:[%s7175_s2] sm:$0x3] }
 0x1c3   : > { %1791 = vmatmul.mubr.f32.gmra.mrb[26].mxu1 %v7901_v11  ;;  %4040 = vmatpush1.bf16.msra.mxu0 %v7909_v16 }
 0x1c4   : > { %1797 = vmatprep.mubr.f32.mxu1 %v7902_v58  ;;  %3844 = vmatpush1.bf16.msra.mxu1 %v3843_v39  ;;  %v7920_v39 = vld [vmem:[#allocation146_spill] sm:$0xff] }
 0x1c5   : > { %3846 = vmatprep.subr.bf16.mxu1 %v3845_v62  ;;  %3106 = vmatmul.mubr.f32.gmra.mrb[30].mxu0 %v6518_v63  ;;  %v777_v62 = vlaneseq }
 0x1c6   : > { %3112 = vmatprep.mubr.f32.mxu0 %v6541_v0  ;;  %4042 = vmatprep.subr.bf16.mxu0 %v7910_v47 }
 0x1c7   : > { %1799 = vmatmul.mubr.f32.gmra.mrb[28].mxu1 %v7907_v52  ;;  %4044 = vmatpush1.bf16.msra.mxu0 %v7911_v4 }
 0x1c8   : > { %1805 = vmatprep.mubr.f32.mxu1 %v6495_v18  ;;  %3848 = vmatpush1.bf16.msra.mxu1 %v3847_v19 }
 0x1c9   : > { %3850 = vmatprep.subr.bf16.mxu1 %v3849_v21  ;;  %3114 = vmatmul.mubr.f32.gmra.mrb[32].mxu0 %v6543_v46 }
 0x1ca   : > { %3120 = vmatprep.mubr.f32.mxu0 %v6545_v3 }
 0x1cb   : > { %1807 = vmatmul.mubr.f32.gmra.mrb[30].mxu1 %v6518_v63 }
 0x1cc   : > { %1813 = vmatprep.mubr.f32.mxu1 %v6541_v0  ;;  %3852 = vmatpush1.bf16.msra.mxu1 %v7912_v50 }
 0x1cd   : > { %3122 = vmatmul.mubr.f32.gmra.mrb[34].mxu0 %v6565_v12 }
 0x1ce   : > { %3128 = vmatprep.mubr.f32.mxu0 %v6568_v55 }
 0x1cf   : > { %1815 = vmatmul.mubr.f32.gmra.mrb[32].mxu1 %v6543_v46 }
 0x1d0   : > { %1821 = vmatprep.mubr.f32.mxu1 %v6545_v3 }
 0x1d1   : > { %3130 = vmatmul.mubr.f32.gmra.mrb[36].mxu0 %v6583_v6 }
 0x1d2   : > { %3136 = vmatprep.mubr.f32.mxu0 %v6600_v17 }
 0x1d3   : > { %1823 = vmatmul.mubr.f32.gmra.mrb[34].mxu1 %v6565_v12 }
 0x1d4   : > { %1829 = vmatprep.mubr.f32.mxu1 %v6568_v55 }
 0x1d5   : > { %3138 = vmatmul.mubr.f32.gmra.mrb[38].mxu0 %v6603_v1 }
 0x1d6   : > { %3144 = vmatprep.mubr.f32.mxu0 %v6624_v40 }
 0x1d7   : > { %1831 = vmatmul.mubr.f32.gmra.mrb[36].mxu1 %v6583_v6 }
 0x1d8   : > { %1837 = vmatprep.mubr.f32.mxu1 %v6600_v17 }
 0x1d9   : > { %3146 = vmatmul.mubr.f32.gmra.mrb[40].mxu0 %v7913_v61 }
 0x1da   : > { %3152 = vmatprep.mubr.f32.mxu0 %v7914_v22 }
 0x1db   : > { %1839 = vmatmul.mubr.f32.gmra.mrb[38].mxu1 %v6603_v1 }
 0x1dc   : > { %1845 = vmatprep.mubr.f32.mxu1 %v6624_v40 }
 0x1dd   : > { %3154 = vmatmul.mubr.f32.gmra.mrb[42].mxu0 %v7915_v34 }
 0x1de   : > { %3160 = vmatprep.mubr.f32.mxu0 %v7916_v24 }
 0x1df   : > { %1847 = vmatmul.mubr.f32.gmra.mrb[40].mxu1 %v7913_v61 }
 0x1e0   : > { %1853 = vmatprep.mubr.f32.mxu1 %v7914_v22 }
 0x1e1   : > { %3162 = vmatmul.mubr.f32.gmra.mrb[44].mxu0 %v6683_v7 }
 0x1e2   : > { %3168 = vmatprep.mubr.f32.mxu0 %v6697_v56 }
 0x1e3   : > { %1855 = vmatmul.mubr.f32.gmra.mrb[42].mxu1 %v7915_v34 }
 0x1e4   : > { %1861 = vmatprep.mubr.f32.mxu1 %v7916_v24 }
 0x1e5   : > { %3170 = vmatmul.mubr.f32.gmra.mrb[46].mxu0 %v6700_v5 }
 0x1e6   : > { %3305 = vmatprep.mubr.f32.mxu0 %v7814_v41  ;;  %v7921_v41 = vld [vmem:[#allocation147_spill] sm:$0xff] }
 0x1e7   : > { %1863 = vmatmul.mubr.f32.gmra.mrb[44].mxu1 %v6683_v7 }
 0x1e8   : > { %1869 = vmatprep.mubr.f32.mxu1 %v6697_v56 }
 0x1e9   : > { %3307 = vmatmul.mubr.f32.vlgmr.msra.gmra.mrb[0].mxu0 %v7815_v29  ;;  %v7922_v29 = vld [vmem:[#allocation148_spill] sm:$0xff] }
 0x1ea   : > { %3313 = vmatprep.mubr.f32.mxu0 %v7816_v27  ;;  %v7923_v27 = vld [vmem:[#allocation149_spill] sm:$0xff] }
 0x1eb   : > { %1871 = vmatmul.mubr.f32.gmra.mrb[46].mxu1 %v6700_v5 }
 0x1ec   : > { %2071 = vmatprep.mubr.f32.mxu1 %v7917_v38 }
 0x1ed   : > { %3315 = vmatmul.mubr.f32.gmra.mrb[2].mxu0 %v7823_v8  ;;  %v7924_v8 = vld [vmem:[#allocation150_spill] sm:$0xff] }
 0x1ee   : > { %3321 = vmatprep.mubr.f32.mxu0 %v5916_v42  ;;  %v7925_v42 = vld [vmem:[#allocation151_spill] sm:$0xff] }
 0x1ef   : > { %2074 = vmatmul.mubr.f32.vlgmr.msra.gmra.mrb[0].mxu1 %v7918_v54 }
 0x1f0   : > { %2081 = vmatprep.mubr.f32.mxu1 %v7919_v30 }
 0x1f1   : > { %3323 = vmatmul.mubr.f32.gmra.mrb[4].mxu0 %v5970_v9  ;;  %v7926_v9 = vld [vmem:[#allocation152_spill] sm:$0xff] }
 0x1f2   : > { %3329 = vmatprep.mubr.f32.mxu0 %v5973_v44  ;;  %v7927_v44 = vld [vmem:[#allocation110_spill] sm:$0xff] }
 0x1f3   : > { %2084 = vmatmul.mubr.f32.gmra.mrb[2].mxu1 %v7920_v39 }
 0x1f4   : > { %2091 = vmatprep.mubr.f32.mxu1 %v7921_v41 }
 0x1f5   : > { %3331 = vmatmul.mubr.f32.gmra.mrb[6].mxu0 %v6004_v35  ;;  %v7928_v35 = vld [vmem:[#allocation107_spill] sm:$0xff] }
 0x1f6   : > { %3337 = vmatprep.mubr.f32.mxu0 %v6033_v43  ;;  %v7929_v43 = vld [vmem:[#allocation108_spill] sm:$0xff] }
 0x1f7   : > { %2094 = vmatmul.mubr.f32.gmra.mrb[4].mxu1 %v7922_v29 }
 0x1f8   : > { %2101 = vmatprep.mubr.f32.mxu1 %v7923_v27 }
 0x1f9   : > { %3339 = vmatmul.mubr.f32.gmra.mrb[8].mxu0 %v6065_v37  ;;  %v7930_v37 = vld [vmem:[#allocation111_spill] sm:$0xff] }
 0x1fa   : > { %3345 = vmatprep.mubr.f32.mxu0 %v6094_v31  ;;  %v7931_v31 = vld [vmem:[#allocation109_spill] sm:$0xff] }
 0x1fb   : > { %2104 = vmatmul.mubr.f32.gmra.mrb[6].mxu1 %v7924_v8 }
 0x1fc   : > { %2111 = vmatprep.mubr.f32.mxu1 %v7925_v42 }
 0x1fd   : > { %3347 = vmatmul.mubr.f32.gmra.mrb[10].mxu0 %v6109_v23  ;;  %v7932_v23 = vld [vmem:[#allocation112_spill] sm:$0xff] }
 0x1fe   : > { %3353 = vmatprep.mubr.f32.mxu0 %v6136_v60  ;;  %v7933_v60 = vld [vmem:[#allocation114_spill] sm:$0xff] }
 0x1ff   : > { %2114 = vmatmul.mubr.f32.gmra.mrb[8].mxu1 %v7926_v9 }
 0x200   : > { %2121 = vmatprep.mubr.f32.mxu1 %v7927_v44 }
 0x201   : > { %3355 = vmatmul.mubr.f32.gmra.mrb[12].mxu0 %v6150_v53  ;;  %v7934_v53 = vld [vmem:[#allocation113_spill] sm:$0xff] }
 0x202   : > { %3361 = vmatprep.mubr.f32.mxu0 %v6167_v28  ;;  %v7935_v28 = vld [vmem:[#allocation115_spill] sm:$0xff] }
 0x203   : > { %2124 = vmatmul.mubr.f32.gmra.mrb[10].mxu1 %v7928_v35 }
 0x204   : > { %2131 = vmatprep.mubr.f32.mxu1 %v7929_v43 }
 0x205   : > { %3363 = vmatmul.mubr.f32.gmra.mrb[14].mxu0 %v6187_v26  ;;  %v7936_v26 = vld [vmem:[#allocation116_spill] sm:$0xff] }
 0x206   : > { %3369 = vmatprep.mubr.f32.mxu0 %v6219_v13  ;;  %v7937_v13 = vld [vmem:[#allocation118_spill] sm:$0xff] }
 0x207   : > { %2134 = vmatmul.mubr.f32.gmra.mrb[12].mxu1 %v7930_v37 }
 0x208   : > { %2141 = vmatprep.mubr.f32.mxu1 %v7931_v31 }
 0x209   : > { %3371 = vmatmul.mubr.f32.gmra.mrb[16].mxu0 %v6227_v2  ;;  %v7938_v2 = vld [vmem:[#allocation121_spill] sm:$0xff] }
 0x20a   : > { %3377 = vmatprep.mubr.f32.mxu0 %v6261_v25  ;;  %v7939_v25 = vld [vmem:[#allocation122_spill] sm:$0xff] }
 0x20b   : > { %2144 = vmatmul.mubr.f32.gmra.mrb[14].mxu1 %v7932_v23 }
 0x20c   : > { %2151 = vmatprep.mubr.f32.mxu1 %v7933_v60 }
 0x20d   : > { %3379 = vmatmul.mubr.f32.gmra.mrb[18].mxu0 %v6271_v14  ;;  %v7940_v14 = vld [vmem:[#allocation123_spill] sm:$0xff] }
 0x20e   : > { %3385 = vmatprep.mubr.f32.mxu0 %v7871_v45  ;;  %v7941_v45 = vld [vmem:[#allocation127_spill] sm:$0xff] }
 0x20f   : > { %2154 = vmatmul.mubr.f32.gmra.mrb[16].mxu1 %v7934_v53 }
 0x210   : > { %2161 = vmatprep.mubr.f32.mxu1 %v7935_v28 }
 0x211   : > { %3387 = vmatmul.mubr.f32.gmra.mrb[20].mxu0 %v7878_v36  ;;  %v7942_v36 = vld [vmem:[#allocation126_spill] sm:$0xff] }
 0x212   : > { %3393 = vmatprep.mubr.f32.mxu0 %v7879_v15  ;;  %v7943_v15 = vld [vmem:[#allocation128_spill] sm:$0xff] }
 0x213   : > { %2164 = vmatmul.mubr.f32.gmra.mrb[18].mxu1 %v7936_v26 }
 0x214   : > { %2171 = vmatprep.mubr.f32.mxu1 %v7937_v13 }
 0x215   : > { %3395 = vmatmul.mubr.f32.gmra.mrb[22].mxu0 %v6361_v49  ;;  %v7944_v49 = vld [vmem:[#allocation130_spill] sm:$0xff] }
 0x216   : > { %3401 = vmatprep.mubr.f32.mxu0 %v7886_v10  ;;  %v7945_v10 = vld [vmem:[#allocation132_spill] sm:$0xff] }
 0x217   : > { %2174 = vmatmul.mubr.f32.gmra.mrb[20].mxu1 %v7938_v2 }
 0x218   : > { %2181 = vmatprep.mubr.f32.mxu1 %v7939_v25 }
 0x219   : > { %3403 = vmatmul.mubr.f32.gmra.mrb[24].mxu0 %v7893_v51  ;;  %v7946_v51 = vld [vmem:[#allocation135_spill] sm:$0xff] }
 0x21a   : > { %3409 = vmatprep.mubr.f32.mxu0 %v7894_v57  ;;  %v7947_v57 = vld [vmem:[#allocation137_spill] sm:$0xff] }
 0x21b   : > { %2184 = vmatmul.mubr.f32.gmra.mrb[22].mxu1 %v7940_v14 }
 0x21c   : > { %2191 = vmatprep.mubr.f32.mxu1 %v7941_v45 }
 0x21d   : > { %3411 = vmatmul.mubr.f32.gmra.mrb[26].mxu0 %v7901_v11  ;;  %v7948_v11 = vld [vmem:[#allocation153_spill] sm:$0xff] }
 0x21e   : > { %3417 = vmatprep.mubr.f32.mxu0 %v7902_v58  ;;  %v7949_v58 = vld [vmem:[#allocation154_spill] sm:$0xff] }
 0x21f   : > { %2194 = vmatmul.mubr.f32.gmra.mrb[24].mxu1 %v7942_v36 }
 0x220   : > { %2201 = vmatprep.mubr.f32.mxu1 %v7943_v15 }
 0x221   : > { %3419 = vmatmul.mubr.f32.gmra.mrb[28].mxu0 %v7907_v52  ;;  %v778_v52 = vshrl.u32 %v777_v62, 7 }
 0x222   : > { %3425 = vmatprep.mubr.f32.mxu0 %v6495_v18  ;;  %v7951_v18 = vld [vmem:[#allocation156_spill] sm:$0xff] }
 0x223   : > { %2204 = vmatmul.mubr.f32.gmra.mrb[26].mxu1 %v7944_v49  ;;  %v779_v19 = vsub.s32 0, %v778_v52 }
 0x224   : > { %2211 = vmatprep.mubr.f32.mxu1 %v7945_v10 }
 0x225   : > { %3427 = vmatmul.mubr.f32.gmra.mrb[30].mxu0 %v6518_v63  ;;  %v7952_v63 = vld [vmem:[#allocation157_spill] sm:$0xff] }
 0x226   : > { %3433 = vmatprep.mubr.f32.mxu0 %v6541_v0  ;;  %v7953_v0 = vld [vmem:[#allocation158_spill] sm:$0xff] }
 0x227   : > { %2214 = vmatmul.mubr.f32.gmra.mrb[28].mxu1 %v7946_v51 }
 0x228   : > { %2221 = vmatprep.mubr.f32.mxu1 %v7947_v57 }
 0x229   : > { %3435 = vmatmul.mubr.f32.gmra.mrb[32].mxu0 %v6543_v46  ;;  %v7954_v46 = vld [vmem:[#allocation159_spill] sm:$0xff] }
 0x22a   : > { %3441 = vmatprep.mubr.f32.mxu0 %v6545_v3  ;;  %v7955_v3 = vld [vmem:[#allocation160_spill] sm:$0xff] }
 0x22b   : > { %2224 = vmatmul.mubr.f32.gmra.mrb[30].mxu1 %v7948_v11 }
 0x22c   : > { %2231 = vmatprep.mubr.f32.mxu1 %v7949_v58 }
 0x22d   : > { %3443 = vmatmul.mubr.f32.gmra.mrb[34].mxu0 %v6565_v12  ;;  %v7956_v12 = vld [vmem:[#allocation161_spill] sm:$0xff] }
 0x22e   : > { %3449 = vmatprep.mubr.f32.mxu0 %v6568_v55  ;;  %v7957_v55 = vld [vmem:[#allocation164_spill] sm:$0xff] }
 0x22f   : > { %2234 = vmatmul.mubr.f32.gmra.mrb[32].mxu1 %v7950_v20 }
 0x230   : > { %2241 = vmatprep.mubr.f32.mxu1 %v7951_v18 }
 0x231   : > { %3451 = vmatmul.mubr.f32.gmra.mrb[36].mxu0 %v6583_v6  ;;  %v7958_v6 = vld [vmem:[#allocation165_spill] sm:$0xff] }
 0x232   : > { %3457 = vmatprep.mubr.f32.mxu0 %v6600_v17  ;;  %v7959_v17 = vld [vmem:[#allocation166_spill] sm:$0xff] }
 0x233   : > { %2244 = vmatmul.mubr.f32.gmra.mrb[34].mxu1 %v7952_v63 }
 0x234   : > { %2251 = vmatprep.mubr.f32.mxu1 %v7953_v0 }
 0x235   : > { %3459 = vmatmul.mubr.f32.gmra.mrb[38].mxu0 %v6603_v1  ;;  %v7960_v1 = vld [vmem:[#allocation140_spill] sm:$0xff] }
 0x236   : > { %3465 = vmatprep.mubr.f32.mxu0 %v6624_v40  ;;  %v7961_v40 = vld [vmem:[#allocation169_spill] sm:$0xff] }
 0x237   : > { %2254 = vmatmul.mubr.f32.gmra.mrb[36].mxu1 %v7954_v46 }
 0x238   : > { %2261 = vmatprep.mubr.f32.mxu1 %v7955_v3 }
 0x239   : > { %3467 = vmatmul.mubr.f32.gmra.mrb[40].mxu0 %v7913_v61 }
 0x23a   : > { %3473 = vmatprep.mubr.f32.mxu0 %v7914_v22 }
 0x23b   : > { %2264 = vmatmul.mubr.f32.gmra.mrb[38].mxu1 %v7956_v12 }
 0x23c   : > { %2271 = vmatprep.mubr.f32.mxu1 %v7957_v55 }
 0x23d   : > { %3475 = vmatmul.mubr.f32.gmra.mrb[42].mxu0 %v7915_v34 }
 0x23e   : > { %3481 = vmatprep.mubr.f32.mxu0 %v7916_v24 }
 0x23f   : > { %2274 = vmatmul.mubr.f32.gmra.mrb[40].mxu1 %v7958_v6 }
 0x240   : > { %2281 = vmatprep.mubr.f32.mxu1 %v7959_v17 }
 0x241   : > { %3483 = vmatmul.mubr.f32.gmra.mrb[44].mxu0 %v6683_v7  ;;  %v783_v7 = vsub.s32 1, %v778_v52 }
 0x242   : > { %3489 = vmatprep.mubr.f32.mxu0 %v6697_v56  ;;  %v7018_v56 = vrot.slane %v775_v32, %v779_v19 }
 0x243   : > { %2284 = vmatmul.mubr.f32.gmra.mrb[42].mxu1 %v7960_v1  ;;  %v7020_v47 = vrot.slane %v775_v32, %v783_v7 }
 0x244   : > { %2291 = vmatprep.mubr.f32.mxu1 %v7961_v40 }
 0x245   : > { %3491 = vmatmul.mubr.f32.gmra.mrb[46].mxu0 %v6700_v5 }
 0x247   : > { %2294 = vmatmul.mubr.f32.gmra.mrb[44].mxu1 %v7962_v48 }
 0x248   : > { %2301 = vmatprep.mubr.f32.mxu1 %v6709_v59 }
 0x24b   : > { %2304 = vmatmul.mubr.f32.gmra.mrb[46].mxu1 %v6715_v33 }
 0x2bc   : > { %v3308_v16 = vpop.f32.mrb[0].mxu0 }
 0x2bd   : > { %v3310_v21 = vpop.f32.mrb[1].mxu0 }
 0x2c0   : > { %v3316_v4 = vpop.f32.mrb[2].mxu0 }
 0x2c1   : > { %v3318_v50 = vpop.f32.mrb[3].mxu0 }
 0x2c2   : > { %v2075_v5 = vpop.f32.mrb[0].mxu1 }
 0x2c3   : > { %v4045_v59 = vadd.f32 %v2075_v5, %v7018_v56  ;;  %v2077_v33 = vpop.f32.mrb[1].mxu1 }
 0x2c4   : > { %v4047_v61 = vadd.f32 %v2077_v33, %v7020_v47  ;;  %v3324_v38 = vpop.f32.mrb[4].mxu0 }
 0x2c5   : > { %v4046_v22 = vadd.f32 %v4045_v59, %v3308_v16  ;;  %v3326_v39 = vpop.f32.mrb[5].mxu0 }
 0x2c6   : > { %v4048_v34 = vadd.f32 %v4047_v61, %v3310_v21  ;;  %v2085_v24 = vpop.f32.mrb[2].mxu1 }
 0x2c7   : > { %3497 = vst [vmem:[%s7026_s8] sm:$0xff] %v4046_v22  ;;  %v4049_v54 = vadd.f32 %v2085_v24, %v7018_v56  ;;  %v2087_v30 = vpop.f32.mrb[3].mxu1 }
 0x2c8   : > { %3498 = vst [vmem:[%s7026_s8 + $0x8] sm:$0xff] %v4048_v34  ;;  %v4051_v41 = vadd.f32 %v2087_v30, %v7020_v47  ;;  %v3332_v42 = vpop.f32.mrb[6].mxu0 }
 0x2c9   : > { %v4050_v29 = vadd.f32 %v4049_v54, %v3316_v4  ;;  %v3334_v35 = vpop.f32.mrb[7].mxu0 }
 0x2ca   : > { %v4052_v27 = vadd.f32 %v4051_v41, %v3318_v50  ;;  %v2095_v8 = vpop.f32.mrb[4].mxu1 }
 0x2cb   : > { %3499 = vst [vmem:[%s7026_s8 + $0x10] sm:$0xff] %v4050_v29  ;;  %v4053_v9 = vadd.f32 %v2095_v8, %v7018_v56  ;;  %v2097_v44 = vpop.f32.mrb[5].mxu1 }
 0x2cc   : > { %3500 = vst [vmem:[%s7026_s8 + $0x18] sm:$0xff] %v4052_v27  ;;  %v4055_v43 = vadd.f32 %v2097_v44, %v7020_v47  ;;  %v3340_v60 = vpop.f32.mrb[8].mxu0 }
 0x2cd   : > { %v4054_v37 = vadd.f32 %v4053_v9, %v3324_v38  ;;  %v3342_v26 = vpop.f32.mrb[9].mxu0 }
 0x2ce   : > { %v4056_v31 = vadd.f32 %v4055_v43, %v3326_v39  ;;  %v2105_v23 = vpop.f32.mrb[6].mxu1 }
 0x2cf   : > { %3501 = vst [vmem:[%s7026_s8 + $0x20] sm:$0xff] %v4054_v37  ;;  %v4057_v53 = vadd.f32 %v2105_v23, %v7018_v56  ;;  %v2107_v28 = vpop.f32.mrb[7].mxu1 }
 0x2d0   : > { %3502 = vst [vmem:[%s7026_s8 + $0x28] sm:$0xff] %v4056_v31  ;;  %v4059_v13 = vadd.f32 %v2107_v28, %v7020_v47  ;;  %v3348_v45 = vpop.f32.mrb[10].mxu0 }
 0x2d1   : > { %v4058_v2 = vadd.f32 %v4057_v53, %v3332_v42  ;;  %v3350_v49 = vpop.f32.mrb[11].mxu0 }
 0x2d2   : > { %v4060_v25 = vadd.f32 %v4059_v13, %v3334_v35  ;;  %v2115_v14 = vpop.f32.mrb[8].mxu1 }
 0x2d3   : > { %3503 = vst [vmem:[%s7026_s8 + $0x30] sm:$0xff] %v4058_v2  ;;  %v4061_v36 = vadd.f32 %v2115_v14, %v7018_v56  ;;  %v2117_v15 = vpop.f32.mrb[9].mxu1 }
 0x2d4   : > { %3504 = vst [vmem:[%s7026_s8 + $0x38] sm:$0xff] %v4060_v25  ;;  %v4063_v10 = vadd.f32 %v2117_v15, %v7020_v47  ;;  %v3356_v58 = vpop.f32.mrb[12].mxu0 }
 0x2d5   : > { %v4062_v51 = vadd.f32 %v4061_v36, %v3340_v60  ;;  %v3358_v63 = vpop.f32.mrb[13].mxu0 }
 0x2d6   : > { %v4064_v57 = vadd.f32 %v4063_v10, %v3342_v26  ;;  %v2125_v11 = vpop.f32.mrb[10].mxu1 }
 0x2d7   : > { %3505 = vst [vmem:[%s7026_s8 + $0x40] sm:$0xff] %v4062_v51  ;;  %v4065_v20 = vadd.f32 %v2125_v11, %v7018_v56  ;;  %v2127_v18 = vpop.f32.mrb[11].mxu1 }
 0x2d8   : > { %3506 = vst [vmem:[%s7026_s8 + $0x48] sm:$0xff] %v4064_v57  ;;  %v4067_v0 = vadd.f32 %v2127_v18, %v7020_v47  ;;  %v3364_v55 = vpop.f32.mrb[14].mxu0 }
 0x2d9   : > { %v4066_v46 = vadd.f32 %v4065_v20, %v3348_v45  ;;  %v3366_v1 = vpop.f32.mrb[15].mxu0 }
 0x2da   : > { %v4068_v3 = vadd.f32 %v4067_v0, %v3350_v49  ;;  %v2135_v12 = vpop.f32.mrb[12].mxu1 }
 0x2db   : > { %3507 = vst [vmem:[%s7026_s8 + $0x50] sm:$0xff] %v4066_v46  ;;  %v4069_v6 = vadd.f32 %v2135_v12, %v7018_v56  ;;  %v2137_v17 = vpop.f32.mrb[13].mxu1 }
 0x2dc   : > { %3508 = vst [vmem:[%s7026_s8 + $0x58] sm:$0xff] %v4068_v3  ;;  %v4071_v40 = vadd.f32 %v2137_v17, %v7020_v47  ;;  %v3372_v19 = vpop.f32.mrb[16].mxu0 }
 0x2dd   : > { %v4070_v48 = vadd.f32 %v4069_v6, %v3356_v58  ;;  %v3374_v16 = vpop.f32.mrb[17].mxu0 }
 0x2de   : > { %v4072_v62 = vadd.f32 %v4071_v40, %v3358_v63  ;;  %v2145_v52 = vpop.f32.mrb[14].mxu1 }
 0x2df   : > { %3509 = vst [vmem:[%s7026_s8 + $0x60] sm:$0xff] %v4070_v48  ;;  %v4073_v32 = vadd.f32 %v2145_v52, %v7018_v56  ;;  %v2147_v7 = vpop.f32.mrb[15].mxu1 }
 0x2e0   : > { %3510 = vst [vmem:[%s7026_s8 + $0x68] sm:$0xff] %v4072_v62  ;;  %v4075_v21 = vadd.f32 %v2147_v7, %v7020_v47  ;;  %v3380_v33 = vpop.f32.mrb[18].mxu0 }
 0x2e1   : > { %v4074_v5 = vadd.f32 %v4073_v32, %v3364_v55  ;;  %v3382_v22 = vpop.f32.mrb[19].mxu0 }
 0x2e2   : > { %v4076_v4 = vadd.f32 %v4075_v21, %v3366_v1  ;;  %v2155_v59 = vpop.f32.mrb[16].mxu1 }
 0x2e3   : > { %3511 = vst [vmem:[%s7026_s8 + $0x70] sm:$0xff] %v4074_v5  ;;  %v4077_v50 = vadd.f32 %v2155_v59, %v7018_v56  ;;  %v2157_v61 = vpop.f32.mrb[17].mxu1 }
 0x2e4   : > { %3512 = vst [vmem:[%s7026_s8 + $0x78] sm:$0xff] %v4076_v4  ;;  %v4079_v34 = vadd.f32 %v2157_v61, %v7020_v47  ;;  %v3388_v30 = vpop.f32.mrb[20].mxu0 }
 0x2e5   : > { %v4078_v24 = vadd.f32 %v4077_v50, %v3372_v19  ;;  %v3390_v29 = vpop.f32.mrb[21].mxu0 }
 0x2e6   : > { %v4080_v38 = vadd.f32 %v4079_v34, %v3374_v16  ;;  %v2165_v54 = vpop.f32.mrb[18].mxu1 }
 0x2e7   : > { %3513 = vst [vmem:[%s7026_s8 + $0x80] sm:$0xff] %v4078_v24  ;;  %v4081_v39 = vadd.f32 %v2165_v54, %v7018_v56  ;;  %v2167_v41 = vpop.f32.mrb[19].mxu1 }
 0x2e8   : > { %3514 = vst [vmem:[%s7026_s8 + $0x88] sm:$0xff] %v4080_v38  ;;  %v4083_v27 = vadd.f32 %v2167_v41, %v7020_v47  ;;  %v3396_v44 = vpop.f32.mrb[22].mxu0 }
 0x2e9   : > { %v4082_v8 = vadd.f32 %v4081_v39, %v3380_v33  ;;  %v3398_v37 = vpop.f32.mrb[23].mxu0 }
 0x2ea   : > { %v4084_v42 = vadd.f32 %v4083_v27, %v3382_v22  ;;  %v2175_v9 = vpop.f32.mrb[20].mxu1 }
 0x2eb   : > { %3515 = vst [vmem:[%s7026_s8 + $0x90] sm:$0xff] %v4082_v8  ;;  %v4085_v35 = vadd.f32 %v2175_v9, %v7018_v56  ;;  %v2177_v43 = vpop.f32.mrb[21].mxu1 }
 0x2ec   : > { %3516 = vst [vmem:[%s7026_s8 + $0x98] sm:$0xff] %v4084_v42  ;;  %v4087_v31 = vadd.f32 %v2177_v43, %v7020_v47  ;;  %v3404_v28 = vpop.f32.mrb[24].mxu0 }
 0x2ed   : > { %v4086_v23 = vadd.f32 %v4085_v35, %v3388_v30  ;;  %v3406_v2 = vpop.f32.mrb[25].mxu0 }
 0x2ee   : > { %v4088_v60 = vadd.f32 %v4087_v31, %v3390_v29  ;;  %v2185_v53 = vpop.f32.mrb[22].mxu1 }
 0x2ef   : > { %3517 = vst [vmem:[%s7026_s8 + $0xa0] sm:$0xff] %v4086_v23  ;;  %v4089_v26 = vadd.f32 %v2185_v53, %v7018_v56  ;;  %v2187_v13 = vpop.f32.mrb[23].mxu1 }
 0x2f0   : > { %3518 = vst [vmem:[%s7026_s8 + $0xa8] sm:$0xff] %v4088_v60  ;;  %v4091_v25 = vadd.f32 %v2187_v13, %v7020_v47  ;;  %v3412_v15 = vpop.f32.mrb[26].mxu0 }
 0x2f1   : > { %v4090_v14 = vadd.f32 %v4089_v26, %v3396_v44  ;;  %v3414_v51 = vpop.f32.mrb[27].mxu0 }
 0x2f2   : > { %v4092_v45 = vadd.f32 %v4091_v25, %v3398_v37  ;;  %v2195_v36 = vpop.f32.mrb[24].mxu1 }
 0x2f3   : > { %3519 = vst [vmem:[%s7026_s8 + $0xb0] sm:$0xff] %v4090_v14  ;;  %v4093_v49 = vadd.f32 %v2195_v36, %v7018_v56  ;;  %v2197_v10 = vpop.f32.mrb[25].mxu1 }
 0x2f4   : > { %3520 = vst [vmem:[%s7026_s8 + $0xb8] sm:$0xff] %v4092_v45  ;;  %v4095_v57 = vadd.f32 %v2197_v10, %v7020_v47  ;;  %v3420_v18 = vpop.f32.mrb[28].mxu0 }
 0x2f5   : > { %v4094_v11 = vadd.f32 %v4093_v49, %v3404_v28  ;;  %v3422_v46 = vpop.f32.mrb[29].mxu0 }
 0x2f6   : > { %v4096_v58 = vadd.f32 %v4095_v57, %v3406_v2  ;;  %v2205_v20 = vpop.f32.mrb[26].mxu1 }
 0x2f7   : > { %3521 = vst [vmem:[%s7026_s8 + $0xc0] sm:$0xff] %v4094_v11  ;;  %v4097_v63 = vadd.f32 %v2205_v20, %v7018_v56  ;;  %v2207_v0 = vpop.f32.mrb[27].mxu1 }
 0x2f8   : > { %3522 = vst [vmem:[%s7026_s8 + $0xc8] sm:$0xff] %v4096_v58  ;;  %v4099_v3 = vadd.f32 %v2207_v0, %v7020_v47  ;;  %v3428_v17 = vpop.f32.mrb[30].mxu0 }
 0x2f9   : > { %v4098_v12 = vadd.f32 %v4097_v63, %v3412_v15  ;;  %v3430_v48 = vpop.f32.mrb[31].mxu0 }
 0x2fa   : > { %v4100_v55 = vadd.f32 %v4099_v3, %v3414_v51  ;;  %v2215_v6 = vpop.f32.mrb[28].mxu1 }
 0x2fb   : > { %3523 = vst [vmem:[%s7026_s8 + $0xd0] sm:$0xff] %v4098_v12  ;;  %v4101_v1 = vadd.f32 %v2215_v6, %v7018_v56  ;;  %v2217_v40 = vpop.f32.mrb[29].mxu1 }
 0x2fc   : > { %3524 = vst [vmem:[%s7026_s8 + $0xd8] sm:$0xff] %v4100_v55  ;;  %v4103_v62 = vadd.f32 %v2217_v40, %v7020_v47  ;;  %v3436_v7 = vpop.f32.mrb[32].mxu0 }
 0x2fd   : > { %v4102_v52 = vadd.f32 %v4101_v1, %v3420_v18  ;;  %v3438_v5 = vpop.f32.mrb[33].mxu0 }
 0x2fe   : > { %v4104_v19 = vadd.f32 %v4103_v62, %v3422_v46  ;;  %v2225_v32 = vpop.f32.mrb[30].mxu1 }
 0x2ff   : > { %3525 = vst [vmem:[%s7026_s8 + $0xe0] sm:$0xff] %v4102_v52  ;;  %v4105_v16 = vadd.f32 %v2225_v32, %v7018_v56  ;;  %v2227_v21 = vpop.f32.mrb[31].mxu1 }
 0x300   : > { %3526 = vst [vmem:[%s7026_s8 + $0xe8] sm:$0xff] %v4104_v19  ;;  %v4107_v4 = vadd.f32 %v2227_v21, %v7020_v47  ;;  %v3444_v61 = vpop.f32.mrb[34].mxu0 }
 0x301   : > { %v4106_v59 = vadd.f32 %v4105_v16, %v3428_v17  ;;  %v3446_v24 = vpop.f32.mrb[35].mxu0 }
 0x302   : > { %v4108_v33 = vadd.f32 %v4107_v4, %v3430_v48  ;;  %v2235_v50 = vpop.f32.mrb[32].mxu1 }
 0x303   : > { %3527 = vst [vmem:[%s7026_s8 + $0xf0] sm:$0xff] %v4106_v59  ;;  %v4109_v22 = vadd.f32 %v2235_v50, %v7018_v56  ;;  %v2237_v34 = vpop.f32.mrb[33].mxu1 }
 0x304   : > { %3528 = vst [vmem:[%s7026_s8 + $0xf8] sm:$0xff] %v4108_v33  ;;  %v4111_v38 = vadd.f32 %v2237_v34, %v7020_v47  ;;  %v3452_v41 = vpop.f32.mrb[36].mxu0 }
 0x305   : > { %v4110_v54 = vadd.f32 %v4109_v22, %v3436_v7  ;;  %v3454_v8 = vpop.f32.mrb[37].mxu0 }
 0x306   : > { %v4112_v30 = vadd.f32 %v4111_v38, %v3438_v5  ;;  %v2245_v39 = vpop.f32.mrb[34].mxu1 }
 0x307   : > { %3529 = vst [vmem:[%s7026_s8 + $0x100] sm:$0xff] %v4110_v54  ;;  %v4113_v29 = vadd.f32 %v2245_v39, %v7018_v56  ;;  %v2247_v27 = vpop.f32.mrb[35].mxu1 }
 0x308   : > { %3530 = vst [vmem:[%s7026_s8 + $0x108] sm:$0xff] %v4112_v30  ;;  %v4115_v42 = vadd.f32 %v2247_v27, %v7020_v47  ;;  %v3460_v43 = vpop.f32.mrb[38].mxu0 }
 0x309   : > { %v4114_v9 = vadd.f32 %v4113_v29, %v3444_v61  ;;  %v3462_v23 = vpop.f32.mrb[39].mxu0 }
 0x30a   : > { %v4116_v44 = vadd.f32 %v4115_v42, %v3446_v24  ;;  %v2255_v35 = vpop.f32.mrb[36].mxu1 }
 0x30b   : > { %3531 = vst [vmem:[%s7026_s8 + $0x110] sm:$0xff] %v4114_v9  ;;  %v4117_v37 = vadd.f32 %v2255_v35, %v7018_v56  ;;  %v2257_v31 = vpop.f32.mrb[37].mxu1 }
 0x30c   : > { %3532 = vst [vmem:[%s7026_s8 + $0x118] sm:$0xff] %v4116_v44  ;;  %v4119_v60 = vadd.f32 %v2257_v31, %v7020_v47  ;;  %v3468_v13 = vpop.f32.mrb[40].mxu0 }
 0x30d   : > { %v4118_v53 = vadd.f32 %v4117_v37, %v3452_v41  ;;  %v3470_v14 = vpop.f32.mrb[41].mxu0 }
 0x30e   : > { %v4120_v28 = vadd.f32 %v4119_v60, %v3454_v8  ;;  %v2265_v26 = vpop.f32.mrb[38].mxu1 }
 0x30f   : > { %3533 = vst [vmem:[%s7026_s8 + $0x120] sm:$0xff] %v4118_v53  ;;  %v4121_v2 = vadd.f32 %v2265_v26, %v7018_v56  ;;  %v2267_v25 = vpop.f32.mrb[39].mxu1 }
 0x310   : > { %3534 = vst [vmem:[%s7026_s8 + $0x128] sm:$0xff] %v4120_v28  ;;  %v4123_v45 = vadd.f32 %v2267_v25, %v7020_v47  ;;  %v3476_v10 = vpop.f32.mrb[42].mxu0 }
 0x311   : > { %v4122_v36 = vadd.f32 %v4121_v2, %v3460_v43  ;;  %v3478_v11 = vpop.f32.mrb[43].mxu0 }
 0x312   : > { %v4124_v15 = vadd.f32 %v4123_v45, %v3462_v23  ;;  %v2275_v49 = vpop.f32.mrb[40].mxu1 }
 0x313   : > { %3535 = vst [vmem:[%s7026_s8 + $0x130] sm:$0xff] %v4122_v36  ;;  %v4125_v51 = vadd.f32 %v2275_v49, %v7018_v56  ;;  %v2277_v57 = vpop.f32.mrb[41].mxu1 }
 0x314   : > { %3536 = vst [vmem:[%s7026_s8 + $0x138] sm:$0xff] %v4124_v15  ;;  %v4127_v58 = vadd.f32 %v2277_v57, %v7020_v47  ;;  %v3484_v0 = vpop.f32.mrb[44].mxu0 }
 0x315   : > { %v4126_v20 = vadd.f32 %v4125_v51, %v3468_v13  ;;  %v3486_v12 = vpop.f32.mrb[45].mxu0 }
 0x316   : > { %v4128_v18 = vadd.f32 %v4127_v58, %v3470_v14  ;;  %v2285_v63 = vpop.f32.mrb[42].mxu1 }
 0x317   : > { %3537 = vst [vmem:[%s7026_s8 + $0x140] sm:$0xff] %v4126_v20  ;;  %v4129_v46 = vadd.f32 %v2285_v63, %v7018_v56  ;;  %v2287_v3 = vpop.f32.mrb[43].mxu1 }
 0x318   : > { %3538 = vst [vmem:[%s7026_s8 + $0x148] sm:$0xff] %v4128_v18  ;;  %v4131_v55 = vadd.f32 %v2287_v3, %v7020_v47  ;;  %v3492_v40 = vpop.f32.mrb[46].mxu0 }
 0x319   : > { %v4130_v6 = vadd.f32 %v4129_v46, %v3476_v10  ;;  %v3494_v52 = vpop.f32.mrb[47].mxu0 }
 0x31a   : > { %v4132_v17 = vadd.f32 %v4131_v55, %v3478_v11  ;;  %v2295_v1 = vpop.f32.mrb[44].mxu1 }
 0x31b   : > { %3539 = vst [vmem:[%s7026_s8 + $0x150] sm:$0xff] %v4130_v6  ;;  %v4133_v48 = vadd.f32 %v2295_v1, %v7018_v56  ;;  %v2297_v62 = vpop.f32.mrb[45].mxu1 }
 0x31c   : > { %3540 = vst [vmem:[%s7026_s8 + $0x158] sm:$0xff] %v4132_v17  ;;  %v4135_v19 = vadd.f32 %v2297_v62, %v7020_v47 }
 0x31d   : > { %v4134_v32 = vadd.f32 %v4133_v48, %v3484_v0 }
 0x31e   : > { %v4136_v7 = vadd.f32 %v4135_v19, %v3486_v12  ;;  %v2305_v16 = vpop.f32.mrb[46].mxu1 }
 0x31f   : > { %3541 = vst [vmem:[%s7026_s8 + $0x160] sm:$0xff] %v4134_v32  ;;  %v4137_v21 = vadd.f32 %v2305_v16, %v7018_v56  ;;  %v2307_v5 = vpop.f32.mrb[47].mxu1 }
 0x320   : > { %3542 = vst [vmem:[%s7026_s8 + $0x168] sm:$0xff] %v4136_v7  ;;  %v4139_v4 = vadd.f32 %v2307_v5, %v7020_v47 }
 0x321   : > { %v4138_v59 = vadd.f32 %v4137_v21, %v3492_v40 }
 0x322   : > { %v4140_v33 = vadd.f32 %v4139_v4, %v3494_v52 }
 0x323   : > { %3543 = vst [vmem:[%s7026_s8 + $0x170] sm:$0xff] %v4138_v59 }
 0x324   : > { %3544 = vst [vmem:[%s7026_s8 + $0x178] sm:$0xff] %v4140_v33 }
 0x325   : > { %4563 = shalt.err (!%p4560_p7)
}
 0x326   : > { %s4564_s26 = scalar_lea.hbm %s7125_s11, 6144  ;;  %s4568_s10 = scalar_lea.hbm %s7176_s3, 12288 }
 0x327   : > { %p4565_p9 = scmp.ne.s32.totalorder %s7125_s11, %s4564_s26  ;;  %p4569_p5 = scmp.lt.u32.totalorder %s7125_s11, %s7176_s3 }
 0x328   : > { %p4570_p13 = scmp.lt.u32.totalorder %s4568_s10, %s4564_s26  ;;  %p4572_p4 = scmp.lt.u32.totalorder %s4564_s26, %s7125_s11 }
 0x329   : > { %p4566_p1 = pnand %p4565_p9, %p4743_p12 }
 0x32a   : > { %p4571_p2 = por %p4570_p13, %p4569_p5 }
 0x32b   : > { %p4567_p0 = pneg %p4566_p1 }
 0x32c   : > { %p4573_p6 = por %p4572_p4, %p4571_p2 }
 0x32e   : > { %p4574_p8 = pnand %p4573_p6, %p4567_p0 }
 0x330   : > { %4577 = shalt.err (!%p4574_p8)
}
 0x331   : > { %s4627_s20 = smov 256   ;;  %s4628_s8 = smov 16  }
 0x332   : > { %4341 = dma.vmem_to_hbm [thread:$0]  (%p4743_p12), %s7127_s25, 6144, %s7125_s11, %s3546_s16, %s4627_s20, %s4627_s20, %s4628_s8  }
 0x333 PF: > { %s3575_s9 = sand.u32 1, %s4608_s12   ;;  %p7963_p10 = scmp.ne.s32.totalorder %s7405_s19, 0 }
 0x334   : > { %p7964_p11 = scmp.ge.s32.totalorder %s4620_s15, 2  ;;  %s3576_s4 = scalar_lea.sflag [#allocation4], %s3575_s9 }
 0x336   : > { %p4352_p3 = pnand %p7964_p11, %p7963_p10 }
 0x338   : > { %4603 = dma.done.wait (!%p4352_p3), %s3576_s4, 6144  }
 0x339   : > { %4605 = vsyncadd (!%p4352_p3), %s3576_s4, 4294961152  ;;  %p17_p7 = scmp.ge.s32.totalorder %s4705_s24, 4   ;;  %s7965_s12 = smov %s4612_s13 }
 0x33a   : > { %s7966_s13 = smov %s4616_s14  ;;  %s7967_s14 = smov %s4739_s17 }
 0x33b   : > { %s7968_s15 = smov %s4705_s24  ;;  %19 = sbr.rel (!%p17_p7) target bundleno = 6 (0x6), region = 81 }
 0x342   :  { %3581 = vsyncpa [#allocation3], 1 }
 0x343   :  { %3583 = vsyncpa [#allocation3 + $0x1], 1 }
 0x344   :  { %3584 = vsyncpa [#allocation6], 1 }
 0x345   :  { %3585 = vsyncpa [#allocation4], 1 }
 0x346   :  { %3587 = vsyncpa [#allocation4 + $0x1], 1 }

</bundles_post_ra>
